<compile_context>
chip_gen: v7x
topology: tpu7x:2x2x1
jax: 0.10.0
libtpu: 0.0.40
codegen_flags: <defaults>
</compile_context>

<pallas_src>
import functools
import math

import jax
import jax.numpy as jnp
from jax.experimental import pallas as pl
from jax.experimental.pallas import tpu as pltpu


def _round_up(x, m):
    return (x + m - 1) // m * m


# --------------------------------------------------------------------------
# Fused kernel: the whole NeckSectionConv forward for one image per grid step.
# --------------------------------------------------------------------------
def _neck_section_kernel(xph_ref, p_ref, mask_ref,
                         wdn_ref, bdn_ref,
                         w1i_ref, w1p_ref, b1_ref,
                         wm_ref, bm_ref,
                         w2_ref, b2_ref,
                         o_ref,
                         *, wp, n_bottleneck, shortcut):
    cdt = xph_ref.dtype                   # MXU operand dtype (bf16)
    mask = mask_ref[...]                  # (1, Rpad) f32; 1.0 on valid pixels
    rp = mask.shape[-1]                   # Rpad (multiple of 128)
    guard = wp + 1                        # largest |lane shift| of any 3x3 tap

    def extend(x):
        """Zero guard band on both lane ends so every tap is a pure slice."""
        z = jnp.zeros((x.shape[0], guard), x.dtype)
        return jnp.concatenate([z, x, z], axis=-1)

    def silu_mask(acc):
        """SiLU on the f32 accumulator, re-zero the pad lanes, cast to bf16."""
        # (pl.reciprocal(1+exp(-acc), approx=True) would push the divide to the
        #  EUP; kept exact here since the kernel is memory-bound.)
        y = acc * jax.nn.sigmoid(acc)
        return (y * mask).astype(cdt)

    def conv_taps(taps, bias):
        """taps: [(extended plane (Cin, Rpad+2*guard), lane shift, (Cout, Cin))]."""
        acc = None
        for xe, d, w in taps:
            xs = xe[:, guard + d:guard + d + rp]          # shifted, zero-filled
            part = jnp.dot(w, xs, preferred_element_type=jnp.float32)
            acc = part if acc is None else acc + part
        return silu_mask(acc + bias)

    # ---- 3x3 / stride-2 downsample conv over 4 space-to-depth phase planes --
    phases = [extend(xph_ref[0, k]) for k in range(4)]
    taps = []
    for ky in range(3):
        for kx in range(3):
            taps.append((phases[(ky % 2) * 2 + (kx % 2)],
                         (ky // 2) * wp + (kx // 2),
                         wdn_ref[ky * 3 + kx]))
    xd = conv_taps(taps, bdn_ref[...])                    # (Ci, Rpad)

    # ---- C2f.cv1 (1x1) on concat(xd, p): concat folded into weight column
    #      slices, .chunk(2, dim=1) folded into weight row slices -------------
    pp = p_ref[0]                                         # (Cp, Rpad)
    ys = []
    for chunk in range(2):
        acc = (jnp.dot(w1i_ref[chunk], xd, preferred_element_type=jnp.float32)
               + jnp.dot(w1p_ref[chunk], pp, preferred_element_type=jnp.float32))
        ys.append(silu_mask(acc + b1_ref[chunk]))         # (c, Rpad)

    # ---- n sequential Bottlenecks (two 3x3 convs each), all kept in VMEM ----
    def conv3x3(x, w9, b):
        xe = extend(x)
        t = [(xe, (ky - 1) * wp + (kx - 1), w9[ky * 3 + kx])
             for ky in range(3) for kx in range(3)]
        return conv_taps(t, b)

    cur = ys[-1]
    for k in range(n_bottleneck):
        h = conv3x3(cur, wm_ref[2 * k], bm_ref[2 * k])
        y_k = conv3x3(h, wm_ref[2 * k + 1], bm_ref[2 * k + 1])
        if shortcut:                                      # Bottleneck.add
            y_k = (cur.astype(jnp.float32)
                   + y_k.astype(jnp.float32)).astype(cdt)
        ys.append(y_k)
        cur = y_k

    # ---- C2f.cv2 (1x1) on concat(ys): folded into per-chunk matmuls ---------
    acc = b2_ref[...]                                     # (c2, 1) f32
    for j, yj in enumerate(ys):
        acc = acc + jnp.dot(w2_ref[j], yj, preferred_element_type=jnp.float32)
    o_ref[0] = silu_mask(acc)


# --------------------------------------------------------------------------
# Wrapper: layout/packing glue (cheap XLA ops) + the single pallas_call.
# --------------------------------------------------------------------------
def neck_section_conv(i_nchw, p_nchw, params, *, shortcut=False,
                      compute_dtype=jnp.bfloat16):
    """NeckSectionConv.forward(i, p) -> (N, c2, H/2, W/2); NCHW in/out."""
    n, ci, hi, wi = i_nchw.shape
    np_, cp, ho, wo = p_nchw.shape
    assert np_ == n and hi == 2 * ho and wi == 2 * wo

    wdn, bdn = params["conv"]
    w1, b1 = params["cv1"]
    w2, b2 = params["cv2"]
    m = params["m"]
    nb = len(m) // 2
    c = w1.shape[0] // 2
    c2 = w2.shape[0]
    assert wdn.shape[:2] == (ci, ci) and w1.shape[1] == ci + cp
    assert w2.shape[1] == (2 + nb) * c

    hp, wp = ho + 2, wo + 2
    r = hp * wp
    rpad = _round_up(r, 128)              # lane-dense activation width

    def to_flat(x4d):                     # (N, C, Hp, Wp) -> (N, C, Rpad)
        x4d = x4d.reshape(x4d.shape[0], x4d.shape[1], r)
        return jnp.pad(x4d, ((0, 0), (0, 0), (0, rpad - r)))

    # 4 space-to-depth phase planes of the zero-padded high-res input i
    # (replaces the 9x materialized im2col with ~1x input traffic).
    xp = jnp.pad(i_nchw.astype(compute_dtype), ((0, 0), (0, 0), (1, 1), (1, 1)))
    planes = []
    for pa in range(2):
        for pb in range(2):
            ph = xp[:, :, pa::2, pb::2]                       # (N, Ci, Ho+1, Wo+1)
            ph = jnp.pad(ph, ((0, 0), (0, 0), (1, 0), (1, 0)))  # -> (N, Ci, Hp, Wp)
            planes.append(to_flat(ph))
    xph = jnp.stack(planes, axis=1)                           # (N, 4, Ci, Rpad)

    pf = to_flat(jnp.pad(p_nchw.astype(compute_dtype),
                         ((0, 0), (0, 0), (1, 1), (1, 1))))   # (N, Cp, Rpad)

    mask = jnp.pad(jnp.ones((1, ho, wo), jnp.float32), ((0, 0), (1, 1), (1, 1)))
    mask = jnp.pad(mask.reshape(1, r), ((0, 0), (0, rpad - r)))  # (1, Rpad) f32

    # ---- weights: repack every conv into tap-matmul form (free XLA glue) ----
    def taps9(w):                          # (Cout, Cin, 3, 3) -> (9, Cout, Cin)
        return jnp.stack([w[:, :, t // 3, t % 3] for t in range(9)], axis=0)

    wdn9 = taps9(wdn).astype(compute_dtype)                   # (9, Ci, Ci)
    bdn2 = bdn.reshape(ci, 1).astype(jnp.float32)

    w1m = w1.reshape(2 * c, ci + cp)
    w1i = w1m[:, :ci].reshape(2, c, ci).astype(compute_dtype)
    w1p = w1m[:, ci:].reshape(2, c, cp).astype(compute_dtype)
    b1s = b1.reshape(2, c, 1).astype(jnp.float32)

    wm = jnp.stack([taps9(wk) for wk, _ in m], axis=0).astype(compute_dtype)
    bm = jnp.stack([bk for _, bk in m], axis=0).reshape(2 * nb, c, 1)
    bm = bm.astype(jnp.float32)

    w2s = jnp.transpose(w2.reshape(c2, 2 + nb, c), (1, 0, 2)).astype(compute_dtype)
    b2s = b2.reshape(c2, 1).astype(jnp.float32)

    kernel = functools.partial(_neck_section_kernel, wp=wp, n_bottleneck=nb,
                               shortcut=shortcut)

    out_flat = pl.pallas_call(
        kernel,
        out_shape=jax.ShapeDtypeStruct((n, c2, rpad), compute_dtype),
        grid=(n,),                                   # one image per grid step
        in_specs=[
            pl.BlockSpec((1, 4, ci, rpad), lambda bi: (bi, 0, 0, 0)),
            pl.BlockSpec((1, cp, rpad), lambda bi: (bi, 0, 0)),
            pl.BlockSpec((1, rpad), lambda bi: (0, 0)),
            pl.BlockSpec((9, ci, ci), lambda bi: (0, 0, 0)),
            pl.BlockSpec((ci, 1), lambda bi: (0, 0)),
            pl.BlockSpec((2, c, ci), lambda bi: (0, 0, 0)),
            pl.BlockSpec((2, c, cp), lambda bi: (0, 0, 0)),
            pl.BlockSpec((2, c, 1), lambda bi: (0, 0, 0)),
            pl.BlockSpec((2 * nb, 9, c, c), lambda bi: (0, 0, 0, 0)),
            pl.BlockSpec((2 * nb, c, 1), lambda bi: (0, 0, 0)),
            pl.BlockSpec((2 + nb, c2, c), lambda bi: (0, 0, 0)),
            pl.BlockSpec((c2, 1), lambda bi: (0, 0)),
        ],
        out_specs=pl.BlockSpec((1, c2, rpad), lambda bi: (bi, 0, 0)),
        compiler_params=pltpu.CompilerParams(
            dimension_semantics=("parallel",),       # v7x: both TCs get images
            vmem_limit_bytes=48 * 1024 * 1024,       # > scoped defaults, < v7x phys
        ),
    )(xph, pf, mask, wdn9, bdn2, w1i, w1p, b1s, wm, bm, w2s, b2s)

    out = out_flat[:, :, :r].reshape(n, c2, hp, wp)[:, :, 1:ho + 1, 1:wo + 1]
    return out.astype(i_nchw.dtype)


# --------------------------------------------------------------------------
# Parameters (BatchNorm folded into the conv weights, inference semantics).
# --------------------------------------------------------------------------
MAX_CHANNELS = 768 // 4
WIDTH_SCALE = 2


def get_channels(x):
    limit = min(x, MAX_CHANNELS) * WIDTH_SCALE
    return int(math.ceil(limit / 8) * 8)


def _fold_bn(w, gamma, beta, mean, var, eps=1e-5):
    scale = gamma / jnp.sqrt(var + eps)
    return w * scale[:, None, None, None], beta - mean * scale


def make_conv_params(key, c_in, c_out, k):
    k1, k2, k3, k4, k5 = jax.random.split(key, 5)
    fan_in = c_in * k * k
    w = jax.random.normal(k1, (c_out, c_in, k, k), jnp.float32) / math.sqrt(fan_in)
    gamma = 1.0 + 0.1 * jax.random.normal(k2, (c_out,), jnp.float32)
    beta = 0.1 * jax.random.normal(k3, (c_out,), jnp.float32)
    mean = 0.1 * jax.random.normal(k4, (c_out,), jnp.float32)
    var = jnp.abs(jax.random.normal(k5, (c_out,), jnp.float32)) + 0.5
    return _fold_bn(w, gamma, beta, mean, var)


def init_neck_params(key, li_cn, lp_cn, cn, n_bottleneck=3):
    c2 = get_channels(cn)
    c = c2 // 2                            # C2f hidden width (e=0.5)
    keys = jax.random.split(key, 3 + 2 * n_bottleneck)
    return {
        "conv": make_conv_params(keys[0], li_cn, li_cn, 3),          # 3x3, s=2
        "cv1": make_conv_params(keys[1], li_cn + lp_cn, 2 * c, 1),
        "cv2": make_conv_params(keys[2], (2 + n_bottleneck) * c, c2, 1),
        "m": [make_conv_params(keys[3 + j], c, c, 3)
              for j in range(2 * n_bottleneck)],
    }


# --------------------------------------------------------------------------
# Pure-JAX reference (same bf16/f32 mixed precision) for a sanity check.
# --------------------------------------------------------------------------
def reference_forward(i_nchw, p_nchw, params, *, shortcut=False,
                      compute_dtype=jnp.bfloat16):
    def conv_bn_silu(x, w, b, stride):
        pad = ((1, 1), (1, 1)) if w.shape[-1] == 3 else ((0, 0), (0, 0))
        y = jax.lax.conv_general_dilated(
            x.astype(compute_dtype), w.astype(compute_dtype),
            window_strides=(stride, stride), padding=pad,
            dimension_numbers=("NCHW", "OIHW", "NCHW"),
            preferred_element_type=jnp.float32)
        y = y + b[None, :, None, None]
        return (y * jax.nn.sigmoid(y)).astype(compute_dtype)

    wdn, bdn = params["conv"]
    w1, b1 = params["cv1"]
    w2, b2 = params["cv2"]
    m = params["m"]
    nb = len(m) // 2
    c = w1.shape[0] // 2

    x = conv_bn_silu(i_nchw, wdn, bdn, 2)
    x = jnp.concatenate([x, p_nchw.astype(compute_dtype)], axis=1)
    y = conv_bn_silu(x, w1, b1, 1)
    ys = [y[:, :c], y[:, c:]]
    cur = ys[-1]
    for k in range(nb):
        h = conv_bn_silu(cur, m[2 * k][0], m[2 * k][1], 1)
        yk = conv_bn_silu(h, m[2 * k + 1][0], m[2 * k + 1][1], 1)
        if shortcut:
            yk = (cur.astype(jnp.float32) + yk.astype(jnp.float32)).astype(compute_dtype)
        ys.append(yk)
        cur = yk
    out = conv_bn_silu(jnp.concatenate(ys, axis=1), w2, b2, 1)
    return out.astype(i_nchw.dtype)


# --------------------------------------------------------------------------
if __name__ == "__main__":
    key = jax.random.PRNGKey(0)
    ki, kp, kw = jax.random.split(key, 3)

    N = 2
    LI_CN, LP_CN, CN = 8, 16, 8            # li.cn, lp.cn, cn (small toy config)
    HI = WI = 16                           # spatial size of the high-res input i
    HO, WO = HI // 2, WI // 2              # resolution of p and of the output
    C2 = get_channels(CN)                  # == 16

    params = init_neck_params(kw, LI_CN, LP_CN, CN, n_bottleneck=3)
    i = jax.random.normal(ki, (N, LI_CN, HI, WI), jnp.float32)
    p = jax.random.normal(kp, (N, LP_CN, HO, WO), jnp.float32)

    fwd = jax.jit(neck_section_conv)
    out = jax.block_until_ready(fwd(i, p, params))

    assert out.shape == (N, C2, HO, WO), out.shape
    assert out.dtype == jnp.float32
    assert bool(jnp.all(jnp.isfinite(out)))

    # Numerical sanity check against the XLA reference (same mixed precision).
    ref = jax.block_until_ready(jax.jit(reference_forward)(i, p, params))
    max_err = float(jnp.max(jnp.abs(out - ref)))
    assert max_err < 0.1, f"max abs error vs reference: {max_err}"

    print("KERNEL_OK")
</pallas_src>

<mosaic_0001>
module attributes {stable_mosaic.version = 11 : i64} {
  func.func @_neck_section_kernel(%arg0: i32, %arg1: memref<1x4x8x128xbf16, #tpu.memory_space<vmem>>, %arg2: memref<1x16x128xbf16, #tpu.memory_space<vmem>>, %arg3: memref<1x128xf32, #tpu.memory_space<vmem>>, %arg4: memref<9x8x8xbf16, #tpu.memory_space<vmem>>, %arg5: memref<8x1xf32, #tpu.memory_space<vmem>>, %arg6: memref<2x8x8xbf16, #tpu.memory_space<vmem>>, %arg7: memref<2x8x16xbf16, #tpu.memory_space<vmem>>, %arg8: memref<2x8x1xf32, #tpu.memory_space<vmem>>, %arg9: memref<6x9x8x8xbf16, #tpu.memory_space<vmem>>, %arg10: memref<6x8x1xf32, #tpu.memory_space<vmem>>, %arg11: memref<5x16x8xbf16, #tpu.memory_space<vmem>>, %arg12: memref<16x1xf32, #tpu.memory_space<vmem>>, %arg13: memref<1x16x128xbf16, #tpu.memory_space<vmem>>) attributes {dimension_semantics = [#tpu.dimension_semantics<parallel>], iteration_bounds = array<i64: 2>, scalar_prefetch = 0 : i64, scratch_operands = 0 : i64, tpu.core_type = #tpu.core_type<tc>, window_params = [{transform_indices = @transform_0, window_bounds = array<i64: 1, 4, 8, 128>}, {transform_indices = @transform_1, window_bounds = array<i64: 1, 16, 128>}, {pipeline_mode = #tpu.pipeline_mode<synchronous>, transform_indices = @transform_2, window_bounds = array<i64: 1, 128>}, {pipeline_mode = #tpu.pipeline_mode<synchronous>, transform_indices = @transform_3, window_bounds = array<i64: 9, 8, 8>}, {pipeline_mode = #tpu.pipeline_mode<synchronous>, transform_indices = @transform_4, window_bounds = array<i64: 8, 1>}, {pipeline_mode = #tpu.pipeline_mode<synchronous>, transform_indices = @transform_5, window_bounds = array<i64: 2, 8, 8>}, {pipeline_mode = #tpu.pipeline_mode<synchronous>, transform_indices = @transform_6, window_bounds = array<i64: 2, 8, 16>}, {pipeline_mode = #tpu.pipeline_mode<synchronous>, transform_indices = @transform_7, window_bounds = array<i64: 2, 8, 1>}, {pipeline_mode = #tpu.pipeline_mode<synchronous>, transform_indices = @transform_8, window_bounds = array<i64: 6, 9, 8, 8>}, {pipeline_mode = #tpu.pipeline_mode<synchronous>, transform_indices = @transform_9, window_bounds = array<i64: 6, 8, 1>}, {pipeline_mode = #tpu.pipeline_mode<synchronous>, transform_indices = @transform_10, window_bounds = array<i64: 5, 16, 8>}, {pipeline_mode = #tpu.pipeline_mode<synchronous>, transform_indices = @transform_11, window_bounds = array<i64: 16, 1>}, {transform_indices = @transform_12, window_bounds = array<i64: 1, 16, 128>}]} {
    %c0 = arith.constant 0 : index
    %c0_0 = arith.constant 0 : index
    %0 = vector.load %arg3[%c0, %c0_0] : memref<1x128xf32, #tpu.memory_space<vmem>>, vector<1x128xf32>
    %c0_1 = arith.constant 0 : index
    %c0_2 = arith.constant 0 : index
    %c0_3 = arith.constant 0 : index
    %c0_4 = arith.constant 0 : index
    %1 = vector.load %arg1[%c0_1, %c0_2, %c0_3, %c0_4] : memref<1x4x8x128xbf16, #tpu.memory_space<vmem>>, vector<1x1x8x128xbf16>
    %2 = vector.shape_cast %1 : vector<1x1x8x128xbf16> to vector<8x128xbf16>
    %cst = arith.constant 0.000000e+00 : bf16
    %3 = vector.broadcast %cst : bf16 to vector<8x11xbf16>
    %4 = tpu.concatenate %3, %2, %3 in 1 : vector<8x11xbf16>, vector<8x128xbf16>, vector<8x11xbf16> -> vector<8x150xbf16>
    %c0_5 = arith.constant 0 : index
    %c1 = arith.constant 1 : index
    %c0_6 = arith.constant 0 : index
    %c0_7 = arith.constant 0 : index
    %5 = vector.load %arg1[%c0_5, %c1, %c0_6, %c0_7] : memref<1x4x8x128xbf16, #tpu.memory_space<vmem>>, vector<1x1x8x128xbf16>
    %6 = vector.shape_cast %5 : vector<1x1x8x128xbf16> to vector<8x128xbf16>
    %cst_8 = arith.constant 0.000000e+00 : bf16
    %7 = vector.broadcast %cst_8 : bf16 to vector<8x11xbf16>
    %8 = tpu.concatenate %7, %6, %7 in 1 : vector<8x11xbf16>, vector<8x128xbf16>, vector<8x11xbf16> -> vector<8x150xbf16>
    %c0_9 = arith.constant 0 : index
    %c2 = arith.constant 2 : index
    %c0_10 = arith.constant 0 : index
    %c0_11 = arith.constant 0 : index
    %9 = vector.load %arg1[%c0_9, %c2, %c0_10, %c0_11] : memref<1x4x8x128xbf16, #tpu.memory_space<vmem>>, vector<1x1x8x128xbf16>
    %10 = vector.shape_cast %9 : vector<1x1x8x128xbf16> to vector<8x128xbf16>
    %cst_12 = arith.constant 0.000000e+00 : bf16
    %11 = vector.broadcast %cst_12 : bf16 to vector<8x11xbf16>
    %12 = tpu.concatenate %11, %10, %11 in 1 : vector<8x11xbf16>, vector<8x128xbf16>, vector<8x11xbf16> -> vector<8x150xbf16>
    %c0_13 = arith.constant 0 : index
    %c3 = arith.constant 3 : index
    %c0_14 = arith.constant 0 : index
    %c0_15 = arith.constant 0 : index
    %13 = vector.load %arg1[%c0_13, %c3, %c0_14, %c0_15] : memref<1x4x8x128xbf16, #tpu.memory_space<vmem>>, vector<1x1x8x128xbf16>
    %14 = vector.shape_cast %13 : vector<1x1x8x128xbf16> to vector<8x128xbf16>
    %cst_16 = arith.constant 0.000000e+00 : bf16
    %15 = vector.broadcast %cst_16 : bf16 to vector<8x11xbf16>
    %16 = tpu.concatenate %15, %14, %15 in 1 : vector<8x11xbf16>, vector<8x128xbf16>, vector<8x11xbf16> -> vector<8x150xbf16>
    %c0_17 = arith.constant 0 : index
    %c0_18 = arith.constant 0 : index
    %c0_19 = arith.constant 0 : index
    %17 = vector.load %arg4[%c0_17, %c0_18, %c0_19] : memref<9x8x8xbf16, #tpu.memory_space<vmem>>, vector<1x8x8xbf16>
    %18 = vector.shape_cast %17 : vector<1x8x8xbf16> to vector<8x8xbf16>
    %c1_20 = arith.constant 1 : index
    %c0_21 = arith.constant 0 : index
    %c0_22 = arith.constant 0 : index
    %19 = vector.load %arg4[%c1_20, %c0_21, %c0_22] : memref<9x8x8xbf16, #tpu.memory_space<vmem>>, vector<1x8x8xbf16>
    %20 = vector.shape_cast %19 : vector<1x8x8xbf16> to vector<8x8xbf16>
    %c2_23 = arith.constant 2 : index
    %c0_24 = arith.constant 0 : index
    %c0_25 = arith.constant 0 : index
    %21 = vector.load %arg4[%c2_23, %c0_24, %c0_25] : memref<9x8x8xbf16, #tpu.memory_space<vmem>>, vector<1x8x8xbf16>
    %22 = vector.shape_cast %21 : vector<1x8x8xbf16> to vector<8x8xbf16>
    %c3_26 = arith.constant 3 : index
    %c0_27 = arith.constant 0 : index
    %c0_28 = arith.constant 0 : index
    %23 = vector.load %arg4[%c3_26, %c0_27, %c0_28] : memref<9x8x8xbf16, #tpu.memory_space<vmem>>, vector<1x8x8xbf16>
    %24 = vector.shape_cast %23 : vector<1x8x8xbf16> to vector<8x8xbf16>
    %c4 = arith.constant 4 : index
    %c0_29 = arith.constant 0 : index
    %c0_30 = arith.constant 0 : index
    %25 = vector.load %arg4[%c4, %c0_29, %c0_30] : memref<9x8x8xbf16, #tpu.memory_space<vmem>>, vector<1x8x8xbf16>
    %26 = vector.shape_cast %25 : vector<1x8x8xbf16> to vector<8x8xbf16>
    %c5 = arith.constant 5 : index
    %c0_31 = arith.constant 0 : index
    %c0_32 = arith.constant 0 : index
    %27 = vector.load %arg4[%c5, %c0_31, %c0_32] : memref<9x8x8xbf16, #tpu.memory_space<vmem>>, vector<1x8x8xbf16>
    %28 = vector.shape_cast %27 : vector<1x8x8xbf16> to vector<8x8xbf16>
    %c6 = arith.constant 6 : index
    %c0_33 = arith.constant 0 : index
    %c0_34 = arith.constant 0 : index
    %29 = vector.load %arg4[%c6, %c0_33, %c0_34] : memref<9x8x8xbf16, #tpu.memory_space<vmem>>, vector<1x8x8xbf16>
    %30 = vector.shape_cast %29 : vector<1x8x8xbf16> to vector<8x8xbf16>
    %c7 = arith.constant 7 : index
    %c0_35 = arith.constant 0 : index
    %c0_36 = arith.constant 0 : index
    %31 = vector.load %arg4[%c7, %c0_35, %c0_36] : memref<9x8x8xbf16, #tpu.memory_space<vmem>>, vector<1x8x8xbf16>
    %32 = vector.shape_cast %31 : vector<1x8x8xbf16> to vector<8x8xbf16>
    %c8 = arith.constant 8 : index
    %c0_37 = arith.constant 0 : index
    %c0_38 = arith.constant 0 : index
    %33 = vector.load %arg4[%c8, %c0_37, %c0_38] : memref<9x8x8xbf16, #tpu.memory_space<vmem>>, vector<1x8x8xbf16>
    %34 = vector.shape_cast %33 : vector<1x8x8xbf16> to vector<8x8xbf16>
    %c0_39 = arith.constant 0 : index
    %c0_40 = arith.constant 0 : index
    %35 = vector.load %arg5[%c0_39, %c0_40] : memref<8x1xf32, #tpu.memory_space<vmem>>, vector<8x1xf32>
    %36 = vector.extract_strided_slice %4 {offsets = [0, 11], sizes = [8, 128], strides = [1, 1]} : vector<8x150xbf16> to vector<8x128xbf16>
    %cst_41 = arith.constant dense<0.000000e+00> : vector<8x128xf32>
    %37 = tpu.matmul %18, %36, %cst_41 {dimension_numbers = #tpu.dot_dimension_numbers<[1], [0], [0], [1], [0, 0, 1, 1], [], []>} : vector<8x8xbf16>, vector<8x128xbf16>, vector<8x128xf32> -> vector<8x128xf32>
    %38 = vector.extract_strided_slice %8 {offsets = [0, 11], sizes = [8, 128], strides = [1, 1]} : vector<8x150xbf16> to vector<8x128xbf16>
    %cst_42 = arith.constant dense<0.000000e+00> : vector<8x128xf32>
    %39 = tpu.matmul %20, %38, %cst_42 {dimension_numbers = #tpu.dot_dimension_numbers<[1], [0], [0], [1], [0, 0, 1, 1], [], []>} : vector<8x8xbf16>, vector<8x128xbf16>, vector<8x128xf32> -> vector<8x128xf32>
    %40 = arith.addf %37, %39 : vector<8x128xf32>
    %41 = vector.extract_strided_slice %4 {offsets = [0, 12], sizes = [8, 128], strides = [1, 1]} : vector<8x150xbf16> to vector<8x128xbf16>
    %cst_43 = arith.constant dense<0.000000e+00> : vector<8x128xf32>
    %42 = tpu.matmul %22, %41, %cst_43 {dimension_numbers = #tpu.dot_dimension_numbers<[1], [0], [0], [1], [0, 0, 1, 1], [], []>} : vector<8x8xbf16>, vector<8x128xbf16>, vector<8x128xf32> -> vector<8x128xf32>
    %43 = arith.addf %40, %42 : vector<8x128xf32>
    %44 = vector.extract_strided_slice %12 {offsets = [0, 11], sizes = [8, 128], strides = [1, 1]} : vector<8x150xbf16> to vector<8x128xbf16>
    %cst_44 = arith.constant dense<0.000000e+00> : vector<8x128xf32>
    %45 = tpu.matmul %24, %44, %cst_44 {dimension_numbers = #tpu.dot_dimension_numbers<[1], [0], [0], [1], [0, 0, 1, 1], [], []>} : vector<8x8xbf16>, vector<8x128xbf16>, vector<8x128xf32> -> vector<8x128xf32>
    %46 = arith.addf %43, %45 : vector<8x128xf32>
    %47 = vector.extract_strided_slice %16 {offsets = [0, 11], sizes = [8, 128], strides = [1, 1]} : vector<8x150xbf16> to vector<8x128xbf16>
    %cst_45 = arith.constant dense<0.000000e+00> : vector<8x128xf32>
    %48 = tpu.matmul %26, %47, %cst_45 {dimension_numbers = #tpu.dot_dimension_numbers<[1], [0], [0], [1], [0, 0, 1, 1], [], []>} : vector<8x8xbf16>, vector<8x128xbf16>, vector<8x128xf32> -> vector<8x128xf32>
    %49 = arith.addf %46, %48 : vector<8x128xf32>
    %50 = vector.extract_strided_slice %12 {offsets = [0, 12], sizes = [8, 128], strides = [1, 1]} : vector<8x150xbf16> to vector<8x128xbf16>
    %cst_46 = arith.constant dense<0.000000e+00> : vector<8x128xf32>
    %51 = tpu.matmul %28, %50, %cst_46 {dimension_numbers = #tpu.dot_dimension_numbers<[1], [0], [0], [1], [0, 0, 1, 1], [], []>} : vector<8x8xbf16>, vector<8x128xbf16>, vector<8x128xf32> -> vector<8x128xf32>
    %52 = arith.addf %49, %51 : vector<8x128xf32>
    %53 = vector.extract_strided_slice %4 {offsets = [0, 21], sizes = [8, 128], strides = [1, 1]} : vector<8x150xbf16> to vector<8x128xbf16>
    %cst_47 = arith.constant dense<0.000000e+00> : vector<8x128xf32>
    %54 = tpu.matmul %30, %53, %cst_47 {dimension_numbers = #tpu.dot_dimension_numbers<[1], [0], [0], [1], [0, 0, 1, 1], [], []>} : vector<8x8xbf16>, vector<8x128xbf16>, vector<8x128xf32> -> vector<8x128xf32>
    %55 = arith.addf %52, %54 : vector<8x128xf32>
    %56 = vector.extract_strided_slice %8 {offsets = [0, 21], sizes = [8, 128], strides = [1, 1]} : vector<8x150xbf16> to vector<8x128xbf16>
    %cst_48 = arith.constant dense<0.000000e+00> : vector<8x128xf32>
    %57 = tpu.matmul %32, %56, %cst_48 {dimension_numbers = #tpu.dot_dimension_numbers<[1], [0], [0], [1], [0, 0, 1, 1], [], []>} : vector<8x8xbf16>, vector<8x128xbf16>, vector<8x128xf32> -> vector<8x128xf32>
    %58 = arith.addf %55, %57 : vector<8x128xf32>
    %59 = vector.extract_strided_slice %4 {offsets = [0, 22], sizes = [8, 128], strides = [1, 1]} : vector<8x150xbf16> to vector<8x128xbf16>
    %cst_49 = arith.constant dense<0.000000e+00> : vector<8x128xf32>
    %60 = tpu.matmul %34, %59, %cst_49 {dimension_numbers = #tpu.dot_dimension_numbers<[1], [0], [0], [1], [0, 0, 1, 1], [], []>} : vector<8x8xbf16>, vector<8x128xbf16>, vector<8x128xf32> -> vector<8x128xf32>
    %61 = arith.addf %58, %60 : vector<8x128xf32>
    %62 = vector.broadcast %35 : vector<8x1xf32> to vector<8x128xf32>
    %63 = arith.addf %61, %62 : vector<8x128xf32>
    %64 = arith.negf %63 : vector<8x128xf32>
    %65 = math.exp %64 : vector<8x128xf32>
    %cst_50 = arith.constant 1.000000e+00 : f32
    %66 = vector.broadcast %cst_50 : f32 to vector<8x128xf32>
    %67 = arith.addf %66, %65 : vector<8x128xf32>
    %68 = arith.divf %66, %67 : vector<8x128xf32>
    %69 = arith.mulf %63, %68 : vector<8x128xf32>
    %70 = vector.broadcast %0 : vector<1x128xf32> to vector<8x128xf32>
    %71 = arith.mulf %69, %70 : vector<8x128xf32>
    %72 = arith.truncf %71 : vector<8x128xf32> to vector<8x128xbf16>
    %c0_51 = arith.constant 0 : index
    %c0_52 = arith.constant 0 : index
    %c0_53 = arith.constant 0 : index
    %73 = vector.load %arg2[%c0_51, %c0_52, %c0_53] : memref<1x16x128xbf16, #tpu.memory_space<vmem>>, vector<1x16x128xbf16>
    %74 = vector.shape_cast %73 : vector<1x16x128xbf16> to vector<16x128xbf16>
    %c0_54 = arith.constant 0 : index
    %c0_55 = arith.constant 0 : index
    %c0_56 = arith.constant 0 : index
    %75 = vector.load %arg6[%c0_54, %c0_55, %c0_56] : memref<2x8x8xbf16, #tpu.memory_space<vmem>>, vector<1x8x8xbf16>
    %76 = vector.shape_cast %75 : vector<1x8x8xbf16> to vector<8x8xbf16>
    %cst_57 = arith.constant dense<0.000000e+00> : vector<8x128xf32>
    %77 = tpu.matmul %76, %72, %cst_57 {dimension_numbers = #tpu.dot_dimension_numbers<[1], [0], [0], [1], [0, 0, 1, 1], [], []>} : vector<8x8xbf16>, vector<8x128xbf16>, vector<8x128xf32> -> vector<8x128xf32>
    %c0_58 = arith.constant 0 : index
    %c0_59 = arith.constant 0 : index
    %c0_60 = arith.constant 0 : index
    %78 = vector.load %arg7[%c0_58, %c0_59, %c0_60] : memref<2x8x16xbf16, #tpu.memory_space<vmem>>, vector<1x8x16xbf16>
    %79 = vector.shape_cast %78 : vector<1x8x16xbf16> to vector<8x16xbf16>
    %cst_61 = arith.constant dense<0.000000e+00> : vector<8x128xf32>
    %80 = tpu.matmul %79, %74, %cst_61 {dimension_numbers = #tpu.dot_dimension_numbers<[1], [0], [0], [1], [0, 0, 1, 1], [], []>} : vector<8x16xbf16>, vector<16x128xbf16>, vector<8x128xf32> -> vector<8x128xf32>
    %81 = arith.addf %77, %80 : vector<8x128xf32>
    %c0_62 = arith.constant 0 : index
    %c0_63 = arith.constant 0 : index
    %c0_64 = arith.constant 0 : index
    %82 = vector.load %arg8[%c0_62, %c0_63, %c0_64] : memref<2x8x1xf32, #tpu.memory_space<vmem>>, vector<1x8x1xf32>
    %83 = vector.shape_cast %82 : vector<1x8x1xf32> to vector<8x1xf32>
    %84 = vector.broadcast %83 : vector<8x1xf32> to vector<8x128xf32>
    %85 = arith.addf %81, %84 : vector<8x128xf32>
    %86 = arith.negf %85 : vector<8x128xf32>
    %87 = math.exp %86 : vector<8x128xf32>
    %cst_65 = arith.constant 1.000000e+00 : f32
    %88 = vector.broadcast %cst_65 : f32 to vector<8x128xf32>
    %89 = arith.addf %88, %87 : vector<8x128xf32>
    %90 = arith.divf %88, %89 : vector<8x128xf32>
    %91 = arith.mulf %85, %90 : vector<8x128xf32>
    %92 = vector.broadcast %0 : vector<1x128xf32> to vector<8x128xf32>
    %93 = arith.mulf %91, %92 : vector<8x128xf32>
    %94 = arith.truncf %93 : vector<8x128xf32> to vector<8x128xbf16>
    %c1_66 = arith.constant 1 : index
    %c0_67 = arith.constant 0 : index
    %c0_68 = arith.constant 0 : index
    %95 = vector.load %arg6[%c1_66, %c0_67, %c0_68] : memref<2x8x8xbf16, #tpu.memory_space<vmem>>, vector<1x8x8xbf16>
    %96 = vector.shape_cast %95 : vector<1x8x8xbf16> to vector<8x8xbf16>
    %cst_69 = arith.constant dense<0.000000e+00> : vector<8x128xf32>
    %97 = tpu.matmul %96, %72, %cst_69 {dimension_numbers = #tpu.dot_dimension_numbers<[1], [0], [0], [1], [0, 0, 1, 1], [], []>} : vector<8x8xbf16>, vector<8x128xbf16>, vector<8x128xf32> -> vector<8x128xf32>
    %c1_70 = arith.constant 1 : index
    %c0_71 = arith.constant 0 : index
    %c0_72 = arith.constant 0 : index
    %98 = vector.load %arg7[%c1_70, %c0_71, %c0_72] : memref<2x8x16xbf16, #tpu.memory_space<vmem>>, vector<1x8x16xbf16>
    %99 = vector.shape_cast %98 : vector<1x8x16xbf16> to vector<8x16xbf16>
    %cst_73 = arith.constant dense<0.000000e+00> : vector<8x128xf32>
    %100 = tpu.matmul %99, %74, %cst_73 {dimension_numbers = #tpu.dot_dimension_numbers<[1], [0], [0], [1], [0, 0, 1, 1], [], []>} : vector<8x16xbf16>, vector<16x128xbf16>, vector<8x128xf32> -> vector<8x128xf32>
    %101 = arith.addf %97, %100 : vector<8x128xf32>
    %c1_74 = arith.constant 1 : index
    %c0_75 = arith.constant 0 : index
    %c0_76 = arith.constant 0 : index
    %102 = vector.load %arg8[%c1_74, %c0_75, %c0_76] : memref<2x8x1xf32, #tpu.memory_space<vmem>>, vector<1x8x1xf32>
    %103 = vector.shape_cast %102 : vector<1x8x1xf32> to vector<8x1xf32>
    %104 = vector.broadcast %103 : vector<8x1xf32> to vector<8x128xf32>
    %105 = arith.addf %101, %104 : vector<8x128xf32>
    %106 = arith.negf %105 : vector<8x128xf32>
    %107 = math.exp %106 : vector<8x128xf32>
    %cst_77 = arith.constant 1.000000e+00 : f32
    %108 = vector.broadcast %cst_77 : f32 to vector<8x128xf32>
    %109 = arith.addf %108, %107 : vector<8x128xf32>
    %110 = arith.divf %108, %109 : vector<8x128xf32>
    %111 = arith.mulf %105, %110 : vector<8x128xf32>
    %112 = vector.broadcast %0 : vector<1x128xf32> to vector<8x128xf32>
    %113 = arith.mulf %111, %112 : vector<8x128xf32>
    %114 = arith.truncf %113 : vector<8x128xf32> to vector<8x128xbf16>
    %c0_78 = arith.constant 0 : index
    %c0_79 = arith.constant 0 : index
    %c0_80 = arith.constant 0 : index
    %c0_81 = arith.constant 0 : index
    %115 = vector.load %arg9[%c0_78, %c0_79, %c0_80, %c0_81] : memref<6x9x8x8xbf16, #tpu.memory_space<vmem>>, vector<1x9x8x8xbf16>
    %116 = vector.shape_cast %115 : vector<1x9x8x8xbf16> to vector<9x8x8xbf16>
    %c0_82 = arith.constant 0 : index
    %c0_83 = arith.constant 0 : index
    %c0_84 = arith.constant 0 : index
    %117 = vector.load %arg10[%c0_82, %c0_83, %c0_84] : memref<6x8x1xf32, #tpu.memory_space<vmem>>, vector<1x8x1xf32>
    %118 = vector.shape_cast %117 : vector<1x8x1xf32> to vector<8x1xf32>
    %cst_85 = arith.constant 0.000000e+00 : bf16
    %119 = vector.broadcast %cst_85 : bf16 to vector<8x11xbf16>
    %120 = tpu.concatenate %119, %114, %119 in 1 : vector<8x11xbf16>, vector<8x128xbf16>, vector<8x11xbf16> -> vector<8x150xbf16>
    %121 = vector.extract_strided_slice %116 {offsets = [0, 0, 0], sizes = [1, 8, 8], strides = [1, 1, 1]} : vector<9x8x8xbf16> to vector<1x8x8xbf16>
    %122 = vector.shape_cast %121 : vector<1x8x8xbf16> to vector<8x8xbf16>
    %123 = vector.extract_strided_slice %116 {offsets = [1, 0, 0], sizes = [1, 8, 8], strides = [1, 1, 1]} : vector<9x8x8xbf16> to vector<1x8x8xbf16>
    %124 = vector.shape_cast %123 : vector<1x8x8xbf16> to vector<8x8xbf16>
    %125 = vector.extract_strided_slice %116 {offsets = [2, 0, 0], sizes = [1, 8, 8], strides = [1, 1, 1]} : vector<9x8x8xbf16> to vector<1x8x8xbf16>
    %126 = vector.shape_cast %125 : vector<1x8x8xbf16> to vector<8x8xbf16>
    %127 = vector.extract_strided_slice %116 {offsets = [3, 0, 0], sizes = [1, 8, 8], strides = [1, 1, 1]} : vector<9x8x8xbf16> to vector<1x8x8xbf16>
    %128 = vector.shape_cast %127 : vector<1x8x8xbf16> to vector<8x8xbf16>
    %129 = vector.extract_strided_slice %116 {offsets = [4, 0, 0], sizes = [1, 8, 8], strides = [1, 1, 1]} : vector<9x8x8xbf16> to vector<1x8x8xbf16>
    %130 = vector.shape_cast %129 : vector<1x8x8xbf16> to vector<8x8xbf16>
    %131 = vector.extract_strided_slice %116 {offsets = [5, 0, 0], sizes = [1, 8, 8], strides = [1, 1, 1]} : vector<9x8x8xbf16> to vector<1x8x8xbf16>
    %132 = vector.shape_cast %131 : vector<1x8x8xbf16> to vector<8x8xbf16>
    %133 = vector.extract_strided_slice %116 {offsets = [6, 0, 0], sizes = [1, 8, 8], strides = [1, 1, 1]} : vector<9x8x8xbf16> to vector<1x8x8xbf16>
    %134 = vector.shape_cast %133 : vector<1x8x8xbf16> to vector<8x8xbf16>
    %135 = vector.extract_strided_slice %116 {offsets = [7, 0, 0], sizes = [1, 8, 8], strides = [1, 1, 1]} : vector<9x8x8xbf16> to vector<1x8x8xbf16>
    %136 = vector.shape_cast %135 : vector<1x8x8xbf16> to vector<8x8xbf16>
    %137 = vector.extract_strided_slice %116 {offsets = [8, 0, 0], sizes = [1, 8, 8], strides = [1, 1, 1]} : vector<9x8x8xbf16> to vector<1x8x8xbf16>
    %138 = vector.shape_cast %137 : vector<1x8x8xbf16> to vector<8x8xbf16>
    %139 = vector.extract_strided_slice %120 {offsets = [0, 0], sizes = [8, 128], strides = [1, 1]} : vector<8x150xbf16> to vector<8x128xbf16>
    %cst_86 = arith.constant dense<0.000000e+00> : vector<8x128xf32>
    %140 = tpu.matmul %122, %139, %cst_86 {dimension_numbers = #tpu.dot_dimension_numbers<[1], [0], [0], [1], [0, 0, 1, 1], [], []>} : vector<8x8xbf16>, vector<8x128xbf16>, vector<8x128xf32> -> vector<8x128xf32>
    %141 = vector.extract_strided_slice %120 {offsets = [0, 1], sizes = [8, 128], strides = [1, 1]} : vector<8x150xbf16> to vector<8x128xbf16>
    %cst_87 = arith.constant dense<0.000000e+00> : vector<8x128xf32>
    %142 = tpu.matmul %124, %141, %cst_87 {dimension_numbers = #tpu.dot_dimension_numbers<[1], [0], [0], [1], [0, 0, 1, 1], [], []>} : vector<8x8xbf16>, vector<8x128xbf16>, vector<8x128xf32> -> vector<8x128xf32>
    %143 = arith.addf %140, %142 : vector<8x128xf32>
    %144 = vector.extract_strided_slice %120 {offsets = [0, 2], sizes = [8, 128], strides = [1, 1]} : vector<8x150xbf16> to vector<8x128xbf16>
    %cst_88 = arith.constant dense<0.000000e+00> : vector<8x128xf32>
    %145 = tpu.matmul %126, %144, %cst_88 {dimension_numbers = #tpu.dot_dimension_numbers<[1], [0], [0], [1], [0, 0, 1, 1], [], []>} : vector<8x8xbf16>, vector<8x128xbf16>, vector<8x128xf32> -> vector<8x128xf32>
    %146 = arith.addf %143, %145 : vector<8x128xf32>
    %147 = vector.extract_strided_slice %120 {offsets = [0, 10], sizes = [8, 128], strides = [1, 1]} : vector<8x150xbf16> to vector<8x128xbf16>
    %cst_89 = arith.constant dense<0.000000e+00> : vector<8x128xf32>
    %148 = tpu.matmul %128, %147, %cst_89 {dimension_numbers = #tpu.dot_dimension_numbers<[1], [0], [0], [1], [0, 0, 1, 1], [], []>} : vector<8x8xbf16>, vector<8x128xbf16>, vector<8x128xf32> -> vector<8x128xf32>
    %149 = arith.addf %146, %148 : vector<8x128xf32>
    %150 = vector.extract_strided_slice %120 {offsets = [0, 11], sizes = [8, 128], strides = [1, 1]} : vector<8x150xbf16> to vector<8x128xbf16>
    %cst_90 = arith.constant dense<0.000000e+00> : vector<8x128xf32>
    %151 = tpu.matmul %130, %150, %cst_90 {dimension_numbers = #tpu.dot_dimension_numbers<[1], [0], [0], [1], [0, 0, 1, 1], [], []>} : vector<8x8xbf16>, vector<8x128xbf16>, vector<8x128xf32> -> vector<8x128xf32>
    %152 = arith.addf %149, %151 : vector<8x128xf32>
    %153 = vector.extract_strided_slice %120 {offsets = [0, 12], sizes = [8, 128], strides = [1, 1]} : vector<8x150xbf16> to vector<8x128xbf16>
    %cst_91 = arith.constant dense<0.000000e+00> : vector<8x128xf32>
    %154 = tpu.matmul %132, %153, %cst_91 {dimension_numbers = #tpu.dot_dimension_numbers<[1], [0], [0], [1], [0, 0, 1, 1], [], []>} : vector<8x8xbf16>, vector<8x128xbf16>, vector<8x128xf32> -> vector<8x128xf32>
    %155 = arith.addf %152, %154 : vector<8x128xf32>
    %156 = vector.extract_strided_slice %120 {offsets = [0, 20], sizes = [8, 128], strides = [1, 1]} : vector<8x150xbf16> to vector<8x128xbf16>
    %cst_92 = arith.constant dense<0.000000e+00> : vector<8x128xf32>
    %157 = tpu.matmul %134, %156, %cst_92 {dimension_numbers = #tpu.dot_dimension_numbers<[1], [0], [0], [1], [0, 0, 1, 1], [], []>} : vector<8x8xbf16>, vector<8x128xbf16>, vector<8x128xf32> -> vector<8x128xf32>
    %158 = arith.addf %155, %157 : vector<8x128xf32>
    %159 = vector.extract_strided_slice %120 {offsets = [0, 21], sizes = [8, 128], strides = [1, 1]} : vector<8x150xbf16> to vector<8x128xbf16>
    %cst_93 = arith.constant dense<0.000000e+00> : vector<8x128xf32>
    %160 = tpu.matmul %136, %159, %cst_93 {dimension_numbers = #tpu.dot_dimension_numbers<[1], [0], [0], [1], [0, 0, 1, 1], [], []>} : vector<8x8xbf16>, vector<8x128xbf16>, vector<8x128xf32> -> vector<8x128xf32>
    %161 = arith.addf %158, %160 : vector<8x128xf32>
    %162 = vector.extract_strided_slice %120 {offsets = [0, 22], sizes = [8, 128], strides = [1, 1]} : vector<8x150xbf16> to vector<8x128xbf16>
    %cst_94 = arith.constant dense<0.000000e+00> : vector<8x128xf32>
    %163 = tpu.matmul %138, %162, %cst_94 {dimension_numbers = #tpu.dot_dimension_numbers<[1], [0], [0], [1], [0, 0, 1, 1], [], []>} : vector<8x8xbf16>, vector<8x128xbf16>, vector<8x128xf32> -> vector<8x128xf32>
    %164 = arith.addf %161, %163 : vector<8x128xf32>
    %165 = vector.broadcast %118 : vector<8x1xf32> to vector<8x128xf32>
    %166 = arith.addf %164, %165 : vector<8x128xf32>
    %167 = arith.negf %166 : vector<8x128xf32>
    %168 = math.exp %167 : vector<8x128xf32>
    %cst_95 = arith.constant 1.000000e+00 : f32
    %169 = vector.broadcast %cst_95 : f32 to vector<8x128xf32>
    %170 = arith.addf %169, %168 : vector<8x128xf32>
    %171 = arith.divf %169, %170 : vector<8x128xf32>
    %172 = arith.mulf %166, %171 : vector<8x128xf32>
    %173 = vector.broadcast %0 : vector<1x128xf32> to vector<8x128xf32>
    %174 = arith.mulf %172, %173 : vector<8x128xf32>
    %175 = arith.truncf %174 : vector<8x128xf32> to vector<8x128xbf16>
    %c1_96 = arith.constant 1 : index
    %c0_97 = arith.constant 0 : index
    %c0_98 = arith.constant 0 : index
    %c0_99 = arith.constant 0 : index
    %176 = vector.load %arg9[%c1_96, %c0_97, %c0_98, %c0_99] : memref<6x9x8x8xbf16, #tpu.memory_space<vmem>>, vector<1x9x8x8xbf16>
    %177 = vector.shape_cast %176 : vector<1x9x8x8xbf16> to vector<9x8x8xbf16>
    %c1_100 = arith.constant 1 : index
    %c0_101 = arith.constant 0 : index
    %c0_102 = arith.constant 0 : index
    %178 = vector.load %arg10[%c1_100, %c0_101, %c0_102] : memref<6x8x1xf32, #tpu.memory_space<vmem>>, vector<1x8x1xf32>
    %179 = vector.shape_cast %178 : vector<1x8x1xf32> to vector<8x1xf32>
    %cst_103 = arith.constant 0.000000e+00 : bf16
    %180 = vector.broadcast %cst_103 : bf16 to vector<8x11xbf16>
    %181 = tpu.concatenate %180, %175, %180 in 1 : vector<8x11xbf16>, vector<8x128xbf16>, vector<8x11xbf16> -> vector<8x150xbf16>
    %182 = vector.extract_strided_slice %177 {offsets = [0, 0, 0], sizes = [1, 8, 8], strides = [1, 1, 1]} : vector<9x8x8xbf16> to vector<1x8x8xbf16>
    %183 = vector.shape_cast %182 : vector<1x8x8xbf16> to vector<8x8xbf16>
    %184 = vector.extract_strided_slice %177 {offsets = [1, 0, 0], sizes = [1, 8, 8], strides = [1, 1, 1]} : vector<9x8x8xbf16> to vector<1x8x8xbf16>
    %185 = vector.shape_cast %184 : vector<1x8x8xbf16> to vector<8x8xbf16>
    %186 = vector.extract_strided_slice %177 {offsets = [2, 0, 0], sizes = [1, 8, 8], strides = [1, 1, 1]} : vector<9x8x8xbf16> to vector<1x8x8xbf16>
    %187 = vector.shape_cast %186 : vector<1x8x8xbf16> to vector<8x8xbf16>
    %188 = vector.extract_strided_slice %177 {offsets = [3, 0, 0], sizes = [1, 8, 8], strides = [1, 1, 1]} : vector<9x8x8xbf16> to vector<1x8x8xbf16>
    %189 = vector.shape_cast %188 : vector<1x8x8xbf16> to vector<8x8xbf16>
    %190 = vector.extract_strided_slice %177 {offsets = [4, 0, 0], sizes = [1, 8, 8], strides = [1, 1, 1]} : vector<9x8x8xbf16> to vector<1x8x8xbf16>
    %191 = vector.shape_cast %190 : vector<1x8x8xbf16> to vector<8x8xbf16>
    %192 = vector.extract_strided_slice %177 {offsets = [5, 0, 0], sizes = [1, 8, 8], strides = [1, 1, 1]} : vector<9x8x8xbf16> to vector<1x8x8xbf16>
    %193 = vector.shape_cast %192 : vector<1x8x8xbf16> to vector<8x8xbf16>
    %194 = vector.extract_strided_slice %177 {offsets = [6, 0, 0], sizes = [1, 8, 8], strides = [1, 1, 1]} : vector<9x8x8xbf16> to vector<1x8x8xbf16>
    %195 = vector.shape_cast %194 : vector<1x8x8xbf16> to vector<8x8xbf16>
    %196 = vector.extract_strided_slice %177 {offsets = [7, 0, 0], sizes = [1, 8, 8], strides = [1, 1, 1]} : vector<9x8x8xbf16> to vector<1x8x8xbf16>
    %197 = vector.shape_cast %196 : vector<1x8x8xbf16> to vector<8x8xbf16>
    %198 = vector.extract_strided_slice %177 {offsets = [8, 0, 0], sizes = [1, 8, 8], strides = [1, 1, 1]} : vector<9x8x8xbf16> to vector<1x8x8xbf16>
    %199 = vector.shape_cast %198 : vector<1x8x8xbf16> to vector<8x8xbf16>
    %200 = vector.extract_strided_slice %181 {offsets = [0, 0], sizes = [8, 128], strides = [1, 1]} : vector<8x150xbf16> to vector<8x128xbf16>
    %cst_104 = arith.constant dense<0.000000e+00> : vector<8x128xf32>
    %201 = tpu.matmul %183, %200, %cst_104 {dimension_numbers = #tpu.dot_dimension_numbers<[1], [0], [0], [1], [0, 0, 1, 1], [], []>} : vector<8x8xbf16>, vector<8x128xbf16>, vector<8x128xf32> -> vector<8x128xf32>
    %202 = vector.extract_strided_slice %181 {offsets = [0, 1], sizes = [8, 128], strides = [1, 1]} : vector<8x150xbf16> to vector<8x128xbf16>
    %cst_105 = arith.constant dense<0.000000e+00> : vector<8x128xf32>
    %203 = tpu.matmul %185, %202, %cst_105 {dimension_numbers = #tpu.dot_dimension_numbers<[1], [0], [0], [1], [0, 0, 1, 1], [], []>} : vector<8x8xbf16>, vector<8x128xbf16>, vector<8x128xf32> -> vector<8x128xf32>
    %204 = arith.addf %201, %203 : vector<8x128xf32>
    %205 = vector.extract_strided_slice %181 {offsets = [0, 2], sizes = [8, 128], strides = [1, 1]} : vector<8x150xbf16> to vector<8x128xbf16>
    %cst_106 = arith.constant dense<0.000000e+00> : vector<8x128xf32>
    %206 = tpu.matmul %187, %205, %cst_106 {dimension_numbers = #tpu.dot_dimension_numbers<[1], [0], [0], [1], [0, 0, 1, 1], [], []>} : vector<8x8xbf16>, vector<8x128xbf16>, vector<8x128xf32> -> vector<8x128xf32>
    %207 = arith.addf %204, %206 : vector<8x128xf32>
    %208 = vector.extract_strided_slice %181 {offsets = [0, 10], sizes = [8, 128], strides = [1, 1]} : vector<8x150xbf16> to vector<8x128xbf16>
    %cst_107 = arith.constant dense<0.000000e+00> : vector<8x128xf32>
    %209 = tpu.matmul %189, %208, %cst_107 {dimension_numbers = #tpu.dot_dimension_numbers<[1], [0], [0], [1], [0, 0, 1, 1], [], []>} : vector<8x8xbf16>, vector<8x128xbf16>, vector<8x128xf32> -> vector<8x128xf32>
    %210 = arith.addf %207, %209 : vector<8x128xf32>
    %211 = vector.extract_strided_slice %181 {offsets = [0, 11], sizes = [8, 128], strides = [1, 1]} : vector<8x150xbf16> to vector<8x128xbf16>
    %cst_108 = arith.constant dense<0.000000e+00> : vector<8x128xf32>
    %212 = tpu.matmul %191, %211, %cst_108 {dimension_numbers = #tpu.dot_dimension_numbers<[1], [0], [0], [1], [0, 0, 1, 1], [], []>} : vector<8x8xbf16>, vector<8x128xbf16>, vector<8x128xf32> -> vector<8x128xf32>
    %213 = arith.addf %210, %212 : vector<8x128xf32>
    %214 = vector.extract_strided_slice %181 {offsets = [0, 12], sizes = [8, 128], strides = [1, 1]} : vector<8x150xbf16> to vector<8x128xbf16>
    %cst_109 = arith.constant dense<0.000000e+00> : vector<8x128xf32>
    %215 = tpu.matmul %193, %214, %cst_109 {dimension_numbers = #tpu.dot_dimension_numbers<[1], [0], [0], [1], [0, 0, 1, 1], [], []>} : vector<8x8xbf16>, vector<8x128xbf16>, vector<8x128xf32> -> vector<8x128xf32>
    %216 = arith.addf %213, %215 : vector<8x128xf32>
    %217 = vector.extract_strided_slice %181 {offsets = [0, 20], sizes = [8, 128], strides = [1, 1]} : vector<8x150xbf16> to vector<8x128xbf16>
    %cst_110 = arith.constant dense<0.000000e+00> : vector<8x128xf32>
    %218 = tpu.matmul %195, %217, %cst_110 {dimension_numbers = #tpu.dot_dimension_numbers<[1], [0], [0], [1], [0, 0, 1, 1], [], []>} : vector<8x8xbf16>, vector<8x128xbf16>, vector<8x128xf32> -> vector<8x128xf32>
    %219 = arith.addf %216, %218 : vector<8x128xf32>
    %220 = vector.extract_strided_slice %181 {offsets = [0, 21], sizes = [8, 128], strides = [1, 1]} : vector<8x150xbf16> to vector<8x128xbf16>
    %cst_111 = arith.constant dense<0.000000e+00> : vector<8x128xf32>
    %221 = tpu.matmul %197, %220, %cst_111 {dimension_numbers = #tpu.dot_dimension_numbers<[1], [0], [0], [1], [0, 0, 1, 1], [], []>} : vector<8x8xbf16>, vector<8x128xbf16>, vector<8x128xf32> -> vector<8x128xf32>
    %222 = arith.addf %219, %221 : vector<8x128xf32>
    %223 = vector.extract_strided_slice %181 {offsets = [0, 22], sizes = [8, 128], strides = [1, 1]} : vector<8x150xbf16> to vector<8x128xbf16>
    %cst_112 = arith.constant dense<0.000000e+00> : vector<8x128xf32>
    %224 = tpu.matmul %199, %223, %cst_112 {dimension_numbers = #tpu.dot_dimension_numbers<[1], [0], [0], [1], [0, 0, 1, 1], [], []>} : vector<8x8xbf16>, vector<8x128xbf16>, vector<8x128xf32> -> vector<8x128xf32>
    %225 = arith.addf %222, %224 : vector<8x128xf32>
    %226 = vector.broadcast %179 : vector<8x1xf32> to vector<8x128xf32>
    %227 = arith.addf %225, %226 : vector<8x128xf32>
    %228 = arith.negf %227 : vector<8x128xf32>
    %229 = math.exp %228 : vector<8x128xf32>
    %cst_113 = arith.constant 1.000000e+00 : f32
    %230 = vector.broadcast %cst_113 : f32 to vector<8x128xf32>
    %231 = arith.addf %230, %229 : vector<8x128xf32>
    %232 = arith.divf %230, %231 : vector<8x128xf32>
    %233 = arith.mulf %227, %232 : vector<8x128xf32>
    %234 = vector.broadcast %0 : vector<1x128xf32> to vector<8x128xf32>
    %235 = arith.mulf %233, %234 : vector<8x128xf32>
    %236 = arith.truncf %235 : vector<8x128xf32> to vector<8x128xbf16>
    %c2_114 = arith.constant 2 : index
    %c0_115 = arith.constant 0 : index
    %c0_116 = arith.constant 0 : index
    %c0_117 = arith.constant 0 : index
    %237 = vector.load %arg9[%c2_114, %c0_115, %c0_116, %c0_117] : memref<6x9x8x8xbf16, #tpu.memory_space<vmem>>, vector<1x9x8x8xbf16>
    %238 = vector.shape_cast %237 : vector<1x9x8x8xbf16> to vector<9x8x8xbf16>
    %c2_118 = arith.constant 2 : index
    %c0_119 = arith.constant 0 : index
    %c0_120 = arith.constant 0 : index
    %239 = vector.load %arg10[%c2_118, %c0_119, %c0_120] : memref<6x8x1xf32, #tpu.memory_space<vmem>>, vector<1x8x1xf32>
    %240 = vector.shape_cast %239 : vector<1x8x1xf32> to vector<8x1xf32>
    %cst_121 = arith.constant 0.000000e+00 : bf16
    %241 = vector.broadcast %cst_121 : bf16 to vector<8x11xbf16>
    %242 = tpu.concatenate %241, %236, %241 in 1 : vector<8x11xbf16>, vector<8x128xbf16>, vector<8x11xbf16> -> vector<8x150xbf16>
    %243 = vector.extract_strided_slice %238 {offsets = [0, 0, 0], sizes = [1, 8, 8], strides = [1, 1, 1]} : vector<9x8x8xbf16> to vector<1x8x8xbf16>
    %244 = vector.shape_cast %243 : vector<1x8x8xbf16> to vector<8x8xbf16>
    %245 = vector.extract_strided_slice %238 {offsets = [1, 0, 0], sizes = [1, 8, 8], strides = [1, 1, 1]} : vector<9x8x8xbf16> to vector<1x8x8xbf16>
    %246 = vector.shape_cast %245 : vector<1x8x8xbf16> to vector<8x8xbf16>
    %247 = vector.extract_strided_slice %238 {offsets = [2, 0, 0], sizes = [1, 8, 8], strides = [1, 1, 1]} : vector<9x8x8xbf16> to vector<1x8x8xbf16>
    %248 = vector.shape_cast %247 : vector<1x8x8xbf16> to vector<8x8xbf16>
    %249 = vector.extract_strided_slice %238 {offsets = [3, 0, 0], sizes = [1, 8, 8], strides = [1, 1, 1]} : vector<9x8x8xbf16> to vector<1x8x8xbf16>
    %250 = vector.shape_cast %249 : vector<1x8x8xbf16> to vector<8x8xbf16>
    %251 = vector.extract_strided_slice %238 {offsets = [4, 0, 0], sizes = [1, 8, 8], strides = [1, 1, 1]} : vector<9x8x8xbf16> to vector<1x8x8xbf16>
    %252 = vector.shape_cast %251 : vector<1x8x8xbf16> to vector<8x8xbf16>
    %253 = vector.extract_strided_slice %238 {offsets = [5, 0, 0], sizes = [1, 8, 8], strides = [1, 1, 1]} : vector<9x8x8xbf16> to vector<1x8x8xbf16>
    %254 = vector.shape_cast %253 : vector<1x8x8xbf16> to vector<8x8xbf16>
    %255 = vector.extract_strided_slice %238 {offsets = [6, 0, 0], sizes = [1, 8, 8], strides = [1, 1, 1]} : vector<9x8x8xbf16> to vector<1x8x8xbf16>
    %256 = vector.shape_cast %255 : vector<1x8x8xbf16> to vector<8x8xbf16>
    %257 = vector.extract_strided_slice %238 {offsets = [7, 0, 0], sizes = [1, 8, 8], strides = [1, 1, 1]} : vector<9x8x8xbf16> to vector<1x8x8xbf16>
    %258 = vector.shape_cast %257 : vector<1x8x8xbf16> to vector<8x8xbf16>
    %259 = vector.extract_strided_slice %238 {offsets = [8, 0, 0], sizes = [1, 8, 8], strides = [1, 1, 1]} : vector<9x8x8xbf16> to vector<1x8x8xbf16>
    %260 = vector.shape_cast %259 : vector<1x8x8xbf16> to vector<8x8xbf16>
    %261 = vector.extract_strided_slice %242 {offsets = [0, 0], sizes = [8, 128], strides = [1, 1]} : vector<8x150xbf16> to vector<8x128xbf16>
    %cst_122 = arith.constant dense<0.000000e+00> : vector<8x128xf32>
    %262 = tpu.matmul %244, %261, %cst_122 {dimension_numbers = #tpu.dot_dimension_numbers<[1], [0], [0], [1], [0, 0, 1, 1], [], []>} : vector<8x8xbf16>, vector<8x128xbf16>, vector<8x128xf32> -> vector<8x128xf32>
    %263 = vector.extract_strided_slice %242 {offsets = [0, 1], sizes = [8, 128], strides = [1, 1]} : vector<8x150xbf16> to vector<8x128xbf16>
    %cst_123 = arith.constant dense<0.000000e+00> : vector<8x128xf32>
    %264 = tpu.matmul %246, %263, %cst_123 {dimension_numbers = #tpu.dot_dimension_numbers<[1], [0], [0], [1], [0, 0, 1, 1], [], []>} : vector<8x8xbf16>, vector<8x128xbf16>, vector<8x128xf32> -> vector<8x128xf32>
    %265 = arith.addf %262, %264 : vector<8x128xf32>
    %266 = vector.extract_strided_slice %242 {offsets = [0, 2], sizes = [8, 128], strides = [1, 1]} : vector<8x150xbf16> to vector<8x128xbf16>
    %cst_124 = arith.constant dense<0.000000e+00> : vector<8x128xf32>
    %267 = tpu.matmul %248, %266, %cst_124 {dimension_numbers = #tpu.dot_dimension_numbers<[1], [0], [0], [1], [0, 0, 1, 1], [], []>} : vector<8x8xbf16>, vector<8x128xbf16>, vector<8x128xf32> -> vector<8x128xf32>
    %268 = arith.addf %265, %267 : vector<8x128xf32>
    %269 = vector.extract_strided_slice %242 {offsets = [0, 10], sizes = [8, 128], strides = [1, 1]} : vector<8x150xbf16> to vector<8x128xbf16>
    %cst_125 = arith.constant dense<0.000000e+00> : vector<8x128xf32>
    %270 = tpu.matmul %250, %269, %cst_125 {dimension_numbers = #tpu.dot_dimension_numbers<[1], [0], [0], [1], [0, 0, 1, 1], [], []>} : vector<8x8xbf16>, vector<8x128xbf16>, vector<8x128xf32> -> vector<8x128xf32>
    %271 = arith.addf %268, %270 : vector<8x128xf32>
    %272 = vector.extract_strided_slice %242 {offsets = [0, 11], sizes = [8, 128], strides = [1, 1]} : vector<8x150xbf16> to vector<8x128xbf16>
    %cst_126 = arith.constant dense<0.000000e+00> : vector<8x128xf32>
    %273 = tpu.matmul %252, %272, %cst_126 {dimension_numbers = #tpu.dot_dimension_numbers<[1], [0], [0], [1], [0, 0, 1, 1], [], []>} : vector<8x8xbf16>, vector<8x128xbf16>, vector<8x128xf32> -> vector<8x128xf32>
    %274 = arith.addf %271, %273 : vector<8x128xf32>
    %275 = vector.extract_strided_slice %242 {offsets = [0, 12], sizes = [8, 128], strides = [1, 1]} : vector<8x150xbf16> to vector<8x128xbf16>
    %cst_127 = arith.constant dense<0.000000e+00> : vector<8x128xf32>
    %276 = tpu.matmul %254, %275, %cst_127 {dimension_numbers = #tpu.dot_dimension_numbers<[1], [0], [0], [1], [0, 0, 1, 1], [], []>} : vector<8x8xbf16>, vector<8x128xbf16>, vector<8x128xf32> -> vector<8x128xf32>
    %277 = arith.addf %274, %276 : vector<8x128xf32>
    %278 = vector.extract_strided_slice %242 {offsets = [0, 20], sizes = [8, 128], strides = [1, 1]} : vector<8x150xbf16> to vector<8x128xbf16>
    %cst_128 = arith.constant dense<0.000000e+00> : vector<8x128xf32>
    %279 = tpu.matmul %256, %278, %cst_128 {dimension_numbers = #tpu.dot_dimension_numbers<[1], [0], [0], [1], [0, 0, 1, 1], [], []>} : vector<8x8xbf16>, vector<8x128xbf16>, vector<8x128xf32> -> vector<8x128xf32>
    %280 = arith.addf %277, %279 : vector<8x128xf32>
    %281 = vector.extract_strided_slice %242 {offsets = [0, 21], sizes = [8, 128], strides = [1, 1]} : vector<8x150xbf16> to vector<8x128xbf16>
    %cst_129 = arith.constant dense<0.000000e+00> : vector<8x128xf32>
    %282 = tpu.matmul %258, %281, %cst_129 {dimension_numbers = #tpu.dot_dimension_numbers<[1], [0], [0], [1], [0, 0, 1, 1], [], []>} : vector<8x8xbf16>, vector<8x128xbf16>, vector<8x128xf32> -> vector<8x128xf32>
    %283 = arith.addf %280, %282 : vector<8x128xf32>
    %284 = vector.extract_strided_slice %242 {offsets = [0, 22], sizes = [8, 128], strides = [1, 1]} : vector<8x150xbf16> to vector<8x128xbf16>
    %cst_130 = arith.constant dense<0.000000e+00> : vector<8x128xf32>
    %285 = tpu.matmul %260, %284, %cst_130 {dimension_numbers = #tpu.dot_dimension_numbers<[1], [0], [0], [1], [0, 0, 1, 1], [], []>} : vector<8x8xbf16>, vector<8x128xbf16>, vector<8x128xf32> -> vector<8x128xf32>
    %286 = arith.addf %283, %285 : vector<8x128xf32>
    %287 = vector.broadcast %240 : vector<8x1xf32> to vector<8x128xf32>
    %288 = arith.addf %286, %287 : vector<8x128xf32>
    %289 = arith.negf %288 : vector<8x128xf32>
    %290 = math.exp %289 : vector<8x128xf32>
    %cst_131 = arith.constant 1.000000e+00 : f32
    %291 = vector.broadcast %cst_131 : f32 to vector<8x128xf32>
    %292 = arith.addf %291, %290 : vector<8x128xf32>
    %293 = arith.divf %291, %292 : vector<8x128xf32>
    %294 = arith.mulf %288, %293 : vector<8x128xf32>
    %295 = vector.broadcast %0 : vector<1x128xf32> to vector<8x128xf32>
    %296 = arith.mulf %294, %295 : vector<8x128xf32>
    %297 = arith.truncf %296 : vector<8x128xf32> to vector<8x128xbf16>
    %c3_132 = arith.constant 3 : index
    %c0_133 = arith.constant 0 : index
    %c0_134 = arith.constant 0 : index
    %c0_135 = arith.constant 0 : index
    %298 = vector.load %arg9[%c3_132, %c0_133, %c0_134, %c0_135] : memref<6x9x8x8xbf16, #tpu.memory_space<vmem>>, vector<1x9x8x8xbf16>
    %299 = vector.shape_cast %298 : vector<1x9x8x8xbf16> to vector<9x8x8xbf16>
    %c3_136 = arith.constant 3 : index
    %c0_137 = arith.constant 0 : index
    %c0_138 = arith.constant 0 : index
    %300 = vector.load %arg10[%c3_136, %c0_137, %c0_138] : memref<6x8x1xf32, #tpu.memory_space<vmem>>, vector<1x8x1xf32>
    %301 = vector.shape_cast %300 : vector<1x8x1xf32> to vector<8x1xf32>
    %cst_139 = arith.constant 0.000000e+00 : bf16
    %302 = vector.broadcast %cst_139 : bf16 to vector<8x11xbf16>
    %303 = tpu.concatenate %302, %297, %302 in 1 : vector<8x11xbf16>, vector<8x128xbf16>, vector<8x11xbf16> -> vector<8x150xbf16>
    %304 = vector.extract_strided_slice %299 {offsets = [0, 0, 0], sizes = [1, 8, 8], strides = [1, 1, 1]} : vector<9x8x8xbf16> to vector<1x8x8xbf16>
    %305 = vector.shape_cast %304 : vector<1x8x8xbf16> to vector<8x8xbf16>
    %306 = vector.extract_strided_slice %299 {offsets = [1, 0, 0], sizes = [1, 8, 8], strides = [1, 1, 1]} : vector<9x8x8xbf16> to vector<1x8x8xbf16>
    %307 = vector.shape_cast %306 : vector<1x8x8xbf16> to vector<8x8xbf16>
    %308 = vector.extract_strided_slice %299 {offsets = [2, 0, 0], sizes = [1, 8, 8], strides = [1, 1, 1]} : vector<9x8x8xbf16> to vector<1x8x8xbf16>
    %309 = vector.shape_cast %308 : vector<1x8x8xbf16> to vector<8x8xbf16>
    %310 = vector.extract_strided_slice %299 {offsets = [3, 0, 0], sizes = [1, 8, 8], strides = [1, 1, 1]} : vector<9x8x8xbf16> to vector<1x8x8xbf16>
    %311 = vector.shape_cast %310 : vector<1x8x8xbf16> to vector<8x8xbf16>
    %312 = vector.extract_strided_slice %299 {offsets = [4, 0, 0], sizes = [1, 8, 8], strides = [1, 1, 1]} : vector<9x8x8xbf16> to vector<1x8x8xbf16>
    %313 = vector.shape_cast %312 : vector<1x8x8xbf16> to vector<8x8xbf16>
    %314 = vector.extract_strided_slice %299 {offsets = [5, 0, 0], sizes = [1, 8, 8], strides = [1, 1, 1]} : vector<9x8x8xbf16> to vector<1x8x8xbf16>
    %315 = vector.shape_cast %314 : vector<1x8x8xbf16> to vector<8x8xbf16>
    %316 = vector.extract_strided_slice %299 {offsets = [6, 0, 0], sizes = [1, 8, 8], strides = [1, 1, 1]} : vector<9x8x8xbf16> to vector<1x8x8xbf16>
    %317 = vector.shape_cast %316 : vector<1x8x8xbf16> to vector<8x8xbf16>
    %318 = vector.extract_strided_slice %299 {offsets = [7, 0, 0], sizes = [1, 8, 8], strides = [1, 1, 1]} : vector<9x8x8xbf16> to vector<1x8x8xbf16>
    %319 = vector.shape_cast %318 : vector<1x8x8xbf16> to vector<8x8xbf16>
    %320 = vector.extract_strided_slice %299 {offsets = [8, 0, 0], sizes = [1, 8, 8], strides = [1, 1, 1]} : vector<9x8x8xbf16> to vector<1x8x8xbf16>
    %321 = vector.shape_cast %320 : vector<1x8x8xbf16> to vector<8x8xbf16>
    %322 = vector.extract_strided_slice %303 {offsets = [0, 0], sizes = [8, 128], strides = [1, 1]} : vector<8x150xbf16> to vector<8x128xbf16>
    %cst_140 = arith.constant dense<0.000000e+00> : vector<8x128xf32>
    %323 = tpu.matmul %305, %322, %cst_140 {dimension_numbers = #tpu.dot_dimension_numbers<[1], [0], [0], [1], [0, 0, 1, 1], [], []>} : vector<8x8xbf16>, vector<8x128xbf16>, vector<8x128xf32> -> vector<8x128xf32>
    %324 = vector.extract_strided_slice %303 {offsets = [0, 1], sizes = [8, 128], strides = [1, 1]} : vector<8x150xbf16> to vector<8x128xbf16>
    %cst_141 = arith.constant dense<0.000000e+00> : vector<8x128xf32>
    %325 = tpu.matmul %307, %324, %cst_141 {dimension_numbers = #tpu.dot_dimension_numbers<[1], [0], [0], [1], [0, 0, 1, 1], [], []>} : vector<8x8xbf16>, vector<8x128xbf16>, vector<8x128xf32> -> vector<8x128xf32>
    %326 = arith.addf %323, %325 : vector<8x128xf32>
    %327 = vector.extract_strided_slice %303 {offsets = [0, 2], sizes = [8, 128], strides = [1, 1]} : vector<8x150xbf16> to vector<8x128xbf16>
    %cst_142 = arith.constant dense<0.000000e+00> : vector<8x128xf32>
    %328 = tpu.matmul %309, %327, %cst_142 {dimension_numbers = #tpu.dot_dimension_numbers<[1], [0], [0], [1], [0, 0, 1, 1], [], []>} : vector<8x8xbf16>, vector<8x128xbf16>, vector<8x128xf32> -> vector<8x128xf32>
    %329 = arith.addf %326, %328 : vector<8x128xf32>
    %330 = vector.extract_strided_slice %303 {offsets = [0, 10], sizes = [8, 128], strides = [1, 1]} : vector<8x150xbf16> to vector<8x128xbf16>
    %cst_143 = arith.constant dense<0.000000e+00> : vector<8x128xf32>
    %331 = tpu.matmul %311, %330, %cst_143 {dimension_numbers = #tpu.dot_dimension_numbers<[1], [0], [0], [1], [0, 0, 1, 1], [], []>} : vector<8x8xbf16>, vector<8x128xbf16>, vector<8x128xf32> -> vector<8x128xf32>
    %332 = arith.addf %329, %331 : vector<8x128xf32>
    %333 = vector.extract_strided_slice %303 {offsets = [0, 11], sizes = [8, 128], strides = [1, 1]} : vector<8x150xbf16> to vector<8x128xbf16>
    %cst_144 = arith.constant dense<0.000000e+00> : vector<8x128xf32>
    %334 = tpu.matmul %313, %333, %cst_144 {dimension_numbers = #tpu.dot_dimension_numbers<[1], [0], [0], [1], [0, 0, 1, 1], [], []>} : vector<8x8xbf16>, vector<8x128xbf16>, vector<8x128xf32> -> vector<8x128xf32>
    %335 = arith.addf %332, %334 : vector<8x128xf32>
    %336 = vector.extract_strided_slice %303 {offsets = [0, 12], sizes = [8, 128], strides = [1, 1]} : vector<8x150xbf16> to vector<8x128xbf16>
    %cst_145 = arith.constant dense<0.000000e+00> : vector<8x128xf32>
    %337 = tpu.matmul %315, %336, %cst_145 {dimension_numbers = #tpu.dot_dimension_numbers<[1], [0], [0], [1], [0, 0, 1, 1], [], []>} : vector<8x8xbf16>, vector<8x128xbf16>, vector<8x128xf32> -> vector<8x128xf32>
    %338 = arith.addf %335, %337 : vector<8x128xf32>
    %339 = vector.extract_strided_slice %303 {offsets = [0, 20], sizes = [8, 128], strides = [1, 1]} : vector<8x150xbf16> to vector<8x128xbf16>
    %cst_146 = arith.constant dense<0.000000e+00> : vector<8x128xf32>
    %340 = tpu.matmul %317, %339, %cst_146 {dimension_numbers = #tpu.dot_dimension_numbers<[1], [0], [0], [1], [0, 0, 1, 1], [], []>} : vector<8x8xbf16>, vector<8x128xbf16>, vector<8x128xf32> -> vector<8x128xf32>
    %341 = arith.addf %338, %340 : vector<8x128xf32>
    %342 = vector.extract_strided_slice %303 {offsets = [0, 21], sizes = [8, 128], strides = [1, 1]} : vector<8x150xbf16> to vector<8x128xbf16>
    %cst_147 = arith.constant dense<0.000000e+00> : vector<8x128xf32>
    %343 = tpu.matmul %319, %342, %cst_147 {dimension_numbers = #tpu.dot_dimension_numbers<[1], [0], [0], [1], [0, 0, 1, 1], [], []>} : vector<8x8xbf16>, vector<8x128xbf16>, vector<8x128xf32> -> vector<8x128xf32>
    %344 = arith.addf %341, %343 : vector<8x128xf32>
    %345 = vector.extract_strided_slice %303 {offsets = [0, 22], sizes = [8, 128], strides = [1, 1]} : vector<8x150xbf16> to vector<8x128xbf16>
    %cst_148 = arith.constant dense<0.000000e+00> : vector<8x128xf32>
    %346 = tpu.matmul %321, %345, %cst_148 {dimension_numbers = #tpu.dot_dimension_numbers<[1], [0], [0], [1], [0, 0, 1, 1], [], []>} : vector<8x8xbf16>, vector<8x128xbf16>, vector<8x128xf32> -> vector<8x128xf32>
    %347 = arith.addf %344, %346 : vector<8x128xf32>
    %348 = vector.broadcast %301 : vector<8x1xf32> to vector<8x128xf32>
    %349 = arith.addf %347, %348 : vector<8x128xf32>
    %350 = arith.negf %349 : vector<8x128xf32>
    %351 = math.exp %350 : vector<8x128xf32>
    %cst_149 = arith.constant 1.000000e+00 : f32
    %352 = vector.broadcast %cst_149 : f32 to vector<8x128xf32>
    %353 = arith.addf %352, %351 : vector<8x128xf32>
    %354 = arith.divf %352, %353 : vector<8x128xf32>
    %355 = arith.mulf %349, %354 : vector<8x128xf32>
    %356 = vector.broadcast %0 : vector<1x128xf32> to vector<8x128xf32>
    %357 = arith.mulf %355, %356 : vector<8x128xf32>
    %358 = arith.truncf %357 : vector<8x128xf32> to vector<8x128xbf16>
    %c4_150 = arith.constant 4 : index
    %c0_151 = arith.constant 0 : index
    %c0_152 = arith.constant 0 : index
    %c0_153 = arith.constant 0 : index
    %359 = vector.load %arg9[%c4_150, %c0_151, %c0_152, %c0_153] : memref<6x9x8x8xbf16, #tpu.memory_space<vmem>>, vector<1x9x8x8xbf16>
    %360 = vector.shape_cast %359 : vector<1x9x8x8xbf16> to vector<9x8x8xbf16>
    %c4_154 = arith.constant 4 : index
    %c0_155 = arith.constant 0 : index
    %c0_156 = arith.constant 0 : index
    %361 = vector.load %arg10[%c4_154, %c0_155, %c0_156] : memref<6x8x1xf32, #tpu.memory_space<vmem>>, vector<1x8x1xf32>
    %362 = vector.shape_cast %361 : vector<1x8x1xf32> to vector<8x1xf32>
    %cst_157 = arith.constant 0.000000e+00 : bf16
    %363 = vector.broadcast %cst_157 : bf16 to vector<8x11xbf16>
    %364 = tpu.concatenate %363, %358, %363 in 1 : vector<8x11xbf16>, vector<8x128xbf16>, vector<8x11xbf16> -> vector<8x150xbf16>
    %365 = vector.extract_strided_slice %360 {offsets = [0, 0, 0], sizes = [1, 8, 8], strides = [1, 1, 1]} : vector<9x8x8xbf16> to vector<1x8x8xbf16>
    %366 = vector.shape_cast %365 : vector<1x8x8xbf16> to vector<8x8xbf16>
    %367 = vector.extract_strided_slice %360 {offsets = [1, 0, 0], sizes = [1, 8, 8], strides = [1, 1, 1]} : vector<9x8x8xbf16> to vector<1x8x8xbf16>
    %368 = vector.shape_cast %367 : vector<1x8x8xbf16> to vector<8x8xbf16>
    %369 = vector.extract_strided_slice %360 {offsets = [2, 0, 0], sizes = [1, 8, 8], strides = [1, 1, 1]} : vector<9x8x8xbf16> to vector<1x8x8xbf16>
    %370 = vector.shape_cast %369 : vector<1x8x8xbf16> to vector<8x8xbf16>
    %371 = vector.extract_strided_slice %360 {offsets = [3, 0, 0], sizes = [1, 8, 8], strides = [1, 1, 1]} : vector<9x8x8xbf16> to vector<1x8x8xbf16>
    %372 = vector.shape_cast %371 : vector<1x8x8xbf16> to vector<8x8xbf16>
    %373 = vector.extract_strided_slice %360 {offsets = [4, 0, 0], sizes = [1, 8, 8], strides = [1, 1, 1]} : vector<9x8x8xbf16> to vector<1x8x8xbf16>
    %374 = vector.shape_cast %373 : vector<1x8x8xbf16> to vector<8x8xbf16>
    %375 = vector.extract_strided_slice %360 {offsets = [5, 0, 0], sizes = [1, 8, 8], strides = [1, 1, 1]} : vector<9x8x8xbf16> to vector<1x8x8xbf16>
    %376 = vector.shape_cast %375 : vector<1x8x8xbf16> to vector<8x8xbf16>
    %377 = vector.extract_strided_slice %360 {offsets = [6, 0, 0], sizes = [1, 8, 8], strides = [1, 1, 1]} : vector<9x8x8xbf16> to vector<1x8x8xbf16>
    %378 = vector.shape_cast %377 : vector<1x8x8xbf16> to vector<8x8xbf16>
    %379 = vector.extract_strided_slice %360 {offsets = [7, 0, 0], sizes = [1, 8, 8], strides = [1, 1, 1]} : vector<9x8x8xbf16> to vector<1x8x8xbf16>
    %380 = vector.shape_cast %379 : vector<1x8x8xbf16> to vector<8x8xbf16>
    %381 = vector.extract_strided_slice %360 {offsets = [8, 0, 0], sizes = [1, 8, 8], strides = [1, 1, 1]} : vector<9x8x8xbf16> to vector<1x8x8xbf16>
    %382 = vector.shape_cast %381 : vector<1x8x8xbf16> to vector<8x8xbf16>
    %383 = vector.extract_strided_slice %364 {offsets = [0, 0], sizes = [8, 128], strides = [1, 1]} : vector<8x150xbf16> to vector<8x128xbf16>
    %cst_158 = arith.constant dense<0.000000e+00> : vector<8x128xf32>
    %384 = tpu.matmul %366, %383, %cst_158 {dimension_numbers = #tpu.dot_dimension_numbers<[1], [0], [0], [1], [0, 0, 1, 1], [], []>} : vector<8x8xbf16>, vector<8x128xbf16>, vector<8x128xf32> -> vector<8x128xf32>
    %385 = vector.extract_strided_slice %364 {offsets = [0, 1], sizes = [8, 128], strides = [1, 1]} : vector<8x150xbf16> to vector<8x128xbf16>
    %cst_159 = arith.constant dense<0.000000e+00> : vector<8x128xf32>
    %386 = tpu.matmul %368, %385, %cst_159 {dimension_numbers = #tpu.dot_dimension_numbers<[1], [0], [0], [1], [0, 0, 1, 1], [], []>} : vector<8x8xbf16>, vector<8x128xbf16>, vector<8x128xf32> -> vector<8x128xf32>
    %387 = arith.addf %384, %386 : vector<8x128xf32>
    %388 = vector.extract_strided_slice %364 {offsets = [0, 2], sizes = [8, 128], strides = [1, 1]} : vector<8x150xbf16> to vector<8x128xbf16>
    %cst_160 = arith.constant dense<0.000000e+00> : vector<8x128xf32>
    %389 = tpu.matmul %370, %388, %cst_160 {dimension_numbers = #tpu.dot_dimension_numbers<[1], [0], [0], [1], [0, 0, 1, 1], [], []>} : vector<8x8xbf16>, vector<8x128xbf16>, vector<8x128xf32> -> vector<8x128xf32>
    %390 = arith.addf %387, %389 : vector<8x128xf32>
    %391 = vector.extract_strided_slice %364 {offsets = [0, 10], sizes = [8, 128], strides = [1, 1]} : vector<8x150xbf16> to vector<8x128xbf16>
    %cst_161 = arith.constant dense<0.000000e+00> : vector<8x128xf32>
    %392 = tpu.matmul %372, %391, %cst_161 {dimension_numbers = #tpu.dot_dimension_numbers<[1], [0], [0], [1], [0, 0, 1, 1], [], []>} : vector<8x8xbf16>, vector<8x128xbf16>, vector<8x128xf32> -> vector<8x128xf32>
    %393 = arith.addf %390, %392 : vector<8x128xf32>
    %394 = vector.extract_strided_slice %364 {offsets = [0, 11], sizes = [8, 128], strides = [1, 1]} : vector<8x150xbf16> to vector<8x128xbf16>
    %cst_162 = arith.constant dense<0.000000e+00> : vector<8x128xf32>
    %395 = tpu.matmul %374, %394, %cst_162 {dimension_numbers = #tpu.dot_dimension_numbers<[1], [0], [0], [1], [0, 0, 1, 1], [], []>} : vector<8x8xbf16>, vector<8x128xbf16>, vector<8x128xf32> -> vector<8x128xf32>
    %396 = arith.addf %393, %395 : vector<8x128xf32>
    %397 = vector.extract_strided_slice %364 {offsets = [0, 12], sizes = [8, 128], strides = [1, 1]} : vector<8x150xbf16> to vector<8x128xbf16>
    %cst_163 = arith.constant dense<0.000000e+00> : vector<8x128xf32>
    %398 = tpu.matmul %376, %397, %cst_163 {dimension_numbers = #tpu.dot_dimension_numbers<[1], [0], [0], [1], [0, 0, 1, 1], [], []>} : vector<8x8xbf16>, vector<8x128xbf16>, vector<8x128xf32> -> vector<8x128xf32>
    %399 = arith.addf %396, %398 : vector<8x128xf32>
    %400 = vector.extract_strided_slice %364 {offsets = [0, 20], sizes = [8, 128], strides = [1, 1]} : vector<8x150xbf16> to vector<8x128xbf16>
    %cst_164 = arith.constant dense<0.000000e+00> : vector<8x128xf32>
    %401 = tpu.matmul %378, %400, %cst_164 {dimension_numbers = #tpu.dot_dimension_numbers<[1], [0], [0], [1], [0, 0, 1, 1], [], []>} : vector<8x8xbf16>, vector<8x128xbf16>, vector<8x128xf32> -> vector<8x128xf32>
    %402 = arith.addf %399, %401 : vector<8x128xf32>
    %403 = vector.extract_strided_slice %364 {offsets = [0, 21], sizes = [8, 128], strides = [1, 1]} : vector<8x150xbf16> to vector<8x128xbf16>
    %cst_165 = arith.constant dense<0.000000e+00> : vector<8x128xf32>
    %404 = tpu.matmul %380, %403, %cst_165 {dimension_numbers = #tpu.dot_dimension_numbers<[1], [0], [0], [1], [0, 0, 1, 1], [], []>} : vector<8x8xbf16>, vector<8x128xbf16>, vector<8x128xf32> -> vector<8x128xf32>
    %405 = arith.addf %402, %404 : vector<8x128xf32>
    %406 = vector.extract_strided_slice %364 {offsets = [0, 22], sizes = [8, 128], strides = [1, 1]} : vector<8x150xbf16> to vector<8x128xbf16>
    %cst_166 = arith.constant dense<0.000000e+00> : vector<8x128xf32>
    %407 = tpu.matmul %382, %406, %cst_166 {dimension_numbers = #tpu.dot_dimension_numbers<[1], [0], [0], [1], [0, 0, 1, 1], [], []>} : vector<8x8xbf16>, vector<8x128xbf16>, vector<8x128xf32> -> vector<8x128xf32>
    %408 = arith.addf %405, %407 : vector<8x128xf32>
    %409 = vector.broadcast %362 : vector<8x1xf32> to vector<8x128xf32>
    %410 = arith.addf %408, %409 : vector<8x128xf32>
    %411 = arith.negf %410 : vector<8x128xf32>
    %412 = math.exp %411 : vector<8x128xf32>
    %cst_167 = arith.constant 1.000000e+00 : f32
    %413 = vector.broadcast %cst_167 : f32 to vector<8x128xf32>
    %414 = arith.addf %413, %412 : vector<8x128xf32>
    %415 = arith.divf %413, %414 : vector<8x128xf32>
    %416 = arith.mulf %410, %415 : vector<8x128xf32>
    %417 = vector.broadcast %0 : vector<1x128xf32> to vector<8x128xf32>
    %418 = arith.mulf %416, %417 : vector<8x128xf32>
    %419 = arith.truncf %418 : vector<8x128xf32> to vector<8x128xbf16>
    %c5_168 = arith.constant 5 : index
    %c0_169 = arith.constant 0 : index
    %c0_170 = arith.constant 0 : index
    %c0_171 = arith.constant 0 : index
    %420 = vector.load %arg9[%c5_168, %c0_169, %c0_170, %c0_171] : memref<6x9x8x8xbf16, #tpu.memory_space<vmem>>, vector<1x9x8x8xbf16>
    %421 = vector.shape_cast %420 : vector<1x9x8x8xbf16> to vector<9x8x8xbf16>
    %c5_172 = arith.constant 5 : index
    %c0_173 = arith.constant 0 : index
    %c0_174 = arith.constant 0 : index
    %422 = vector.load %arg10[%c5_172, %c0_173, %c0_174] : memref<6x8x1xf32, #tpu.memory_space<vmem>>, vector<1x8x1xf32>
    %423 = vector.shape_cast %422 : vector<1x8x1xf32> to vector<8x1xf32>
    %cst_175 = arith.constant 0.000000e+00 : bf16
    %424 = vector.broadcast %cst_175 : bf16 to vector<8x11xbf16>
    %425 = tpu.concatenate %424, %419, %424 in 1 : vector<8x11xbf16>, vector<8x128xbf16>, vector<8x11xbf16> -> vector<8x150xbf16>
    %426 = vector.extract_strided_slice %421 {offsets = [0, 0, 0], sizes = [1, 8, 8], strides = [1, 1, 1]} : vector<9x8x8xbf16> to vector<1x8x8xbf16>
    %427 = vector.shape_cast %426 : vector<1x8x8xbf16> to vector<8x8xbf16>
    %428 = vector.extract_strided_slice %421 {offsets = [1, 0, 0], sizes = [1, 8, 8], strides = [1, 1, 1]} : vector<9x8x8xbf16> to vector<1x8x8xbf16>
    %429 = vector.shape_cast %428 : vector<1x8x8xbf16> to vector<8x8xbf16>
    %430 = vector.extract_strided_slice %421 {offsets = [2, 0, 0], sizes = [1, 8, 8], strides = [1, 1, 1]} : vector<9x8x8xbf16> to vector<1x8x8xbf16>
    %431 = vector.shape_cast %430 : vector<1x8x8xbf16> to vector<8x8xbf16>
    %432 = vector.extract_strided_slice %421 {offsets = [3, 0, 0], sizes = [1, 8, 8], strides = [1, 1, 1]} : vector<9x8x8xbf16> to vector<1x8x8xbf16>
    %433 = vector.shape_cast %432 : vector<1x8x8xbf16> to vector<8x8xbf16>
    %434 = vector.extract_strided_slice %421 {offsets = [4, 0, 0], sizes = [1, 8, 8], strides = [1, 1, 1]} : vector<9x8x8xbf16> to vector<1x8x8xbf16>
    %435 = vector.shape_cast %434 : vector<1x8x8xbf16> to vector<8x8xbf16>
    %436 = vector.extract_strided_slice %421 {offsets = [5, 0, 0], sizes = [1, 8, 8], strides = [1, 1, 1]} : vector<9x8x8xbf16> to vector<1x8x8xbf16>
    %437 = vector.shape_cast %436 : vector<1x8x8xbf16> to vector<8x8xbf16>
    %438 = vector.extract_strided_slice %421 {offsets = [6, 0, 0], sizes = [1, 8, 8], strides = [1, 1, 1]} : vector<9x8x8xbf16> to vector<1x8x8xbf16>
    %439 = vector.shape_cast %438 : vector<1x8x8xbf16> to vector<8x8xbf16>
    %440 = vector.extract_strided_slice %421 {offsets = [7, 0, 0], sizes = [1, 8, 8], strides = [1, 1, 1]} : vector<9x8x8xbf16> to vector<1x8x8xbf16>
    %441 = vector.shape_cast %440 : vector<1x8x8xbf16> to vector<8x8xbf16>
    %442 = vector.extract_strided_slice %421 {offsets = [8, 0, 0], sizes = [1, 8, 8], strides = [1, 1, 1]} : vector<9x8x8xbf16> to vector<1x8x8xbf16>
    %443 = vector.shape_cast %442 : vector<1x8x8xbf16> to vector<8x8xbf16>
    %444 = vector.extract_strided_slice %425 {offsets = [0, 0], sizes = [8, 128], strides = [1, 1]} : vector<8x150xbf16> to vector<8x128xbf16>
    %cst_176 = arith.constant dense<0.000000e+00> : vector<8x128xf32>
    %445 = tpu.matmul %427, %444, %cst_176 {dimension_numbers = #tpu.dot_dimension_numbers<[1], [0], [0], [1], [0, 0, 1, 1], [], []>} : vector<8x8xbf16>, vector<8x128xbf16>, vector<8x128xf32> -> vector<8x128xf32>
    %446 = vector.extract_strided_slice %425 {offsets = [0, 1], sizes = [8, 128], strides = [1, 1]} : vector<8x150xbf16> to vector<8x128xbf16>
    %cst_177 = arith.constant dense<0.000000e+00> : vector<8x128xf32>
    %447 = tpu.matmul %429, %446, %cst_177 {dimension_numbers = #tpu.dot_dimension_numbers<[1], [0], [0], [1], [0, 0, 1, 1], [], []>} : vector<8x8xbf16>, vector<8x128xbf16>, vector<8x128xf32> -> vector<8x128xf32>
    %448 = arith.addf %445, %447 : vector<8x128xf32>
    %449 = vector.extract_strided_slice %425 {offsets = [0, 2], sizes = [8, 128], strides = [1, 1]} : vector<8x150xbf16> to vector<8x128xbf16>
    %cst_178 = arith.constant dense<0.000000e+00> : vector<8x128xf32>
    %450 = tpu.matmul %431, %449, %cst_178 {dimension_numbers = #tpu.dot_dimension_numbers<[1], [0], [0], [1], [0, 0, 1, 1], [], []>} : vector<8x8xbf16>, vector<8x128xbf16>, vector<8x128xf32> -> vector<8x128xf32>
    %451 = arith.addf %448, %450 : vector<8x128xf32>
    %452 = vector.extract_strided_slice %425 {offsets = [0, 10], sizes = [8, 128], strides = [1, 1]} : vector<8x150xbf16> to vector<8x128xbf16>
    %cst_179 = arith.constant dense<0.000000e+00> : vector<8x128xf32>
    %453 = tpu.matmul %433, %452, %cst_179 {dimension_numbers = #tpu.dot_dimension_numbers<[1], [0], [0], [1], [0, 0, 1, 1], [], []>} : vector<8x8xbf16>, vector<8x128xbf16>, vector<8x128xf32> -> vector<8x128xf32>
    %454 = arith.addf %451, %453 : vector<8x128xf32>
    %455 = vector.extract_strided_slice %425 {offsets = [0, 11], sizes = [8, 128], strides = [1, 1]} : vector<8x150xbf16> to vector<8x128xbf16>
    %cst_180 = arith.constant dense<0.000000e+00> : vector<8x128xf32>
    %456 = tpu.matmul %435, %455, %cst_180 {dimension_numbers = #tpu.dot_dimension_numbers<[1], [0], [0], [1], [0, 0, 1, 1], [], []>} : vector<8x8xbf16>, vector<8x128xbf16>, vector<8x128xf32> -> vector<8x128xf32>
    %457 = arith.addf %454, %456 : vector<8x128xf32>
    %458 = vector.extract_strided_slice %425 {offsets = [0, 12], sizes = [8, 128], strides = [1, 1]} : vector<8x150xbf16> to vector<8x128xbf16>
    %cst_181 = arith.constant dense<0.000000e+00> : vector<8x128xf32>
    %459 = tpu.matmul %437, %458, %cst_181 {dimension_numbers = #tpu.dot_dimension_numbers<[1], [0], [0], [1], [0, 0, 1, 1], [], []>} : vector<8x8xbf16>, vector<8x128xbf16>, vector<8x128xf32> -> vector<8x128xf32>
    %460 = arith.addf %457, %459 : vector<8x128xf32>
    %461 = vector.extract_strided_slice %425 {offsets = [0, 20], sizes = [8, 128], strides = [1, 1]} : vector<8x150xbf16> to vector<8x128xbf16>
    %cst_182 = arith.constant dense<0.000000e+00> : vector<8x128xf32>
    %462 = tpu.matmul %439, %461, %cst_182 {dimension_numbers = #tpu.dot_dimension_numbers<[1], [0], [0], [1], [0, 0, 1, 1], [], []>} : vector<8x8xbf16>, vector<8x128xbf16>, vector<8x128xf32> -> vector<8x128xf32>
    %463 = arith.addf %460, %462 : vector<8x128xf32>
    %464 = vector.extract_strided_slice %425 {offsets = [0, 21], sizes = [8, 128], strides = [1, 1]} : vector<8x150xbf16> to vector<8x128xbf16>
    %cst_183 = arith.constant dense<0.000000e+00> : vector<8x128xf32>
    %465 = tpu.matmul %441, %464, %cst_183 {dimension_numbers = #tpu.dot_dimension_numbers<[1], [0], [0], [1], [0, 0, 1, 1], [], []>} : vector<8x8xbf16>, vector<8x128xbf16>, vector<8x128xf32> -> vector<8x128xf32>
    %466 = arith.addf %463, %465 : vector<8x128xf32>
    %467 = vector.extract_strided_slice %425 {offsets = [0, 22], sizes = [8, 128], strides = [1, 1]} : vector<8x150xbf16> to vector<8x128xbf16>
    %cst_184 = arith.constant dense<0.000000e+00> : vector<8x128xf32>
    %468 = tpu.matmul %443, %467, %cst_184 {dimension_numbers = #tpu.dot_dimension_numbers<[1], [0], [0], [1], [0, 0, 1, 1], [], []>} : vector<8x8xbf16>, vector<8x128xbf16>, vector<8x128xf32> -> vector<8x128xf32>
    %469 = arith.addf %466, %468 : vector<8x128xf32>
    %470 = vector.broadcast %423 : vector<8x1xf32> to vector<8x128xf32>
    %471 = arith.addf %469, %470 : vector<8x128xf32>
    %472 = arith.negf %471 : vector<8x128xf32>
    %473 = math.exp %472 : vector<8x128xf32>
    %cst_185 = arith.constant 1.000000e+00 : f32
    %474 = vector.broadcast %cst_185 : f32 to vector<8x128xf32>
    %475 = arith.addf %474, %473 : vector<8x128xf32>
    %476 = arith.divf %474, %475 : vector<8x128xf32>
    %477 = arith.mulf %471, %476 : vector<8x128xf32>
    %478 = vector.broadcast %0 : vector<1x128xf32> to vector<8x128xf32>
    %479 = arith.mulf %477, %478 : vector<8x128xf32>
    %480 = arith.truncf %479 : vector<8x128xf32> to vector<8x128xbf16>
    %c0_186 = arith.constant 0 : index
    %c0_187 = arith.constant 0 : index
    %481 = vector.load %arg12[%c0_186, %c0_187] : memref<16x1xf32, #tpu.memory_space<vmem>>, vector<16x1xf32>
    %c0_188 = arith.constant 0 : index
    %c0_189 = arith.constant 0 : index
    %c0_190 = arith.constant 0 : index
    %482 = vector.load %arg11[%c0_188, %c0_189, %c0_190] : memref<5x16x8xbf16, #tpu.memory_space<vmem>>, vector<1x16x8xbf16>
    %483 = vector.shape_cast %482 : vector<1x16x8xbf16> to vector<16x8xbf16>
    %cst_191 = arith.constant dense<0.000000e+00> : vector<16x128xf32>
    %484 = tpu.matmul %483, %94, %cst_191 {dimension_numbers = #tpu.dot_dimension_numbers<[1], [0], [0], [1], [0, 0, 1, 1], [], []>} : vector<16x8xbf16>, vector<8x128xbf16>, vector<16x128xf32> -> vector<16x128xf32>
    %485 = vector.broadcast %481 : vector<16x1xf32> to vector<16x128xf32>
    %486 = arith.addf %485, %484 : vector<16x128xf32>
    %c1_192 = arith.constant 1 : index
    %c0_193 = arith.constant 0 : index
    %c0_194 = arith.constant 0 : index
    %487 = vector.load %arg11[%c1_192, %c0_193, %c0_194] : memref<5x16x8xbf16, #tpu.memory_space<vmem>>, vector<1x16x8xbf16>
    %488 = vector.shape_cast %487 : vector<1x16x8xbf16> to vector<16x8xbf16>
    %cst_195 = arith.constant dense<0.000000e+00> : vector<16x128xf32>
    %489 = tpu.matmul %488, %114, %cst_195 {dimension_numbers = #tpu.dot_dimension_numbers<[1], [0], [0], [1], [0, 0, 1, 1], [], []>} : vector<16x8xbf16>, vector<8x128xbf16>, vector<16x128xf32> -> vector<16x128xf32>
    %490 = arith.addf %486, %489 : vector<16x128xf32>
    %c2_196 = arith.constant 2 : index
    %c0_197 = arith.constant 0 : index
    %c0_198 = arith.constant 0 : index
    %491 = vector.load %arg11[%c2_196, %c0_197, %c0_198] : memref<5x16x8xbf16, #tpu.memory_space<vmem>>, vector<1x16x8xbf16>
    %492 = vector.shape_cast %491 : vector<1x16x8xbf16> to vector<16x8xbf16>
    %cst_199 = arith.constant dense<0.000000e+00> : vector<16x128xf32>
    %493 = tpu.matmul %492, %236, %cst_199 {dimension_numbers = #tpu.dot_dimension_numbers<[1], [0], [0], [1], [0, 0, 1, 1], [], []>} : vector<16x8xbf16>, vector<8x128xbf16>, vector<16x128xf32> -> vector<16x128xf32>
    %494 = arith.addf %490, %493 : vector<16x128xf32>
    %c3_200 = arith.constant 3 : index
    %c0_201 = arith.constant 0 : index
    %c0_202 = arith.constant 0 : index
    %495 = vector.load %arg11[%c3_200, %c0_201, %c0_202] : memref<5x16x8xbf16, #tpu.memory_space<vmem>>, vector<1x16x8xbf16>
    %496 = vector.shape_cast %495 : vector<1x16x8xbf16> to vector<16x8xbf16>
    %cst_203 = arith.constant dense<0.000000e+00> : vector<16x128xf32>
    %497 = tpu.matmul %496, %358, %cst_203 {dimension_numbers = #tpu.dot_dimension_numbers<[1], [0], [0], [1], [0, 0, 1, 1], [], []>} : vector<16x8xbf16>, vector<8x128xbf16>, vector<16x128xf32> -> vector<16x128xf32>
    %498 = arith.addf %494, %497 : vector<16x128xf32>
    %c4_204 = arith.constant 4 : index
    %c0_205 = arith.constant 0 : index
    %c0_206 = arith.constant 0 : index
    %499 = vector.load %arg11[%c4_204, %c0_205, %c0_206] : memref<5x16x8xbf16, #tpu.memory_space<vmem>>, vector<1x16x8xbf16>
    %500 = vector.shape_cast %499 : vector<1x16x8xbf16> to vector<16x8xbf16>
    %cst_207 = arith.constant dense<0.000000e+00> : vector<16x128xf32>
    %501 = tpu.matmul %500, %480, %cst_207 {dimension_numbers = #tpu.dot_dimension_numbers<[1], [0], [0], [1], [0, 0, 1, 1], [], []>} : vector<16x8xbf16>, vector<8x128xbf16>, vector<16x128xf32> -> vector<16x128xf32>
    %502 = arith.addf %498, %501 : vector<16x128xf32>
    %503 = arith.negf %502 : vector<16x128xf32>
    %504 = math.exp %503 : vector<16x128xf32>
    %cst_208 = arith.constant 1.000000e+00 : f32
    %505 = vector.broadcast %cst_208 : f32 to vector<16x128xf32>
    %506 = arith.addf %505, %504 : vector<16x128xf32>
    %507 = arith.divf %505, %506 : vector<16x128xf32>
    %508 = arith.mulf %502, %507 : vector<16x128xf32>
    %509 = vector.broadcast %0 : vector<1x128xf32> to vector<16x128xf32>
    %510 = arith.mulf %508, %509 : vector<16x128xf32>
    %511 = arith.truncf %510 : vector<16x128xf32> to vector<16x128xbf16>
    %c0_209 = arith.constant 0 : index
    %c0_210 = arith.constant 0 : index
    %c0_211 = arith.constant 0 : index
    %512 = vector.load %arg13[%c0_209, %c0_210, %c0_211] : memref<1x16x128xbf16, #tpu.memory_space<vmem>>, vector<1x16x128xbf16>
    %513 = vector.shape_cast %512 : vector<1x16x128xbf16> to vector<16x128xbf16>
    %514 = vector.shape_cast %511 : vector<16x128xbf16> to vector<1x16x128xbf16>
    tpu.vector_store %arg13[%c0_209, %c0_210, %c0_211], %514 {strides = array<i32>} : memref<1x16x128xbf16, #tpu.memory_space<vmem>>, vector<1x16x128xbf16>,
    return
  }
  func.func @transform_0(%arg0: i32) -> (i32, i32, i32, i32) {
    %c0_i32 = arith.constant 0 : i32
    %c0_i32_0 = arith.constant 0 : i32
    %c0_i32_1 = arith.constant 0 : i32
    %c0_i32_2 = arith.constant 0 : i32
    return %arg0, %c0_i32, %c0_i32_0, %c0_i32_1 : i32, i32, i32, i32
  }
  func.func @transform_1(%arg0: i32) -> (i32, i32, i32) {
    %c0_i32 = arith.constant 0 : i32
    %c0_i32_0 = arith.constant 0 : i32
    %c0_i32_1 = arith.constant 0 : i32
    return %arg0, %c0_i32, %c0_i32_0 : i32, i32, i32
  }
  func.func @transform_2(%arg0: i32) -> (i32, i32) {
    %c0_i32 = arith.constant 0 : i32
    %c0_i32_0 = arith.constant 0 : i32
    %c0_i32_1 = arith.constant 0 : i32
    return %c0_i32, %c0_i32_0 : i32, i32
  }
  func.func @transform_3(%arg0: i32) -> (i32, i32, i32) {
    %c0_i32 = arith.constant 0 : i32
    %c0_i32_0 = arith.constant 0 : i32
    %c0_i32_1 = arith.constant 0 : i32
    %c0_i32_2 = arith.constant 0 : i32
    return %c0_i32, %c0_i32_0, %c0_i32_1 : i32, i32, i32
  }
  func.func @transform_4(%arg0: i32) -> (i32, i32) {
    %c0_i32 = arith.constant 0 : i32
    %c0_i32_0 = arith.constant 0 : i32
    %c0_i32_1 = arith.constant 0 : i32
    return %c0_i32, %c0_i32_0 : i32, i32
  }
  func.func @transform_5(%arg0: i32) -> (i32, i32, i32) {
    %c0_i32 = arith.constant 0 : i32
    %c0_i32_0 = arith.constant 0 : i32
    %c0_i32_1 = arith.constant 0 : i32
    %c0_i32_2 = arith.constant 0 : i32
    return %c0_i32, %c0_i32_0, %c0_i32_1 : i32, i32, i32
  }
  func.func @transform_6(%arg0: i32) -> (i32, i32, i32) {
    %c0_i32 = arith.constant 0 : i32
    %c0_i32_0 = arith.constant 0 : i32
    %c0_i32_1 = arith.constant 0 : i32
    %c0_i32_2 = arith.constant 0 : i32
    return %c0_i32, %c0_i32_0, %c0_i32_1 : i32, i32, i32
  }
  func.func @transform_7(%arg0: i32) -> (i32, i32, i32) {
    %c0_i32 = arith.constant 0 : i32
    %c0_i32_0 = arith.constant 0 : i32
    %c0_i32_1 = arith.constant 0 : i32
    %c0_i32_2 = arith.constant 0 : i32
    return %c0_i32, %c0_i32_0, %c0_i32_1 : i32, i32, i32
  }
  func.func @transform_8(%arg0: i32) -> (i32, i32, i32, i32) {
    %c0_i32 = arith.constant 0 : i32
    %c0_i32_0 = arith.constant 0 : i32
    %c0_i32_1 = arith.constant 0 : i32
    %c0_i32_2 = arith.constant 0 : i32
    %c0_i32_3 = arith.constant 0 : i32
    return %c0_i32, %c0_i32_0, %c0_i32_1, %c0_i32_2 : i32, i32, i32, i32
  }
  func.func @transform_9(%arg0: i32) -> (i32, i32, i32) {
    %c0_i32 = arith.constant 0 : i32
    %c0_i32_0 = arith.constant 0 : i32
    %c0_i32_1 = arith.constant 0 : i32
    %c0_i32_2 = arith.constant 0 : i32
    return %c0_i32, %c0_i32_0, %c0_i32_1 : i32, i32, i32
  }
  func.func @transform_10(%arg0: i32) -> (i32, i32, i32) {
    %c0_i32 = arith.constant 0 : i32
    %c0_i32_0 = arith.constant 0 : i32
    %c0_i32_1 = arith.constant 0 : i32
    %c0_i32_2 = arith.constant 0 : i32
    return %c0_i32, %c0_i32_0, %c0_i32_1 : i32, i32, i32
  }
  func.func @transform_11(%arg0: i32) -> (i32, i32) {
    %c0_i32 = arith.constant 0 : i32
    %c0_i32_0 = arith.constant 0 : i32
    %c0_i32_1 = arith.constant 0 : i32
    return %c0_i32, %c0_i32_0 : i32, i32
  }
  func.func @transform_12(%arg0: i32) -> (i32, i32, i32) {
    %c0_i32 = arith.constant 0 : i32
    %c0_i32_0 = arith.constant 0 : i32
    %c0_i32_1 = arith.constant 0 : i32
    return %arg0, %c0_i32, %c0_i32_0 : i32, i32, i32
  }
}

</mosaic_0001>

<bundles_post_ra>
// kernel: neck_section_conv.1
= control target key start
LH: loop header
LB: loop body
LE: loop exit
PB: predicated region body
PF: predicated region fallthrough
CT: control target
= control target key end

     0   :  { %s5528_s21 = smov 0   ;;  %s6398_s0 = inlined_call_operand.vmem [shape: bf16[2,4,8,128], index: 0, kind: input, shape index: {}]   ;;  %s6399_s1 = inlined_call_operand.vmem [shape: bf16[2,16,128], index: 1, kind: input, shape index: {}]   ;;  %s6400_s2 = inlined_call_operand.vmem [shape: f32[1,128], index: 2, kind: input, shape index: {}]   ;;  %s6401_s3 = inlined_call_operand.vmem [shape: bf16[9,8,8], index: 3, kind: input, shape index: {}]   ;;  %s6402_s4 = inlined_call_operand.vmem [shape: f32[8,1], index: 4, kind: input, shape index: {}]   ;;  %s6403_s5 = inlined_call_operand.vmem [shape: bf16[2,8,8], index: 5, kind: input, shape index: {}]   ;;  %s6404_s6 = inlined_call_operand.vmem [shape: bf16[2,8,16], index: 6, kind: input, shape index: {}]   ;;  %s6405_s7 = inlined_call_operand.vmem [shape: f32[2,8,1], index: 7, kind: input, shape index: {}]   ;;  %s6406_s8 = inlined_call_operand.vmem [shape: bf16[6,9,8,8], index: 8, kind: input, shape index: {}]   ;;  %s6407_s9 = inlined_call_operand.vmem [shape: f32[6,8,1], index: 9, kind: input, shape index: {}]   ;;  %s6408_s10 = inlined_call_operand.vmem [shape: bf16[5,16,8], index: 10, kind: input, shape index: {}]   ;;  %s6409_s11 = inlined_call_operand.vmem [shape: f32[16,1], index: 11, kind: input, shape index: {}]   ;;  %s6410_s12 = inlined_call_operand.vmem [shape: bf16[2,16,128], index: 12, kind: output, shape index: {}]  }
   0x1 LB: > { %s4580_s22 = sadd.s32 4294967295, %s5449_s21   ;;  %p4584_p0 = scmp.ge.s32.totalorder %s5449_s21, 1  ;;  %s5449_s21 = sphi %s5528_s21, %s22_s21  }
   0x2   : > { %p372_p1 = scmp.lt.s32.totalorder %s5449_s21, 3 }
   0x4   : > { %p373_p2 = pnand %p4584_p0, %p372_p1 }
   0x5   : > { %p419_p3 = scmp.lt.s32.totalorder (!%p373_p2), %s4580_s22, 1  ;;  %s5451_s27 = smov (!%p373_p2), 11   ;;  %v5452_v4 = vmov (!%p373_p2), 0.0   ;;  %vm5453_vm0 = vmmov (!%p373_p2), 0   ;;  %vm442_vm1 = vcmask (!%p373_p2), 89088   ;;  %v494_v17 = vld [vmem:[%s6402_s4] sm:$0xff] (!%p373_p2) }
   0x6   : > { %376 = sbr.rel (%p373_p2) target bundleno = 4158 (0x103e), region = 68  ;;  %4915 = vmatprep.subr.bf16.mxu0 (!%p373_p2), %v5452_v4  ;;  %4945 = vmatprep.subr.bf16.mxu1 (!%p373_p2), %v5452_v4  ;;  %s5454_s28 = smov (!%p373_p2), 117   ;;  %v5458_v18 = vmov (!%p373_p2), 0   ;;  %vm501_vm2 = vcmask (!%p373_p2), 957440   ;;  %vm507_vm3 = vcmask (!%p373_p2), 1043456   ;;  %vm503_vm4 = vcmask (!%p373_p2), 64512  }
   0x7   : > { %4917 = vmatprep.mubr.msk.bf16.mxu0 (!%p373_p2), %vm5453_vm0, %v5452_v4  ;;  %4947 = vmatprep.mubr.msk.bf16.mxu1 (!%p373_p2), %vm5453_vm0, %v5452_v4  ;;  %s5455_s29 = smov (!%p373_p2), 116   ;;  %s5456_s30 = smov (!%p373_p2), 107   ;;  %v4598_v23 = vld [vmem:[%s6401_s3 + $0x4] sm:$0xf] (!%p373_p2)  ;;  %vm608_vm5 = vcmask (!%p373_p2), 949248   ;;  %vm821_vm6 = vcmask (!%p373_p2), 875520  }
   0x8   : > { %s5457_s13 = smov (!%p373_p2), 106   ;;  %5385 = vset.pattern.permute.xlu0 (!%p373_p2), %v5458_v18  ;;  %5386 = vset.pattern.permute.xlu1 (!%p373_p2), %v5458_v18  ;;  %v477_v31 = vld [vmem:[%s6401_s3] sm:$0xf] (!%p373_p2)  ;;  %v4599_v38 = vld [vmem:[%s6401_s3 + $0x8] sm:$0xf] (!%p373_p2)  ;;  %vm926_vm7 = vcmask (!%p373_p2), 867328  }
   0x9   : > { %v4602_v44 = vld [vmem:[%s6401_s3 + $0x14] sm:$0xf] (!%p373_p2)  ;;  %v4600_v48 = vld [vmem:[%s6401_s3 + $0xc] sm:$0xf] (!%p373_p2)  ;;  %v4604_v54 = vld [vmem:[%s6401_s3 + $0x1c] sm:$0xf] (!%p373_p2) }
   0xa   : > { %v4601_v56 = vld [vmem:[%s6401_s3 + $0x10] sm:$0xf] (!%p373_p2)  ;;  %v4603_v61 = vld [vmem:[%s6401_s3 + $0x18] sm:$0xf] (!%p373_p2)  ;;  %v4605_v63 = vld [vmem:[%s6401_s3 + $0x20] sm:$0xf] (!%p373_p2) }
   0xb   : > { %vm1006_vm8 = vcmask (!%p373_p2), 130048   ;;  %s5459_s18 = smov (!%p373_p2), 127   ;;  %s5461_s24 = smov (!%p373_p2), 118   ;;  %vm1241_vm9 = vcmask (!%p373_p2), 1039360   ;;  %vm1338_vm10 = vcmask (!%p373_p2), 1031168   ;;  %vm1391_vm11 = vcmask (!%p373_p2), 965632  }
   0xc   : > { %vm1548_vm12 = vcmask (!%p373_p2), 883712  }
   0xd   : > { %s6412_s22 = smov (!%p419_p3, %s4580_s22), 1 }
   0xe   : > { %s4761_s23 = sshll.u32 %s6412_s22, 4  ;;  %s4762_s25 = sshll.u32 %s6412_s22, 3 }
   0xf   : > { %s423_s26 = scalar_lea.vmem %s6398_s0, %s4761_s23  ;;  %s428_s15 = scalar_lea.vmem %s6399_s1, %s4762_s25 }
  0x10   : > { %v5387_v0 = vld [vmem:[%s423_s26 + $0x4] ss:$0 sps:$4 sm:$0xff]   ;;  %v5389_v1 = vld [vmem:[%s423_s26 + $0x8] ss:$0 sps:$4 sm:$0xff]   ;;  %v5388_v2 = vld [vmem:[%s423_s26] ss:$0 sps:$4 sm:$0xff]  }
  0x11   : > { %452 = vrot.lane.b32.xlu0 %v5387_v0, %s5451_s27  ;;  %462 = vrot.lane.b32.xlu1 %v5389_v1, %s5451_s27  ;;  %v5390_v3 = vld [vmem:[%s423_s26 + $0xc] ss:$0 sps:$4 sm:$0xff]   ;;  %v5391_v0 = vld [vmem:[%s428_s15] sm:$0xff]   ;;  %s5460_s23 = smov 126   ;;  %s5462_s26 = smov 108  }
  0x12   : > { %v999_v1 = vld [vmem:[%s6404_s6] sm:$0xf] }
  0x15   : > { %440 = vrot.lane.b32.xlu0 %v5388_v2, %s5451_s27  ;;  %472 = vrot.lane.b32.xlu1 %v5390_v3, %s5451_s27  ;;  %v4622_v2 = vld [vmem:[%s6404_s6 + $0x4] sm:$0xf]  ;;  %v4625_v3 = vld [vmem:[%s6405_s7 + $0x8] sm:$0xff] }
  0x83   : > { %v453_v5 = vpop.permute.xlu0 %452  ;;  %v463_v11 = vpop.permute.xlu1 %462 }
  0x84   : > { %v456_v6 = vsel %vm442_vm1, %v453_v5, 0  ;;  %v455_v7 = vsel %vm442_vm1, 0, %v453_v5  ;;  %v466_v12 = vsel %vm442_vm1, %v463_v11, 0  ;;  %v465_v13 = vsel %vm442_vm1, 0, %v463_v11 }
  0x85   : > { %499 = vrot.lane.b32.xlu1 %v456_v6, %s5454_s28  ;;  %497 = vrot.lane.b32.xlu0 %v455_v7, %s5454_s28 }
  0x87   : > { %v441_v8 = vpop.permute.xlu0 %440  ;;  %v473_v14 = vpop.permute.xlu1 %472 }
  0x88   : > { %v446_v9 = vsel %vm442_vm1, %v441_v8, 0  ;;  %v445_v10 = vsel %vm442_vm1, 0, %v441_v8  ;;  %v476_v15 = vsel %vm442_vm1, %v473_v14, 0  ;;  %v475_v16 = vsel %vm442_vm1, 0, %v473_v14 }
  0x89   : > { %555 = vrot.lane.b32.xlu1 %v446_v9, %s5454_s28  ;;  %553 = vrot.lane.b32.xlu0 %v445_v10, %s5454_s28 }
  0x8d   : > { %606 = vrot.lane.b32.xlu1 %v446_v9, %s5455_s29  ;;  %604 = vrot.lane.b32.xlu0 %v445_v10, %s5455_s29 }
  0x91   : > { %661 = vrot.lane.b32.xlu1 %v466_v12, %s5454_s28  ;;  %659 = vrot.lane.b32.xlu0 %v465_v13, %s5454_s28 }
  0x95   : > { %715 = vrot.lane.b32.xlu1 %v476_v15, %s5454_s28  ;;  %713 = vrot.lane.b32.xlu0 %v475_v16, %s5454_s28 }
  0x99   : > { %767 = vrot.lane.b32.xlu1 %v466_v12, %s5455_s29  ;;  %765 = vrot.lane.b32.xlu0 %v465_v13, %s5455_s29 }
  0x9d   : > { %819 = vrot.lane.b32.xlu1 %v446_v9, %s5456_s30  ;;  %817 = vrot.lane.b32.xlu0 %v445_v10, %s5456_s30 }
  0xa1   : > { %872 = vrot.lane.b32.xlu1 %v456_v6, %s5456_s30  ;;  %870 = vrot.lane.b32.xlu0 %v455_v7, %s5456_s30 }
  0xa5   : > { %924 = vrot.lane.b32.xlu1 %v446_v9, %s5457_s13  ;;  %922 = vrot.lane.b32.xlu0 %v445_v10, %s5457_s13 }
  0xa9   : > { %977 = vperm.xlu0 %5385, %v494_v17   ;;  %1206 = vperm.xlu1 %5386, %v4625_v3  }
  0xf7   : > { %v500_v19 = vpop.permute.xlu1 %499  ;;  %v498_v20 = vpop.permute.xlu0 %497 }
  0xf8   : > { %v502_v21 = vsel %vm501_vm2, %v498_v20, %v500_v19 }
  0xf9   : > { %v509_v22 = vsel %vm507_vm3, %v502_v21, 0 }
  0xfa   : > { %4916 = vmatpush3.bf16.msra.mxu0 %v509_v22 }
  0xfb   : > { %v556_v24 = vpop.permute.xlu1 %555  ;;  %v554_v25 = vpop.permute.xlu0 %553  ;;  %4921 = vmatprep.subr.bf16.mxu0 %v5452_v4 }
  0xfc   : > { %v557_v26 = vsel %vm501_vm2, %v554_v25, %v556_v24 }
  0xfd   : > { %v562_v27 = vsel %vm507_vm3, %v557_v26, 0  ;;  %4918 = vmatmul.mubr.msk.bf16.vlgmr.msra.gmra.mrb[0].mxu0 %vm503_vm4, %v4598_v23 }
  0xfe   : > { %4922 = vmatpush3.bf16.msra.mxu0 %v562_v27  ;;  %4923 = vmatprep.mubr.msk.bf16.mxu0 %vm5453_vm0, %v5452_v4 }
  0xff   : > { %v607_v28 = vpop.permute.xlu1 %606  ;;  %v605_v29 = vpop.permute.xlu0 %604  ;;  %4927 = vmatprep.subr.bf16.mxu0 %v5452_v4 }
 0x100   : > { %v609_v30 = vsel %vm608_vm5, %v605_v29, %v607_v28 }
 0x101   : > { %v614_v34 = vsel %vm507_vm3, %v609_v30, 0 }
 0x103   : > { %v662_v32 = vpop.permute.xlu1 %661  ;;  %v660_v33 = vpop.permute.xlu0 %659 }
 0x104   : > { %v663_v37 = vsel %vm501_vm2, %v660_v33, %v662_v32 }
 0x105   : > { %4924 = vmatmul.mubr.msk.bf16.vlgmr.msra.gmra.mrb[4].mxu0 %vm503_vm4, %v477_v31  ;;  %v668_v39 = vsel %vm507_vm3, %v663_v37, 0 }
 0x106   : > { %4928 = vmatpush3.bf16.msra.mxu0 %v614_v34  ;;  %4929 = vmatprep.mubr.msk.bf16.mxu0 %vm5453_vm0, %v5452_v4 }
 0x107   : > { %v716_v35 = vpop.permute.xlu1 %715  ;;  %v714_v36 = vpop.permute.xlu0 %713  ;;  %4933 = vmatprep.subr.bf16.mxu0 %v5452_v4 }
 0x108   : > { %v717_v47 = vsel %vm501_vm2, %v714_v36, %v716_v35 }
 0x109   : > { %v722_v49 = vsel %vm507_vm3, %v717_v47, 0 }
 0x10b   : > { %v768_v40 = vpop.permute.xlu1 %767  ;;  %v766_v41 = vpop.permute.xlu0 %765 }
 0x10c   : > { %v769_v42 = vsel %vm608_vm5, %v766_v41, %v768_v40 }
 0x10d   : > { %4930 = vmatmul.mubr.msk.bf16.vlgmr.msra.gmra.mrb[8].mxu0 %vm503_vm4, %v4599_v38  ;;  %v774_v43 = vsel %vm507_vm3, %v769_v42, 0 }
 0x10e   : > { %4934 = vmatpush3.bf16.msra.mxu0 %v668_v39  ;;  %4946 = vmatpush3.bf16.msra.mxu1 %v774_v43 }
 0x10f   : > { %v820_v45 = vpop.permute.xlu1 %819  ;;  %v818_v46 = vpop.permute.xlu0 %817  ;;  %4935 = vmatprep.mubr.msk.bf16.mxu0 %vm5453_vm0, %v5452_v4  ;;  %4957 = vmatprep.subr.bf16.mxu1 %v5452_v4 }
 0x110   : > { %4939 = vmatprep.subr.bf16.mxu0 %v5452_v4  ;;  %v822_v55 = vsel %vm821_vm6, %v818_v46, %v820_v45 }
 0x111   : > { %4948 = vmatmul.mubr.msk.bf16.vlgmr.msra.gmra.mrb[0].mxu1 %vm503_vm4, %v4602_v44  ;;  %v827_v57 = vsel %vm507_vm3, %v822_v55, 0  ;;  %v5686_v55 = vld [vmem:[%s6400_s2] ss:$0 sm:$0xff] }
 0x112   : > { %4959 = vmatprep.mubr.msk.bf16.mxu1 %vm5453_vm0, %v5452_v4 }
 0x113   : > { %v873_v50 = vpop.permute.xlu1 %872  ;;  %v871_v51 = vpop.permute.xlu0 %870 }
 0x114   : > { %v874_v52 = vsel %vm821_vm6, %v871_v51, %v873_v50 }
 0x115   : > { %v879_v53 = vsel %vm507_vm3, %v874_v52, 0  ;;  %4936 = vmatmul.mubr.msk.bf16.vlgmr.msra.gmra.mrb[12].mxu0 %vm503_vm4, %v4600_v48 }
 0x116   : > { %4958 = vmatpush3.bf16.msra.mxu1 %v879_v53  ;;  %4940 = vmatpush3.bf16.msra.mxu0 %v722_v49 }
 0x117   : > { %4941 = vmatprep.mubr.msk.bf16.mxu0 %vm5453_vm0, %v5452_v4  ;;  %4951 = vmatprep.subr.bf16.mxu0 %v5452_v4  ;;  %v925_v58 = vpop.permute.xlu1 %924  ;;  %v923_v59 = vpop.permute.xlu0 %922 }
 0x118   : > { %4969 = vmatprep.subr.bf16.mxu1 %v5452_v4  ;;  %v927_v60 = vsel %vm926_vm7, %v923_v59, %v925_v58 }
 0x119   : > { %4960 = vmatmul.mubr.msk.bf16.vlgmr.msra.gmra.mrb[4].mxu1 %vm503_vm4, %v4604_v54  ;;  %v932_v62 = vsel %vm507_vm3, %v927_v60, 0  ;;  %v998_v60 = vld [vmem:[%s6403_s5] sm:$0xf] }
 0x11a   : > { %4971 = vmatprep.mubr.msk.bf16.mxu1 %vm5453_vm0, %v5452_v4  ;;  %4970 = vmatpush3.bf16.msra.mxu1 %v5391_v0 }
 0x11b   : > { %4981 = vmatprep.subr.bf16.mxu1 %v5452_v4 }
 0x11d   : > { %4942 = vmatmul.mubr.msk.bf16.vlgmr.msra.gmra.mrb[16].mxu0 %vm503_vm4, %v4601_v56 }
 0x11e   : > { %4952 = vmatpush3.bf16.msra.mxu0 %v827_v57  ;;  %4953 = vmatprep.mubr.msk.bf16.mxu0 %vm5453_vm0, %v5452_v4 }
 0x11f   : > { %4963 = vmatprep.subr.bf16.mxu0 %v5452_v4 }
 0x121   : > { %4972 = vmatmul.mubr.msk.bf16.vlgmr.msra.gmra.mrb[8].mxu1 %vm1006_vm8, %v999_v1 }
 0x122   : > { %4982 = vmatpush3.bf16.msra.mxu1 %v5391_v0  ;;  %4983 = vmatprep.mubr.msk.bf16.mxu1 %vm5453_vm0, %v5452_v4 }
 0x123   : > { %4993 = vmatprep.subr.bf16.mxu1 %v5452_v4 }
 0x125   : > { %4954 = vmatmul.mubr.msk.bf16.vlgmr.msra.gmra.mrb[20].mxu0 %vm503_vm4, %v4603_v61  ;;  %v4621_v61 = vld [vmem:[%s6403_s5 + $0x4] sm:$0xf] }
 0x126   : > { %4964 = vmatpush3.bf16.msra.mxu0 %v932_v62  ;;  %4965 = vmatprep.mubr.msk.bf16.mxu0 %vm5453_vm0, %v5452_v4 }
 0x127   : > { %4975 = vmatprep.subr.bf16.mxu0 %v5452_v4 }
 0x128   : > { %v978_v45 = vpop.permute.xlu0 %977 }
 0x129   : > { %4984 = vmatmul.mubr.msk.bf16.vlgmr.msra.gmra.mrb[12].mxu1 %vm1006_vm8, %v4622_v2 }
 0x12a   : > { %4995 = vmatprep.mubr.msk.bf16.mxu1 %vm5453_vm0, %v5452_v4 }
 0x12d   : > { %4966 = vmatmul.mubr.msk.bf16.vlgmr.msra.gmra.mrb[24].mxu0 %vm503_vm4, %v4605_v63 }
 0x12e   : > { %4977 = vmatprep.mubr.msk.bf16.mxu0 %vm5453_vm0, %v5452_v4 }
 0x1d0   : > { %v545_v5 = vpop.f32.mrb[0].mxu0 }
 0x1d1   : > { %v4919_v6 = vpop.f32.mrb[1].mxu0 }
 0x1d2   : > { %v548_v7 = vpop.f32.mrb[2].mxu0 }
 0x1d3   : > { %v4920_v8 = vpop.f32.mrb[3].mxu0 }
 0x1d8   : > { %v598_v9 = vpop.f32.mrb[4].mxu0 }
 0x1d9   : > { %v599_v10 = vadd.f32 %v598_v9, %v545_v5  ;;  %v4925_v11 = vpop.f32.mrb[5].mxu0 }
 0x1da   : > { %v601_v12 = vpop.f32.mrb[6].mxu0 }
 0x1db   : > { %v4926_v13 = vpop.f32.mrb[7].mxu0 }
 0x1dc   : > { %v1207_v13 = vpop.permute.xlu1 %1206 }
 0x1e0   : > { %v650_v14 = vpop.f32.mrb[8].mxu0 }
 0x1e1   : > { %v656_v15 = vadd.f32 %v650_v14, %v599_v10  ;;  %v4931_v16 = vpop.f32.mrb[9].mxu0 }
 0x1e2   : > { %v653_v17 = vpop.f32.mrb[10].mxu0 }
 0x1e3   : > { %v4932_v18 = vpop.f32.mrb[11].mxu0 }
 0x1e4   : > { %v810_v19 = vpop.f32.mrb[0].mxu1 }
 0x1e5   : > { %v4949_v20 = vpop.f32.mrb[1].mxu1 }
 0x1e6   : > { %v813_v21 = vpop.f32.mrb[2].mxu1 }
 0x1e7   : > { %v4950_v22 = vpop.f32.mrb[3].mxu1 }
 0x1e8   : > { %v704_v23 = vpop.f32.mrb[12].mxu0 }
 0x1e9   : > { %v710_v24 = vadd.f32 %v704_v23, %v656_v15  ;;  %v4937_v25 = vpop.f32.mrb[13].mxu0 }
 0x1ea   : > { %v707_v26 = vpop.f32.mrb[14].mxu0 }
 0x1eb   : > { %v4938_v27 = vpop.f32.mrb[15].mxu0 }
 0x1ec   : > { %v915_v28 = vpop.f32.mrb[4].mxu1 }
 0x1ed   : > { %v4961_v29 = vpop.f32.mrb[5].mxu1 }
 0x1ee   : > { %v918_v30 = vpop.f32.mrb[6].mxu1 }
 0x1ef   : > { %v4962_v31 = vpop.f32.mrb[7].mxu1  ;;  %v1219_v30 = vld [vmem:[%s6406_s8] sm:$0xf] }
 0x1f0   : > { %v758_v32 = vpop.f32.mrb[16].mxu0  ;;  %v1228_v31 = vld [vmem:[%s6407_s9] sm:$0xff] }
 0x1f1   : > { %v764_v33 = vadd.f32 %v758_v32, %v710_v24  ;;  %v4943_v34 = vpop.f32.mrb[17].mxu0 }
 0x1f2   : > { %v761_v35 = vpop.f32.mrb[18].mxu0 }
 0x1f3   : > { %v816_v36 = vadd.f32 %v810_v19, %v764_v33  ;;  %v4944_v37 = vpop.f32.mrb[19].mxu0 }
 0x1f4   : > { %v1044_v62 = vpop.f32.mrb[8].mxu1 }
 0x1f5   : > { %v4973_v63 = vpop.f32.mrb[9].mxu1 }
 0x1f6   : > { %v1047_v0 = vpop.f32.mrb[10].mxu1 }
 0x1f7   : > { %v4974_v1 = vpop.f32.mrb[11].mxu1 }
 0x1f8   : > { %v863_v38 = vpop.f32.mrb[20].mxu0 }
 0x1f9   : > { %v869_v39 = vadd.f32 %v863_v38, %v816_v36  ;;  %v4955_v40 = vpop.f32.mrb[21].mxu0  ;;  %v1220_v36 = vld [vmem:[%s6406_s8 + $0x4] sm:$0xf] }
 0x1fa   : > { %v866_v41 = vpop.f32.mrb[22].mxu0 }
 0x1fb   : > { %v921_v42 = vadd.f32 %v915_v28, %v869_v39  ;;  %v4956_v43 = vpop.f32.mrb[23].mxu0 }
 0x1fc   : > { %v1153_v2 = vpop.f32.mrb[12].mxu1 }
 0x1fd   : > { %v4985_v3 = vpop.f32.mrb[13].mxu1 }
 0x1fe   : > { %v1156_v5 = vpop.f32.mrb[14].mxu1  ;;  %v1226_v3 = vld [vmem:[%s6406_s8 + $0x1c] sm:$0xf] }
 0x1ff   : > { %v4986_v6 = vpop.f32.mrb[15].mxu1 }
 0x200   : > { %v968_v44 = vpop.f32.mrb[24].mxu0 }
 0x201   : > { %v974_v46 = vadd.f32 %v968_v44, %v921_v42  ;;  %v4967_v47 = vpop.f32.mrb[25].mxu0 }
 0x202   : > { %v971_v48 = vpop.f32.mrb[26].mxu0 }
 0x203   : > { %v980_v49 = vadd.f32 %v978_v45, %v974_v46  ;;  %v4968_v50 = vpop.f32.mrb[27].mxu0  ;;  %v1221_v45 = vld [vmem:[%s6406_s8 + $0x8] sm:$0xf]  ;;  %v1222_v46 = vld [vmem:[%s6406_s8 + $0xc] sm:$0xf] }
 0x205   : > { %v4615_v51 = vmul.f32 -1.442695, %v980_v49 }
 0x207   : > { %5397 = vpow2.f32 %v4615_v51 }
 0x211   : > { %v5398_v52 = vpop.eup %5397 }
 0x212   : > { %v984_v53 = vadd.f32 1.0, %v5398_v52 }
 0x214   : > { %5399 = vrcp.f32 %v984_v53 }
 0x21e   : > { %v5400_v54 = vpop.eup %5399 }
 0x21f   : > { %v987_v56 = vmul.f32 %v5400_v54, %v980_v49 }
 0x221   : > { %v994_v57 = vmul.f32 %v5686_v55, %v987_v56  ;;  %v1223_v56 = vld [vmem:[%s6406_s8 + $0x10] sm:$0xf] }
 0x223   : > { %v995_v58 = vpack.c.bf16 %v994_v57, %v994_v57  ;;  %v1224_v57 = vld [vmem:[%s6406_s8 + $0x14] sm:$0xf] }
 0x225   : > { %v1054_v59 = vsel %vm507_vm3, %v995_v58, 0 }
 0x226   : > { %4976 = vmatpush3.bf16.msra.mxu0 %v1054_v59 }
 0x227   : > { %4987 = vmatprep.subr.bf16.mxu0 %v5452_v4 }
 0x229   : > { %4978 = vmatmul.mubr.msk.bf16.vlgmr.msra.gmra.mrb[28].mxu0 %vm503_vm4, %v998_v60 }
 0x22a   : > { %4988 = vmatpush3.bf16.msra.mxu0 %v1054_v59  ;;  %4989 = vmatprep.mubr.msk.bf16.mxu0 %vm5453_vm0, %v5452_v4 }
 0x22b   : > { %4999 = vmatprep.subr.bf16.mxu0 %v5452_v4 }
 0x231   : > { %4990 = vmatmul.mubr.msk.bf16.vlgmr.msra.gmra.mrb[32].mxu0 %vm503_vm4, %v4621_v61 }
 0x232   : > { %5001 = vmatprep.mubr.msk.bf16.mxu0 %vm5453_vm0, %v5452_v4 }
 0x2fc   : > { %v1090_v7 = vpop.f32.mrb[28].mxu0 }
 0x2fd   : > { %v5704_v8 = vadd.f32 %v1090_v7, %v1044_v62  ;;  %v4979_v9 = vpop.f32.mrb[29].mxu0 }
 0x2fe   : > { %v1093_v10 = vpop.f32.mrb[30].mxu0 }
 0x2ff   : > { %v4980_v11 = vpop.f32.mrb[31].mxu0  ;;  %v1227_v10 = vld [vmem:[%s6406_s8 + $0x20] sm:$0xf] }
 0x304   : > { %v1196_v12 = vpop.f32.mrb[32].mxu0 }
 0x305   : > { %v1197_v14 = vadd.f32 %v1196_v12, %v1153_v2  ;;  %v4991_v15 = vpop.f32.mrb[33].mxu0  ;;  %v1225_v2 = vld [vmem:[%s6406_s8 + $0x18] sm:$0xf] }
 0x306   : > { %v1199_v16 = vpop.f32.mrb[34].mxu0 }
 0x307   : > { %v1209_v17 = vadd.f32 %v1207_v13, %v1197_v14  ;;  %v4992_v18 = vpop.f32.mrb[35].mxu0 }
 0x309   : > { %v4626_v19 = vmul.f32 -1.442695, %v1209_v17 }
 0x30b   : > { %5401 = vpow2.f32 %v4626_v19 }
 0x315   : > { %v5402_v20 = vpop.eup %5401 }
 0x316   : > { %v1213_v21 = vadd.f32 1.0, %v5402_v20 }
 0x318   : > { %5403 = vrcp.f32 %v1213_v21 }
 0x322   : > { %v5404_v22 = vpop.eup %5403 }
 0x323   : > { %v1216_v23 = vmul.f32 %v5404_v22, %v1209_v17 }
 0x325   : > { %v1217_v24 = vmul.f32 %v5686_v55, %v1216_v23 }
 0x327   : > { %v5707_v25 = vpack.c.bf16 %v1217_v24, %v1217_v24 }
 0x329   : > { %1230 = vrot.lane.b32.xlu1 %v5707_v25, %s5451_s27 }
 0x39b   : > { %v1231_v26 = vpop.permute.xlu1 %1230 }
 0x39c   : > { %v1233_v27 = vsel %vm442_vm1, 0, %v1231_v26  ;;  %v1234_v28 = vsel %vm442_vm1, %v1231_v26, 0 }
 0x39d   : > { %1239 = vrot.lane.b32.xlu1 %v1234_v28, %s5459_s18  ;;  %1237 = vrot.lane.b32.xlu0 %v1233_v27, %s5459_s18  ;;  %v1292_v29 = vsel %vm507_vm3, %v1233_v27, 0 }
 0x39e   : > { %5000 = vmatpush3.bf16.msra.mxu0 %v1292_v29 }
 0x39f   : > { %5011 = vmatprep.subr.bf16.mxu0 %v5452_v4 }
 0x3a1   : > { %1336 = vrot.lane.b32.xlu1 %v1234_v28, %s5460_s23  ;;  %1334 = vrot.lane.b32.xlu0 %v1233_v27, %s5460_s23 }
 0x3a2   : > { %5002 = vmatmul.mubr.msk.bf16.vlgmr.msra.gmra.mrb[36].mxu0 %vm503_vm4, %v1219_v30 }
 0x3a3   : > { %5013 = vmatprep.mubr.msk.bf16.mxu0 %vm5453_vm0, %v5452_v4 }
 0x3a5   : > { %1389 = vrot.lane.b32.xlu1 %v1234_v28, %s5461_s24  ;;  %1387 = vrot.lane.b32.xlu0 %v1233_v27, %s5461_s24 }
 0x3a9   : > { %1442 = vrot.lane.b32.xlu1 %v1234_v28, %s5454_s28  ;;  %1440 = vrot.lane.b32.xlu0 %v1233_v27, %s5454_s28 }
 0x3ad   : > { %1494 = vrot.lane.b32.xlu1 %v1234_v28, %s5455_s29  ;;  %1492 = vrot.lane.b32.xlu0 %v1233_v27, %s5455_s29 }
 0x3b1   : > { %1546 = vrot.lane.b32.xlu1 %v1234_v28, %s5462_s26  ;;  %1544 = vrot.lane.b32.xlu0 %v1233_v27, %s5462_s26 }
 0x3b5   : > { %1599 = vrot.lane.b32.xlu1 %v1234_v28, %s5456_s30  ;;  %1597 = vrot.lane.b32.xlu0 %v1233_v27, %s5456_s30 }
 0x3b9   : > { %1651 = vrot.lane.b32.xlu1 %v1234_v28, %s5457_s13  ;;  %1649 = vrot.lane.b32.xlu0 %v1233_v27, %s5457_s13 }
 0x3bd   : > { %1703 = vperm.xlu0 %5385, %v1228_v31  }
 0x40f   : > { %v1240_v32 = vpop.permute.xlu1 %1239  ;;  %v1238_v33 = vpop.permute.xlu0 %1237 }
 0x410   : > { %v1242_v34 = vsel %vm1241_vm9, %v1238_v33, %v1240_v32 }
 0x411   : > { %v1247_v35 = vsel %vm507_vm3, %v1242_v34, 0 }
 0x412   : > { %4994 = vmatpush3.bf16.msra.mxu1 %v1247_v35 }
 0x413   : > { %v1337_v37 = vpop.permute.xlu1 %1336  ;;  %v1335_v38 = vpop.permute.xlu0 %1334  ;;  %5005 = vmatprep.subr.bf16.mxu1 %v5452_v4 }
 0x414   : > { %v1339_v39 = vsel %vm1338_vm10, %v1335_v38, %v1337_v37 }
 0x415   : > { %v1344_v40 = vsel %vm507_vm3, %v1339_v39, 0  ;;  %4996 = vmatmul.mubr.msk.bf16.vlgmr.msra.gmra.mrb[16].mxu1 %vm503_vm4, %v1220_v36 }
 0x416   : > { %5006 = vmatpush3.bf16.msra.mxu1 %v1344_v40  ;;  %5007 = vmatprep.mubr.msk.bf16.mxu1 %vm5453_vm0, %v5452_v4 }
 0x417   : > { %v1390_v41 = vpop.permute.xlu1 %1389  ;;  %v1388_v42 = vpop.permute.xlu0 %1387  ;;  %5017 = vmatprep.subr.bf16.mxu1 %v5452_v4 }
 0x418   : > { %v1392_v43 = vsel %vm1391_vm11, %v1388_v42, %v1390_v41 }
 0x419   : > { %v1397_v44 = vsel %vm507_vm3, %v1392_v43, 0 }
 0x41a   : > { %5012 = vmatpush3.bf16.msra.mxu0 %v1397_v44 }
 0x41b   : > { %v1443_v47 = vpop.permute.xlu1 %1442  ;;  %v1441_v48 = vpop.permute.xlu0 %1440  ;;  %5023 = vmatprep.subr.bf16.mxu0 %v5452_v4 }
 0x41c   : > { %v1444_v49 = vsel %vm501_vm2, %v1441_v48, %v1443_v47 }
 0x41d   : > { %v1449_v50 = vsel %vm507_vm3, %v1444_v49, 0  ;;  %5008 = vmatmul.mubr.msk.bf16.vlgmr.msra.gmra.mrb[20].mxu1 %vm503_vm4, %v1221_v45  ;;  %5014 = vmatmul.mubr.msk.bf16.vlgmr.msra.gmra.mrb[40].mxu0 %vm503_vm4, %v1222_v46 }
 0x41e   : > { %5018 = vmatpush3.bf16.msra.mxu1 %v1449_v50  ;;  %5019 = vmatprep.mubr.msk.bf16.mxu1 %vm5453_vm0, %v5452_v4 }
 0x41f   : > { %v1495_v51 = vpop.permute.xlu1 %1494  ;;  %v1493_v52 = vpop.permute.xlu0 %1492  ;;  %5029 = vmatprep.subr.bf16.mxu1 %v5452_v4  ;;  %5025 = vmatprep.mubr.msk.bf16.mxu0 %vm5453_vm0, %v5452_v4 }
 0x420   : > { %v1496_v53 = vsel %vm608_vm5, %v1493_v52, %v1495_v51 }
 0x421   : > { %v1501_v54 = vsel %vm507_vm3, %v1496_v53, 0 }
 0x422   : > { %5024 = vmatpush3.bf16.msra.mxu0 %v1501_v54 }
 0x423   : > { %v1547_v58 = vpop.permute.xlu1 %1546  ;;  %v1545_v59 = vpop.permute.xlu0 %1544  ;;  %5035 = vmatprep.subr.bf16.mxu0 %v5452_v4 }
 0x424   : > { %v1549_v60 = vsel %vm1548_vm12, %v1545_v59, %v1547_v58 }
 0x425   : > { %v1554_v61 = vsel %vm507_vm3, %v1549_v60, 0  ;;  %5020 = vmatmul.mubr.msk.bf16.vlgmr.msra.gmra.mrb[24].mxu1 %vm503_vm4, %v1223_v56  ;;  %5026 = vmatmul.mubr.msk.bf16.vlgmr.msra.gmra.mrb[44].mxu0 %vm503_vm4, %v1224_v57 }
 0x426   : > { %5030 = vmatpush3.bf16.msra.mxu1 %v1554_v61  ;;  %5031 = vmatprep.mubr.msk.bf16.mxu1 %vm5453_vm0, %v5452_v4 }
 0x427   : > { %v1600_v62 = vpop.permute.xlu1 %1599  ;;  %v1598_v63 = vpop.permute.xlu0 %1597  ;;  %5041 = vmatprep.subr.bf16.mxu1 %v5452_v4  ;;  %5037 = vmatprep.mubr.msk.bf16.mxu0 %vm5453_vm0, %v5452_v4 }
 0x428   : > { %v1601_v0 = vsel %vm821_vm6, %v1598_v63, %v1600_v62 }
 0x429   : > { %v1606_v1 = vsel %vm507_vm3, %v1601_v0, 0 }
 0x42a   : > { %5036 = vmatpush3.bf16.msra.mxu0 %v1606_v1 }
 0x42b   : > { %v1652_v5 = vpop.permute.xlu1 %1651  ;;  %v1650_v6 = vpop.permute.xlu0 %1649  ;;  %5047 = vmatprep.subr.bf16.mxu0 %v5452_v4 }
 0x42c   : > { %v1653_v7 = vsel %vm926_vm7, %v1650_v6, %v1652_v5 }
 0x42d   : > { %v1658_v9 = vsel %vm507_vm3, %v1653_v7, 0  ;;  %5032 = vmatmul.mubr.msk.bf16.vlgmr.msra.gmra.mrb[28].mxu1 %vm503_vm4, %v1225_v2  ;;  %5038 = vmatmul.mubr.msk.bf16.vlgmr.msra.gmra.mrb[48].mxu0 %vm503_vm4, %v1226_v3  ;;  %v4637_v7 = vld [vmem:[%s6406_s8 + $0x24] sm:$0xf] }
 0x42e   : > { %5042 = vmatpush3.bf16.msra.mxu1 %v1658_v9  ;;  %5043 = vmatprep.mubr.msk.bf16.mxu1 %vm5453_vm0, %v5452_v4  ;;  %v4646_v9 = vld [vmem:[%s6407_s9 + $0x8] sm:$0xff] }
 0x42f   : > { %5053 = vmatprep.subr.bf16.mxu1 %v5452_v4  ;;  %5049 = vmatprep.mubr.msk.bf16.mxu0 %vm5453_vm0, %v5452_v4 }
 0x435   : > { %5044 = vmatmul.mubr.msk.bf16.vlgmr.msra.gmra.mrb[32].mxu1 %vm503_vm4, %v1227_v10 }
 0x436   : > { %5055 = vmatprep.mubr.msk.bf16.mxu1 %vm5453_vm0, %v5452_v4 }
 0x43c   : > { %v1704_v54 = vpop.permute.xlu0 %1703 }
 0x475   : > { %v1328_v11 = vpop.f32.mrb[36].mxu0 }
 0x476   : > { %v5003_v12 = vpop.f32.mrb[37].mxu0 }
 0x477   : > { %v1331_v13 = vpop.f32.mrb[38].mxu0 }
 0x478   : > { %v5004_v14 = vpop.f32.mrb[39].mxu0 }
 0x479   : > { %v4638_v14 = vld [vmem:[%s6406_s8 + $0x28] sm:$0xf] }
 0x4e8   : > { %v1283_v15 = vpop.f32.mrb[16].mxu1 }
 0x4e9   : > { %v1329_v16 = vadd.f32 %v1328_v11, %v1283_v15  ;;  %v4997_v17 = vpop.f32.mrb[17].mxu1 }
 0x4ea   : > { %v1286_v18 = vpop.f32.mrb[18].mxu1 }
 0x4eb   : > { %v4998_v19 = vpop.f32.mrb[19].mxu1 }
 0x4f0   : > { %v1380_v20 = vpop.f32.mrb[20].mxu1  ;;  %v1433_v21 = vpop.f32.mrb[40].mxu0 }
 0x4f1   : > { %v1386_v22 = vadd.f32 %v1380_v20, %v1329_v16  ;;  %v5009_v23 = vpop.f32.mrb[21].mxu1  ;;  %v5015_v24 = vpop.f32.mrb[41].mxu0 }
 0x4f2   : > { %v1383_v26 = vpop.f32.mrb[22].mxu1  ;;  %v1436_v27 = vpop.f32.mrb[42].mxu0  ;;  %v4639_v23 = vld [vmem:[%s6406_s8 + $0x2c] sm:$0xf]  ;;  %v4640_v24 = vld [vmem:[%s6406_s8 + $0x30] sm:$0xf] }
 0x4f3   : > { %v1439_v28 = vadd.f32 %v1433_v21, %v1386_v22  ;;  %v5010_v29 = vpop.f32.mrb[23].mxu1  ;;  %v5016_v30 = vpop.f32.mrb[43].mxu0 }
 0x4f8   : > { %v1485_v31 = vpop.f32.mrb[24].mxu1  ;;  %v1537_v32 = vpop.f32.mrb[44].mxu0 }
 0x4f9   : > { %v1491_v33 = vadd.f32 %v1485_v31, %v1439_v28  ;;  %v5021_v34 = vpop.f32.mrb[25].mxu1  ;;  %v5027_v35 = vpop.f32.mrb[45].mxu0 }
 0x4fa   : > { %v1488_v36 = vpop.f32.mrb[26].mxu1  ;;  %v1540_v37 = vpop.f32.mrb[46].mxu0  ;;  %v4641_v34 = vld [vmem:[%s6406_s8 + $0x34] sm:$0xf]  ;;  %v4642_v35 = vld [vmem:[%s6406_s8 + $0x38] sm:$0xf] }
 0x4fb   : > { %v1543_v38 = vadd.f32 %v1537_v32, %v1491_v33  ;;  %v5022_v39 = vpop.f32.mrb[27].mxu1  ;;  %v5028_v40 = vpop.f32.mrb[47].mxu0 }
 0x500   : > { %v1590_v41 = vpop.f32.mrb[28].mxu1  ;;  %v1642_v42 = vpop.f32.mrb[48].mxu0 }
 0x501   : > { %v1596_v43 = vadd.f32 %v1590_v41, %v1543_v38  ;;  %v5033_v44 = vpop.f32.mrb[29].mxu1  ;;  %v5039_v45 = vpop.f32.mrb[49].mxu0 }
 0x502   : > { %v1593_v46 = vpop.f32.mrb[30].mxu1  ;;  %v1645_v47 = vpop.f32.mrb[50].mxu0  ;;  %v4643_v44 = vld [vmem:[%s6406_s8 + $0x3c] sm:$0xf]  ;;  %v4644_v45 = vld [vmem:[%s6406_s8 + $0x40] sm:$0xf] }
 0x503   : > { %v1648_v48 = vadd.f32 %v1642_v42, %v1596_v43  ;;  %v5034_v49 = vpop.f32.mrb[31].mxu1  ;;  %v5040_v50 = vpop.f32.mrb[51].mxu0 }
 0x504   : > { %v4645_v50 = vld [vmem:[%s6406_s8 + $0x44] sm:$0xf] }
 0x508   : > { %v1694_v51 = vpop.f32.mrb[32].mxu1 }
 0x509   : > { %v1700_v52 = vadd.f32 %v1694_v51, %v1648_v48  ;;  %v5045_v53 = vpop.f32.mrb[33].mxu1 }
 0x50a   : > { %v1697_v56 = vpop.f32.mrb[34].mxu1 }
 0x50b   : > { %v1706_v57 = vadd.f32 %v1704_v54, %v1700_v52  ;;  %v5046_v58 = vpop.f32.mrb[35].mxu1 }
 0x50d   : > { %v4636_v59 = vmul.f32 -1.442695, %v1706_v57 }
 0x50f   : > { %5405 = vpow2.f32 %v4636_v59 }
 0x519   : > { %v5406_v60 = vpop.eup %5405 }
 0x51a   : > { %v1710_v61 = vadd.f32 1.0, %v5406_v60 }
 0x51c   : > { %5407 = vrcp.f32 %v1710_v61 }
 0x526   : > { %v5408_v62 = vpop.eup %5407 }
 0x527   : > { %v1713_v63 = vmul.f32 %v5408_v62, %v1706_v57 }
 0x529   : > { %v1714_v0 = vmul.f32 %v5686_v55, %v1713_v63 }
 0x52b   : > { %v1715_v1 = vpack.c.bf16 %v1714_v0, %v1714_v0 }
 0x52d   : > { %1729 = vrot.lane.b32.xlu1 %v1715_v1, %s5451_s27 }
 0x59f   : > { %v1730_v2 = vpop.permute.xlu1 %1729 }
 0x5a0   : > { %v1732_v3 = vsel %vm442_vm1, 0, %v1730_v2  ;;  %v1733_v5 = vsel %vm442_vm1, %v1730_v2, 0 }
 0x5a1   : > { %1738 = vrot.lane.b32.xlu1 %v1733_v5, %s5459_s18  ;;  %1736 = vrot.lane.b32.xlu0 %v1732_v3, %s5459_s18  ;;  %v1790_v6 = vsel %vm507_vm3, %v1732_v3, 0 }
 0x5a2   : > { %5054 = vmatpush3.bf16.msra.mxu1 %v1790_v6 }
 0x5a3   : > { %5065 = vmatprep.subr.bf16.mxu1 %v5452_v4 }
 0x5a5   : > { %1834 = vrot.lane.b32.xlu1 %v1733_v5, %s5460_s23  ;;  %1832 = vrot.lane.b32.xlu0 %v1732_v3, %s5460_s23 }
 0x5a6   : > { %5056 = vmatmul.mubr.msk.bf16.vlgmr.msra.gmra.mrb[36].mxu1 %vm503_vm4, %v4637_v7 }
 0x5a7   : > { %5067 = vmatprep.mubr.msk.bf16.mxu1 %vm5453_vm0, %v5452_v4 }
 0x5a9   : > { %1886 = vrot.lane.b32.xlu1 %v1733_v5, %s5461_s24  ;;  %1884 = vrot.lane.b32.xlu0 %v1732_v3, %s5461_s24 }
 0x5ad   : > { %1938 = vrot.lane.b32.xlu1 %v1733_v5, %s5454_s28  ;;  %1936 = vrot.lane.b32.xlu0 %v1732_v3, %s5454_s28 }
 0x5b1   : > { %1990 = vrot.lane.b32.xlu1 %v1733_v5, %s5455_s29  ;;  %1988 = vrot.lane.b32.xlu0 %v1732_v3, %s5455_s29 }
 0x5b5   : > { %2042 = vrot.lane.b32.xlu1 %v1733_v5, %s5462_s26  ;;  %2040 = vrot.lane.b32.xlu0 %v1732_v3, %s5462_s26 }
 0x5b9   : > { %2094 = vrot.lane.b32.xlu1 %v1733_v5, %s5456_s30  ;;  %2092 = vrot.lane.b32.xlu0 %v1732_v3, %s5456_s30 }
 0x5bd   : > { %2146 = vrot.lane.b32.xlu1 %v1733_v5, %s5457_s13  ;;  %2144 = vrot.lane.b32.xlu0 %v1732_v3, %s5457_s13 }
 0x5c1   : > { %2198 = vperm.xlu0 %5385, %v4646_v9  }
 0x613   : > { %v1739_v10 = vpop.permute.xlu1 %1738  ;;  %v1737_v11 = vpop.permute.xlu0 %1736 }
 0x614   : > { %v1740_v12 = vsel %vm1241_vm9, %v1737_v11, %v1739_v10 }
 0x615   : > { %v1745_v13 = vsel %vm507_vm3, %v1740_v12, 0 }
 0x616   : > { %5048 = vmatpush3.bf16.msra.mxu0 %v1745_v13 }
 0x617   : > { %v1835_v15 = vpop.permute.xlu1 %1834  ;;  %v1833_v16 = vpop.permute.xlu0 %1832  ;;  %5059 = vmatprep.subr.bf16.mxu0 %v5452_v4 }
 0x618   : > { %v1836_v17 = vsel %vm1338_vm10, %v1833_v16, %v1835_v15 }
 0x619   : > { %v1841_v18 = vsel %vm507_vm3, %v1836_v17, 0  ;;  %5050 = vmatmul.mubr.msk.bf16.vlgmr.msra.gmra.mrb[52].mxu0 %vm503_vm4, %v4638_v14 }
 0x61a   : > { %5060 = vmatpush3.bf16.msra.mxu0 %v1841_v18  ;;  %5061 = vmatprep.mubr.msk.bf16.mxu0 %vm5453_vm0, %v5452_v4 }
 0x61b   : > { %v1887_v19 = vpop.permute.xlu1 %1886  ;;  %v1885_v20 = vpop.permute.xlu0 %1884  ;;  %5071 = vmatprep.subr.bf16.mxu0 %v5452_v4 }
 0x61c   : > { %v1888_v21 = vsel %vm1391_vm11, %v1885_v20, %v1887_v19 }
 0x61d   : > { %v1893_v22 = vsel %vm507_vm3, %v1888_v21, 0 }
 0x61e   : > { %5066 = vmatpush3.bf16.msra.mxu1 %v1893_v22 }
 0x61f   : > { %v1939_v26 = vpop.permute.xlu1 %1938  ;;  %v1937_v27 = vpop.permute.xlu0 %1936  ;;  %5077 = vmatprep.subr.bf16.mxu1 %v5452_v4 }
 0x620   : > { %v1940_v28 = vsel %vm501_vm2, %v1937_v27, %v1939_v26 }
 0x621   : > { %v1945_v29 = vsel %vm507_vm3, %v1940_v28, 0  ;;  %5062 = vmatmul.mubr.msk.bf16.vlgmr.msra.gmra.mrb[56].mxu0 %vm503_vm4, %v4639_v23  ;;  %5068 = vmatmul.mubr.msk.bf16.vlgmr.msra.gmra.mrb[40].mxu1 %vm503_vm4, %v4640_v24 }
 0x622   : > { %5072 = vmatpush3.bf16.msra.mxu0 %v1945_v29  ;;  %5073 = vmatprep.mubr.msk.bf16.mxu0 %vm5453_vm0, %v5452_v4 }
 0x623   : > { %v1991_v30 = vpop.permute.xlu1 %1990  ;;  %v1989_v31 = vpop.permute.xlu0 %1988  ;;  %5083 = vmatprep.subr.bf16.mxu0 %v5452_v4  ;;  %5079 = vmatprep.mubr.msk.bf16.mxu1 %vm5453_vm0, %v5452_v4 }
 0x624   : > { %v1992_v32 = vsel %vm608_vm5, %v1989_v31, %v1991_v30 }
 0x625   : > { %v1997_v33 = vsel %vm507_vm3, %v1992_v32, 0 }
 0x626   : > { %5078 = vmatpush3.bf16.msra.mxu1 %v1997_v33 }
 0x627   : > { %v2043_v36 = vpop.permute.xlu1 %2042  ;;  %v2041_v37 = vpop.permute.xlu0 %2040  ;;  %5089 = vmatprep.subr.bf16.mxu1 %v5452_v4 }
 0x628   : > { %v2044_v38 = vsel %vm1548_vm12, %v2041_v37, %v2043_v36 }
 0x629   : > { %v2049_v39 = vsel %vm507_vm3, %v2044_v38, 0  ;;  %5074 = vmatmul.mubr.msk.bf16.vlgmr.msra.gmra.mrb[60].mxu0 %vm503_vm4, %v4641_v34  ;;  %5080 = vmatmul.mubr.msk.bf16.vlgmr.msra.gmra.mrb[44].mxu1 %vm503_vm4, %v4642_v35 }
 0x62a   : > { %5084 = vmatpush3.bf16.msra.mxu0 %v2049_v39  ;;  %5085 = vmatprep.mubr.msk.bf16.mxu0 %vm5453_vm0, %v5452_v4 }
 0x62b   : > { %v2095_v40 = vpop.permute.xlu1 %2094  ;;  %v2093_v41 = vpop.permute.xlu0 %2092  ;;  %5095 = vmatprep.subr.bf16.mxu0 %v5452_v4  ;;  %5091 = vmatprep.mubr.msk.bf16.mxu1 %vm5453_vm0, %v5452_v4 }
 0x62c   : > { %v2096_v42 = vsel %vm821_vm6, %v2093_v41, %v2095_v40 }
 0x62d   : > { %v2101_v43 = vsel %vm507_vm3, %v2096_v42, 0 }
 0x62e   : > { %5090 = vmatpush3.bf16.msra.mxu1 %v2101_v43 }
 0x62f   : > { %v2147_v46 = vpop.permute.xlu1 %2146  ;;  %v2145_v47 = vpop.permute.xlu0 %2144  ;;  %5101 = vmatprep.subr.bf16.mxu1 %v5452_v4 }
 0x630   : > { %v2148_v48 = vsel %vm926_vm7, %v2145_v47, %v2147_v46 }
 0x631   : > { %v2153_v49 = vsel %vm507_vm3, %v2148_v48, 0  ;;  %5086 = vmatmul.mubr.msk.bf16.vlgmr.msra.gmra.mrb[64].mxu0 %vm503_vm4, %v4643_v44  ;;  %5092 = vmatmul.mubr.msk.bf16.vlgmr.msra.gmra.mrb[48].mxu1 %vm503_vm4, %v4644_v45  ;;  %v4666_v48 = vld [vmem:[%s6407_s9 + $0x10] sm:$0xff] }
 0x632   : > { %5096 = vmatpush3.bf16.msra.mxu0 %v2153_v49  ;;  %5097 = vmatprep.mubr.msk.bf16.mxu0 %vm5453_vm0, %v5452_v4 }
 0x633   : > { %5107 = vmatprep.subr.bf16.mxu0 %v5452_v4  ;;  %5103 = vmatprep.mubr.msk.bf16.mxu1 %vm5453_vm0, %v5452_v4 }
 0x639   : > { %5098 = vmatmul.mubr.msk.bf16.vlgmr.msra.gmra.mrb[68].mxu0 %vm503_vm4, %v4645_v50 }
 0x63a   : > { %5109 = vmatprep.mubr.msk.bf16.mxu0 %vm5453_vm0, %v5452_v4 }
 0x640   : > { %v2199_v33 = vpop.permute.xlu0 %2198 }
 0x679   : > { %v1826_v51 = vpop.f32.mrb[36].mxu1 }
 0x67a   : > { %v5057_v52 = vpop.f32.mrb[37].mxu1 }
 0x67b   : > { %v1829_v53 = vpop.f32.mrb[38].mxu1 }
 0x67c   : > { %v5058_v54 = vpop.f32.mrb[39].mxu1  ;;  %v4658_v53 = vld [vmem:[%s6406_s8 + $0x4c] sm:$0xf] }
 0x6ec   : > { %v1781_v56 = vpop.f32.mrb[52].mxu0 }
 0x6ed   : > { %v1827_v57 = vadd.f32 %v1826_v51, %v1781_v56  ;;  %v5051_v58 = vpop.f32.mrb[53].mxu0 }
 0x6ee   : > { %v1784_v59 = vpop.f32.mrb[54].mxu0 }
 0x6ef   : > { %v5052_v60 = vpop.f32.mrb[55].mxu0 }
 0x6f4   : > { %v1877_v61 = vpop.f32.mrb[56].mxu0  ;;  %v1929_v62 = vpop.f32.mrb[40].mxu1 }
 0x6f5   : > { %v1883_v63 = vadd.f32 %v1877_v61, %v1827_v57  ;;  %v5063_v0 = vpop.f32.mrb[57].mxu0  ;;  %v5069_v1 = vpop.f32.mrb[41].mxu1 }
 0x6f6   : > { %v1880_v2 = vpop.f32.mrb[58].mxu0  ;;  %v1932_v3 = vpop.f32.mrb[42].mxu1  ;;  %v4660_v0 = vld [vmem:[%s6406_s8 + $0x54] sm:$0xf] }
 0x6f7   : > { %v1935_v5 = vadd.f32 %v1929_v62, %v1883_v63  ;;  %v5064_v6 = vpop.f32.mrb[59].mxu0  ;;  %v5070_v7 = vpop.f32.mrb[43].mxu1  ;;  %v4659_v63 = vld [vmem:[%s6406_s8 + $0x50] sm:$0xf] }
 0x6fc   : > { %v1981_v9 = vpop.f32.mrb[60].mxu0  ;;  %v2033_v10 = vpop.f32.mrb[44].mxu1 }
 0x6fd   : > { %v1987_v11 = vadd.f32 %v1981_v9, %v1935_v5  ;;  %v5075_v12 = vpop.f32.mrb[61].mxu0  ;;  %v5081_v13 = vpop.f32.mrb[45].mxu1 }
 0x6fe   : > { %v1984_v14 = vpop.f32.mrb[62].mxu0  ;;  %v2036_v15 = vpop.f32.mrb[46].mxu1  ;;  %v4662_v12 = vld [vmem:[%s6406_s8 + $0x5c] sm:$0xf] }
 0x6ff   : > { %v2039_v16 = vadd.f32 %v2033_v10, %v1987_v11  ;;  %v5076_v17 = vpop.f32.mrb[63].mxu0  ;;  %v5082_v18 = vpop.f32.mrb[47].mxu1  ;;  %v4661_v11 = vld [vmem:[%s6406_s8 + $0x58] sm:$0xf] }
 0x704   : > { %v2085_v19 = vpop.f32.mrb[64].mxu0  ;;  %v2137_v20 = vpop.f32.mrb[48].mxu1 }
 0x705   : > { %v2091_v21 = vadd.f32 %v2085_v19, %v2039_v16  ;;  %v5087_v22 = vpop.f32.mrb[65].mxu0  ;;  %v5093_v23 = vpop.f32.mrb[49].mxu1 }
 0x706   : > { %v2088_v24 = vpop.f32.mrb[66].mxu0  ;;  %v2140_v26 = vpop.f32.mrb[50].mxu1  ;;  %v4664_v22 = vld [vmem:[%s6406_s8 + $0x64] sm:$0xf] }
 0x707   : > { %v2143_v27 = vadd.f32 %v2137_v20, %v2091_v21  ;;  %v5088_v28 = vpop.f32.mrb[67].mxu0  ;;  %v5094_v29 = vpop.f32.mrb[51].mxu1  ;;  %v4663_v21 = vld [vmem:[%s6406_s8 + $0x60] sm:$0xf] }
 0x708   : > { %v4665_v28 = vld [vmem:[%s6406_s8 + $0x68] sm:$0xf] }
 0x70c   : > { %v2189_v30 = vpop.f32.mrb[68].mxu0 }
 0x70d   : > { %v2195_v31 = vadd.f32 %v2189_v30, %v2143_v27  ;;  %v5099_v32 = vpop.f32.mrb[69].mxu0 }
 0x70e   : > { %v2192_v34 = vpop.f32.mrb[70].mxu0 }
 0x70f   : > { %v2201_v35 = vadd.f32 %v2199_v33, %v2195_v31  ;;  %v5100_v36 = vpop.f32.mrb[71].mxu0 }
 0x711   : > { %v4656_v37 = vmul.f32 -1.442695, %v2201_v35 }
 0x713   : > { %5409 = vpow2.f32 %v4656_v37 }
 0x71d   : > { %v5410_v38 = vpop.eup %5409 }
 0x71e   : > { %v2205_v39 = vadd.f32 1.0, %v5410_v38 }
 0x720   : > { %5411 = vrcp.f32 %v2205_v39 }
 0x72a   : > { %v5412_v40 = vpop.eup %5411 }
 0x72b   : > { %v2208_v41 = vmul.f32 %v5412_v40, %v2201_v35 }
 0x72d   : > { %v2209_v42 = vmul.f32 %v5686_v55, %v2208_v41  ;;  %v4657_v55 = vld [vmem:[%s6406_s8 + $0x48] sm:$0xf] }
 0x72f   : > { %v5916_v43 = vpack.c.bf16 %v2209_v42, %v2209_v42 }
 0x731   : > { %2224 = vrot.lane.b32.xlu1 %v5916_v43, %s5451_s27 }
 0x7a3   : > { %v2225_v44 = vpop.permute.xlu1 %2224 }
 0x7a4   : > { %v2227_v45 = vsel %vm442_vm1, 0, %v2225_v44  ;;  %v2228_v46 = vsel %vm442_vm1, %v2225_v44, 0 }
 0x7a5   : > { %2233 = vrot.lane.b32.xlu1 %v2228_v46, %s5459_s18  ;;  %2231 = vrot.lane.b32.xlu0 %v2227_v45, %s5459_s18  ;;  %v2285_v47 = vsel %vm507_vm3, %v2227_v45, 0 }
 0x7a6   : > { %5108 = vmatpush3.bf16.msra.mxu0 %v2285_v47 }
 0x7a7   : > { %5119 = vmatprep.subr.bf16.mxu0 %v5452_v4 }
 0x7a9   : > { %2329 = vrot.lane.b32.xlu1 %v2228_v46, %s5460_s23  ;;  %2327 = vrot.lane.b32.xlu0 %v2227_v45, %s5460_s23 }
 0x7aa   : > { %5110 = vmatmul.mubr.msk.bf16.vlgmr.msra.gmra.mrb[72].mxu0 %vm503_vm4, %v4657_v55 }
 0x7ab   : > { %5121 = vmatprep.mubr.msk.bf16.mxu0 %vm5453_vm0, %v5452_v4 }
 0x7ad   : > { %2381 = vrot.lane.b32.xlu1 %v2228_v46, %s5461_s24  ;;  %2379 = vrot.lane.b32.xlu0 %v2227_v45, %s5461_s24 }
 0x7b1   : > { %2433 = vrot.lane.b32.xlu1 %v2228_v46, %s5454_s28  ;;  %2431 = vrot.lane.b32.xlu0 %v2227_v45, %s5454_s28 }
 0x7b5   : > { %2485 = vrot.lane.b32.xlu1 %v2228_v46, %s5455_s29  ;;  %2483 = vrot.lane.b32.xlu0 %v2227_v45, %s5455_s29 }
 0x7b9   : > { %2537 = vrot.lane.b32.xlu1 %v2228_v46, %s5462_s26  ;;  %2535 = vrot.lane.b32.xlu0 %v2227_v45, %s5462_s26 }
 0x7bd   : > { %2589 = vrot.lane.b32.xlu1 %v2228_v46, %s5456_s30  ;;  %2587 = vrot.lane.b32.xlu0 %v2227_v45, %s5456_s30 }
 0x7c1   : > { %2641 = vrot.lane.b32.xlu1 %v2228_v46, %s5457_s13  ;;  %2639 = vrot.lane.b32.xlu0 %v2227_v45, %s5457_s13 }
 0x7c5   : > { %2693 = vperm.xlu0 %5385, %v4666_v48  }
 0x817   : > { %v2234_v49 = vpop.permute.xlu1 %2233  ;;  %v2232_v50 = vpop.permute.xlu0 %2231 }
 0x818   : > { %v2235_v51 = vsel %vm1241_vm9, %v2232_v50, %v2234_v49 }
 0x819   : > { %v2240_v52 = vsel %vm507_vm3, %v2235_v51, 0 }
 0x81a   : > { %5102 = vmatpush3.bf16.msra.mxu1 %v2240_v52 }
 0x81b   : > { %v2330_v54 = vpop.permute.xlu1 %2329  ;;  %v2328_v56 = vpop.permute.xlu0 %2327  ;;  %5113 = vmatprep.subr.bf16.mxu1 %v5452_v4 }
 0x81c   : > { %v2331_v57 = vsel %vm1338_vm10, %v2328_v56, %v2330_v54 }
 0x81d   : > { %v2336_v58 = vsel %vm507_vm3, %v2331_v57, 0  ;;  %5104 = vmatmul.mubr.msk.bf16.vlgmr.msra.gmra.mrb[52].mxu1 %vm503_vm4, %v4658_v53 }
 0x81e   : > { %5114 = vmatpush3.bf16.msra.mxu1 %v2336_v58  ;;  %5115 = vmatprep.mubr.msk.bf16.mxu1 %vm5453_vm0, %v5452_v4 }
 0x81f   : > { %v2382_v59 = vpop.permute.xlu1 %2381  ;;  %v2380_v60 = vpop.permute.xlu0 %2379  ;;  %5125 = vmatprep.subr.bf16.mxu1 %v5452_v4 }
 0x820   : > { %v2383_v61 = vsel %vm1391_vm11, %v2380_v60, %v2382_v59 }
 0x821   : > { %v2388_v62 = vsel %vm507_vm3, %v2383_v61, 0 }
 0x822   : > { %5120 = vmatpush3.bf16.msra.mxu0 %v2388_v62 }
 0x823   : > { %v2434_v1 = vpop.permute.xlu1 %2433  ;;  %v2432_v2 = vpop.permute.xlu0 %2431  ;;  %5131 = vmatprep.subr.bf16.mxu0 %v5452_v4 }
 0x824   : > { %v2435_v3 = vsel %vm501_vm2, %v2432_v2, %v2434_v1 }
 0x825   : > { %v2440_v5 = vsel %vm507_vm3, %v2435_v3, 0  ;;  %5116 = vmatmul.mubr.msk.bf16.vlgmr.msra.gmra.mrb[56].mxu1 %vm503_vm4, %v4659_v63  ;;  %5122 = vmatmul.mubr.msk.bf16.vlgmr.msra.gmra.mrb[76].mxu0 %vm503_vm4, %v4660_v0 }
 0x826   : > { %5126 = vmatpush3.bf16.msra.mxu1 %v2440_v5  ;;  %5127 = vmatprep.mubr.msk.bf16.mxu1 %vm5453_vm0, %v5452_v4 }
 0x827   : > { %v2486_v6 = vpop.permute.xlu1 %2485  ;;  %v2484_v7 = vpop.permute.xlu0 %2483  ;;  %5137 = vmatprep.subr.bf16.mxu1 %v5452_v4  ;;  %5133 = vmatprep.mubr.msk.bf16.mxu0 %vm5453_vm0, %v5452_v4 }
 0x828   : > { %v2487_v9 = vsel %vm608_vm5, %v2484_v7, %v2486_v6 }
 0x829   : > { %v2492_v10 = vsel %vm507_vm3, %v2487_v9, 0 }
 0x82a   : > { %5132 = vmatpush3.bf16.msra.mxu0 %v2492_v10 }
 0x82b   : > { %v2538_v13 = vpop.permute.xlu1 %2537  ;;  %v2536_v14 = vpop.permute.xlu0 %2535  ;;  %5143 = vmatprep.subr.bf16.mxu0 %v5452_v4 }
 0x82c   : > { %v2539_v15 = vsel %vm1548_vm12, %v2536_v14, %v2538_v13 }
 0x82d   : > { %v2544_v16 = vsel %vm507_vm3, %v2539_v15, 0  ;;  %5128 = vmatmul.mubr.msk.bf16.vlgmr.msra.gmra.mrb[60].mxu1 %vm503_vm4, %v4661_v11  ;;  %5134 = vmatmul.mubr.msk.bf16.vlgmr.msra.gmra.mrb[80].mxu0 %vm503_vm4, %v4662_v12 }
 0x82e   : > { %5138 = vmatpush3.bf16.msra.mxu1 %v2544_v16  ;;  %5139 = vmatprep.mubr.msk.bf16.mxu1 %vm5453_vm0, %v5452_v4 }
 0x82f   : > { %v2590_v17 = vpop.permute.xlu1 %2589  ;;  %v2588_v18 = vpop.permute.xlu0 %2587  ;;  %5149 = vmatprep.subr.bf16.mxu1 %v5452_v4  ;;  %5145 = vmatprep.mubr.msk.bf16.mxu0 %vm5453_vm0, %v5452_v4 }
 0x830   : > { %v2591_v19 = vsel %vm821_vm6, %v2588_v18, %v2590_v17 }
 0x831   : > { %v2596_v20 = vsel %vm507_vm3, %v2591_v19, 0  ;;  %v6024_v19 = vld [vmem:[%s6400_s2] ss:$0 sm:$0xff] }
 0x832   : > { %5144 = vmatpush3.bf16.msra.mxu0 %v2596_v20 }
 0x833   : > { %v2642_v23 = vpop.permute.xlu1 %2641  ;;  %v2640_v24 = vpop.permute.xlu0 %2639  ;;  %5155 = vmatprep.subr.bf16.mxu0 %v5452_v4 }
 0x834   : > { %v2643_v26 = vsel %vm926_vm7, %v2640_v24, %v2642_v23 }
 0x835   : > { %v2648_v27 = vsel %vm507_vm3, %v2643_v26, 0  ;;  %5140 = vmatmul.mubr.msk.bf16.vlgmr.msra.gmra.mrb[64].mxu1 %vm503_vm4, %v4663_v21  ;;  %5146 = vmatmul.mubr.msk.bf16.vlgmr.msra.gmra.mrb[84].mxu0 %vm503_vm4, %v4664_v22 }
 0x836   : > { %5150 = vmatpush3.bf16.msra.mxu1 %v2648_v27  ;;  %5151 = vmatprep.mubr.msk.bf16.mxu1 %vm5453_vm0, %v5452_v4  ;;  %v4677_v27 = vld [vmem:[%s6406_s8 + $0x6c] sm:$0xf] }
 0x837   : > { %5161 = vmatprep.subr.bf16.mxu1 %v5452_v4  ;;  %5157 = vmatprep.mubr.msk.bf16.mxu0 %vm5453_vm0, %v5452_v4 }
 0x83d   : > { %5152 = vmatmul.mubr.msk.bf16.vlgmr.msra.gmra.mrb[68].mxu1 %vm503_vm4, %v4665_v28  ;;  %v4686_v28 = vld [vmem:[%s6407_s9 + $0x18] sm:$0xff] }
 0x83e   : > { %5163 = vmatprep.mubr.msk.bf16.mxu1 %vm5453_vm0, %v5452_v4 }
 0x844   : > { %v2694_v10 = vpop.permute.xlu0 %2693 }
 0x87d   : > { %v2321_v29 = vpop.f32.mrb[72].mxu0 }
 0x87e   : > { %v5111_v30 = vpop.f32.mrb[73].mxu0 }
 0x87f   : > { %v2324_v31 = vpop.f32.mrb[74].mxu0 }
 0x880   : > { %v5112_v32 = vpop.f32.mrb[75].mxu0 }
 0x8f0   : > { %v2276_v33 = vpop.f32.mrb[52].mxu1 }
 0x8f1   : > { %v2322_v34 = vadd.f32 %v2321_v29, %v2276_v33  ;;  %v5105_v35 = vpop.f32.mrb[53].mxu1  ;;  %v4678_v33 = vld [vmem:[%s6406_s8 + $0x70] sm:$0xf] }
 0x8f2   : > { %v2279_v36 = vpop.f32.mrb[54].mxu1 }
 0x8f3   : > { %v5106_v37 = vpop.f32.mrb[55].mxu1 }
 0x8f8   : > { %v2372_v38 = vpop.f32.mrb[56].mxu1  ;;  %v2424_v39 = vpop.f32.mrb[76].mxu0 }
 0x8f9   : > { %v2378_v40 = vadd.f32 %v2372_v38, %v2322_v34  ;;  %v5117_v41 = vpop.f32.mrb[57].mxu1  ;;  %v5123_v42 = vpop.f32.mrb[77].mxu0 }
 0x8fa   : > { %v2375_v44 = vpop.f32.mrb[58].mxu1  ;;  %v2427_v45 = vpop.f32.mrb[78].mxu0  ;;  %v4679_v42 = vld [vmem:[%s6406_s8 + $0x74] sm:$0xf] }
 0x8fb   : > { %v2430_v46 = vadd.f32 %v2424_v39, %v2378_v40  ;;  %v5118_v47 = vpop.f32.mrb[59].mxu1  ;;  %v5124_v55 = vpop.f32.mrb[79].mxu0  ;;  %v4680_v44 = vld [vmem:[%s6406_s8 + $0x78] sm:$0xf] }
 0x900   : > { %v2476_v48 = vpop.f32.mrb[60].mxu1  ;;  %v2528_v49 = vpop.f32.mrb[80].mxu0 }
 0x901   : > { %v2482_v50 = vadd.f32 %v2476_v48, %v2430_v46  ;;  %v5129_v51 = vpop.f32.mrb[61].mxu1  ;;  %v5135_v52 = vpop.f32.mrb[81].mxu0 }
 0x902   : > { %v2479_v53 = vpop.f32.mrb[62].mxu1  ;;  %v2531_v54 = vpop.f32.mrb[82].mxu0  ;;  %v4681_v52 = vld [vmem:[%s6406_s8 + $0x7c] sm:$0xf] }
 0x903   : > { %v2534_v56 = vadd.f32 %v2528_v49, %v2482_v50  ;;  %v5130_v57 = vpop.f32.mrb[63].mxu1  ;;  %v5136_v58 = vpop.f32.mrb[83].mxu0  ;;  %v4682_v53 = vld [vmem:[%s6406_s8 + $0x80] sm:$0xf] }
 0x908   : > { %v2580_v59 = vpop.f32.mrb[64].mxu1  ;;  %v2632_v60 = vpop.f32.mrb[84].mxu0 }
 0x909   : > { %v2586_v61 = vadd.f32 %v2580_v59, %v2534_v56  ;;  %v5141_v62 = vpop.f32.mrb[65].mxu1  ;;  %v5147_v63 = vpop.f32.mrb[85].mxu0 }
 0x90a   : > { %v2583_v0 = vpop.f32.mrb[66].mxu1  ;;  %v2635_v1 = vpop.f32.mrb[86].mxu0  ;;  %v4683_v63 = vld [vmem:[%s6406_s8 + $0x84] sm:$0xf] }
 0x90b   : > { %v2638_v2 = vadd.f32 %v2632_v60, %v2586_v61  ;;  %v5142_v3 = vpop.f32.mrb[67].mxu1  ;;  %v5148_v5 = vpop.f32.mrb[87].mxu0  ;;  %v4684_v0 = vld [vmem:[%s6406_s8 + $0x88] sm:$0xf] }
 0x910   : > { %v2684_v6 = vpop.f32.mrb[68].mxu1 }
 0x911   : > { %v2690_v7 = vadd.f32 %v2684_v6, %v2638_v2  ;;  %v5153_v9 = vpop.f32.mrb[69].mxu1  ;;  %v4685_v6 = vld [vmem:[%s6406_s8 + $0x8c] sm:$0xf] }
 0x912   : > { %v2687_v11 = vpop.f32.mrb[70].mxu1 }
 0x913   : > { %v2696_v12 = vadd.f32 %v2694_v10, %v2690_v7  ;;  %v5154_v13 = vpop.f32.mrb[71].mxu1 }
 0x915   : > { %v4676_v14 = vmul.f32 -1.442695, %v2696_v12 }
 0x917   : > { %5413 = vpow2.f32 %v4676_v14 }
 0x921   : > { %v5414_v15 = vpop.eup %5413 }
 0x922   : > { %v2700_v16 = vadd.f32 1.0, %v5414_v15 }
 0x924   : > { %5415 = vrcp.f32 %v2700_v16 }
 0x92e   : > { %v5416_v17 = vpop.eup %5415 }
 0x92f   : > { %v2703_v18 = vmul.f32 %v5416_v17, %v2696_v12 }
 0x931   : > { %v2704_v20 = vmul.f32 %v6024_v19, %v2703_v18 }
 0x933   : > { %v2705_v21 = vpack.c.bf16 %v2704_v20, %v2704_v20 }
 0x935   : > { %2719 = vrot.lane.b32.xlu1 %v2705_v21, %s5451_s27 }
 0x9a7   : > { %v2720_v22 = vpop.permute.xlu1 %2719 }
 0x9a8   : > { %v2722_v23 = vsel %vm442_vm1, 0, %v2720_v22  ;;  %v2723_v24 = vsel %vm442_vm1, %v2720_v22, 0 }
 0x9a9   : > { %2728 = vrot.lane.b32.xlu1 %v2723_v24, %s5459_s18  ;;  %2726 = vrot.lane.b32.xlu0 %v2722_v23, %s5459_s18  ;;  %v2780_v26 = vsel %vm507_vm3, %v2722_v23, 0 }
 0x9aa   : > { %5162 = vmatpush3.bf16.msra.mxu1 %v2780_v26 }
 0x9ab   : > { %5173 = vmatprep.subr.bf16.mxu1 %v5452_v4 }
 0x9ad   : > { %2824 = vrot.lane.b32.xlu1 %v2723_v24, %s5460_s23  ;;  %2822 = vrot.lane.b32.xlu0 %v2722_v23, %s5460_s23 }
 0x9ae   : > { %5164 = vmatmul.mubr.msk.bf16.vlgmr.msra.gmra.mrb[72].mxu1 %vm503_vm4, %v4677_v27 }
 0x9af   : > { %5175 = vmatprep.mubr.msk.bf16.mxu1 %vm5453_vm0, %v5452_v4 }
 0x9b1   : > { %2876 = vrot.lane.b32.xlu1 %v2723_v24, %s5461_s24  ;;  %2874 = vrot.lane.b32.xlu0 %v2722_v23, %s5461_s24 }
 0x9b5   : > { %2928 = vrot.lane.b32.xlu1 %v2723_v24, %s5454_s28  ;;  %2926 = vrot.lane.b32.xlu0 %v2722_v23, %s5454_s28 }
 0x9b9   : > { %2980 = vrot.lane.b32.xlu1 %v2723_v24, %s5455_s29  ;;  %2978 = vrot.lane.b32.xlu0 %v2722_v23, %s5455_s29 }
 0x9bd   : > { %3032 = vrot.lane.b32.xlu1 %v2723_v24, %s5462_s26  ;;  %3030 = vrot.lane.b32.xlu0 %v2722_v23, %s5462_s26 }
 0x9c1   : > { %3084 = vrot.lane.b32.xlu1 %v2723_v24, %s5456_s30  ;;  %3082 = vrot.lane.b32.xlu0 %v2722_v23, %s5456_s30 }
 0x9c5   : > { %3136 = vrot.lane.b32.xlu1 %v2723_v24, %s5457_s13  ;;  %3134 = vrot.lane.b32.xlu0 %v2722_v23, %s5457_s13 }
 0x9c9   : > { %3188 = vperm.xlu0 %5385, %v4686_v28  }
 0xa1b   : > { %v2729_v29 = vpop.permute.xlu1 %2728  ;;  %v2727_v30 = vpop.permute.xlu0 %2726 }
 0xa1c   : > { %v2730_v31 = vsel %vm1241_vm9, %v2727_v30, %v2729_v29 }
 0xa1d   : > { %v2735_v32 = vsel %vm507_vm3, %v2730_v31, 0 }
 0xa1e   : > { %5156 = vmatpush3.bf16.msra.mxu0 %v2735_v32 }
 0xa1f   : > { %v2825_v34 = vpop.permute.xlu1 %2824  ;;  %v2823_v35 = vpop.permute.xlu0 %2822  ;;  %5167 = vmatprep.subr.bf16.mxu0 %v5452_v4 }
 0xa20   : > { %v2826_v36 = vsel %vm1338_vm10, %v2823_v35, %v2825_v34 }
 0xa21   : > { %v2831_v37 = vsel %vm507_vm3, %v2826_v36, 0  ;;  %5158 = vmatmul.mubr.msk.bf16.vlgmr.msra.gmra.mrb[88].mxu0 %vm503_vm4, %v4678_v33 }
 0xa22   : > { %5168 = vmatpush3.bf16.msra.mxu0 %v2831_v37  ;;  %5169 = vmatprep.mubr.msk.bf16.mxu0 %vm5453_vm0, %v5452_v4 }
 0xa23   : > { %v2877_v38 = vpop.permute.xlu1 %2876  ;;  %v2875_v39 = vpop.permute.xlu0 %2874  ;;  %5179 = vmatprep.subr.bf16.mxu0 %v5452_v4 }
 0xa24   : > { %v2878_v40 = vsel %vm1391_vm11, %v2875_v39, %v2877_v38 }
 0xa25   : > { %v2883_v41 = vsel %vm507_vm3, %v2878_v40, 0 }
 0xa26   : > { %5174 = vmatpush3.bf16.msra.mxu1 %v2883_v41 }
 0xa27   : > { %v2929_v45 = vpop.permute.xlu1 %2928  ;;  %v2927_v46 = vpop.permute.xlu0 %2926  ;;  %5185 = vmatprep.subr.bf16.mxu1 %v5452_v4 }
 0xa28   : > { %v2930_v47 = vsel %vm501_vm2, %v2927_v46, %v2929_v45 }
 0xa29   : > { %v2935_v55 = vsel %vm507_vm3, %v2930_v47, 0  ;;  %5170 = vmatmul.mubr.msk.bf16.vlgmr.msra.gmra.mrb[92].mxu0 %vm503_vm4, %v4679_v42  ;;  %5176 = vmatmul.mubr.msk.bf16.vlgmr.msra.gmra.mrb[76].mxu1 %vm503_vm4, %v4680_v44 }
 0xa2a   : > { %5180 = vmatpush3.bf16.msra.mxu0 %v2935_v55  ;;  %5181 = vmatprep.mubr.msk.bf16.mxu0 %vm5453_vm0, %v5452_v4 }
 0xa2b   : > { %v2981_v48 = vpop.permute.xlu1 %2980  ;;  %v2979_v49 = vpop.permute.xlu0 %2978  ;;  %5191 = vmatprep.subr.bf16.mxu0 %v5452_v4  ;;  %5187 = vmatprep.mubr.msk.bf16.mxu1 %vm5453_vm0, %v5452_v4 }
 0xa2c   : > { %v2982_v50 = vsel %vm608_vm5, %v2979_v49, %v2981_v48 }
 0xa2d   : > { %v2987_v51 = vsel %vm507_vm3, %v2982_v50, 0 }
 0xa2e   : > { %5186 = vmatpush3.bf16.msra.mxu1 %v2987_v51 }
 0xa2f   : > { %v3033_v54 = vpop.permute.xlu1 %3032  ;;  %v3031_v56 = vpop.permute.xlu0 %3030  ;;  %5197 = vmatprep.subr.bf16.mxu1 %v5452_v4 }
 0xa30   : > { %v3034_v57 = vsel %vm1548_vm12, %v3031_v56, %v3033_v54 }
 0xa31   : > { %v3039_v58 = vsel %vm507_vm3, %v3034_v57, 0  ;;  %5182 = vmatmul.mubr.msk.bf16.vlgmr.msra.gmra.mrb[96].mxu0 %vm503_vm4, %v4681_v52  ;;  %5188 = vmatmul.mubr.msk.bf16.vlgmr.msra.gmra.mrb[80].mxu1 %vm503_vm4, %v4682_v53 }
 0xa32   : > { %5192 = vmatpush3.bf16.msra.mxu0 %v3039_v58  ;;  %5193 = vmatprep.mubr.msk.bf16.mxu0 %vm5453_vm0, %v5452_v4 }
 0xa33   : > { %v3085_v59 = vpop.permute.xlu1 %3084  ;;  %v3083_v60 = vpop.permute.xlu0 %3082  ;;  %5203 = vmatprep.subr.bf16.mxu0 %v5452_v4  ;;  %5199 = vmatprep.mubr.msk.bf16.mxu1 %vm5453_vm0, %v5452_v4 }
 0xa34   : > { %v3086_v61 = vsel %vm821_vm6, %v3083_v60, %v3085_v59 }
 0xa35   : > { %v3091_v62 = vsel %vm507_vm3, %v3086_v61, 0 }
 0xa36   : > { %5198 = vmatpush3.bf16.msra.mxu1 %v3091_v62 }
 0xa37   : > { %v3137_v1 = vpop.permute.xlu1 %3136  ;;  %v3135_v2 = vpop.permute.xlu0 %3134  ;;  %5209 = vmatprep.subr.bf16.mxu1 %v5452_v4 }
 0xa38   : > { %v3138_v3 = vsel %vm926_vm7, %v3135_v2, %v3137_v1 }
 0xa39   : > { %v3143_v5 = vsel %vm507_vm3, %v3138_v3, 0  ;;  %5194 = vmatmul.mubr.msk.bf16.vlgmr.msra.gmra.mrb[100].mxu0 %vm503_vm4, %v4683_v63  ;;  %5200 = vmatmul.mubr.msk.bf16.vlgmr.msra.gmra.mrb[84].mxu1 %vm503_vm4, %v4684_v0 }
 0xa3a   : > { %5204 = vmatpush3.bf16.msra.mxu0 %v3143_v5  ;;  %5205 = vmatprep.mubr.msk.bf16.mxu0 %vm5453_vm0, %v5452_v4  ;;  %v4697_v5 = vld [vmem:[%s6406_s8 + $0x90] sm:$0xf] }
 0xa3b   : > { %5215 = vmatprep.subr.bf16.mxu0 %v5452_v4  ;;  %5211 = vmatprep.mubr.msk.bf16.mxu1 %vm5453_vm0, %v5452_v4 }
 0xa41   : > { %5206 = vmatmul.mubr.msk.bf16.vlgmr.msra.gmra.mrb[104].mxu0 %vm503_vm4, %v4685_v6  ;;  %v4706_v6 = vld [vmem:[%s6407_s9 + $0x20] sm:$0xff] }
 0xa42   : > { %5217 = vmatprep.mubr.msk.bf16.mxu0 %vm5453_vm0, %v5452_v4 }
 0xa48   : > { %v3189_v52 = vpop.permute.xlu0 %3188 }
 0xa81   : > { %v2816_v7 = vpop.f32.mrb[72].mxu1 }
 0xa82   : > { %v5165_v9 = vpop.f32.mrb[73].mxu1 }
 0xa83   : > { %v2819_v10 = vpop.f32.mrb[74].mxu1 }
 0xa84   : > { %v5166_v11 = vpop.f32.mrb[75].mxu1 }
 0xaf4   : > { %v2771_v12 = vpop.f32.mrb[88].mxu0 }
 0xaf5   : > { %v2817_v13 = vadd.f32 %v2816_v7, %v2771_v12  ;;  %v5159_v14 = vpop.f32.mrb[89].mxu0  ;;  %v4698_v12 = vld [vmem:[%s6406_s8 + $0x94] sm:$0xf] }
 0xaf6   : > { %v2774_v15 = vpop.f32.mrb[90].mxu0 }
 0xaf7   : > { %v5160_v16 = vpop.f32.mrb[91].mxu0 }
 0xafc   : > { %v2867_v17 = vpop.f32.mrb[92].mxu0  ;;  %v2919_v18 = vpop.f32.mrb[76].mxu1 }
 0xafd   : > { %v2873_v20 = vadd.f32 %v2867_v17, %v2817_v13  ;;  %v5171_v21 = vpop.f32.mrb[93].mxu0  ;;  %v5177_v22 = vpop.f32.mrb[77].mxu1 }
 0xafe   : > { %v2870_v23 = vpop.f32.mrb[94].mxu0  ;;  %v2922_v24 = vpop.f32.mrb[78].mxu1  ;;  %v4699_v22 = vld [vmem:[%s6406_s8 + $0x98] sm:$0xf] }
 0xaff   : > { %v2925_v26 = vadd.f32 %v2919_v18, %v2873_v20  ;;  %v5172_v27 = vpop.f32.mrb[95].mxu0  ;;  %v5178_v28 = vpop.f32.mrb[79].mxu1  ;;  %v4700_v23 = vld [vmem:[%s6406_s8 + $0x9c] sm:$0xf] }
 0xb04   : > { %v2971_v29 = vpop.f32.mrb[96].mxu0  ;;  %v3023_v30 = vpop.f32.mrb[80].mxu1 }
 0xb05   : > { %v2977_v31 = vadd.f32 %v2971_v29, %v2925_v26  ;;  %v5183_v32 = vpop.f32.mrb[97].mxu0  ;;  %v5189_v33 = vpop.f32.mrb[81].mxu1 }
 0xb06   : > { %v2974_v34 = vpop.f32.mrb[98].mxu0  ;;  %v3026_v35 = vpop.f32.mrb[82].mxu1  ;;  %v4701_v33 = vld [vmem:[%s6406_s8 + $0xa0] sm:$0xf] }
 0xb07   : > { %v3029_v36 = vadd.f32 %v3023_v30, %v2977_v31  ;;  %v5184_v37 = vpop.f32.mrb[99].mxu0  ;;  %v5190_v38 = vpop.f32.mrb[83].mxu1  ;;  %v4702_v34 = vld [vmem:[%s6406_s8 + $0xa4] sm:$0xf] }
 0xb0c   : > { %v3075_v39 = vpop.f32.mrb[100].mxu0  ;;  %v3127_v40 = vpop.f32.mrb[84].mxu1 }
 0xb0d   : > { %v3081_v41 = vadd.f32 %v3075_v39, %v3029_v36  ;;  %v5195_v42 = vpop.f32.mrb[101].mxu0  ;;  %v5201_v44 = vpop.f32.mrb[85].mxu1 }
 0xb0e   : > { %v3078_v45 = vpop.f32.mrb[102].mxu0  ;;  %v3130_v46 = vpop.f32.mrb[86].mxu1  ;;  %v4703_v44 = vld [vmem:[%s6406_s8 + $0xa8] sm:$0xf] }
 0xb0f   : > { %v3133_v47 = vadd.f32 %v3127_v40, %v3081_v41  ;;  %v5196_v55 = vpop.f32.mrb[103].mxu0  ;;  %v5202_v48 = vpop.f32.mrb[87].mxu1  ;;  %v4704_v45 = vld [vmem:[%s6406_s8 + $0xac] sm:$0xf] }
 0xb14   : > { %v3179_v49 = vpop.f32.mrb[104].mxu0 }
 0xb15   : > { %v3185_v50 = vadd.f32 %v3179_v49, %v3133_v47  ;;  %v5207_v51 = vpop.f32.mrb[105].mxu0  ;;  %v4705_v49 = vld [vmem:[%s6406_s8 + $0xb0] sm:$0xf] }
 0xb16   : > { %v3182_v53 = vpop.f32.mrb[106].mxu0 }
 0xb17   : > { %v3191_v54 = vadd.f32 %v3189_v52, %v3185_v50  ;;  %v5208_v56 = vpop.f32.mrb[107].mxu0 }
 0xb19   : > { %v4696_v57 = vmul.f32 -1.442695, %v3191_v54 }
 0xb1b   : > { %5417 = vpow2.f32 %v4696_v57 }
 0xb25   : > { %v5418_v58 = vpop.eup %5417 }
 0xb26   : > { %v3195_v59 = vadd.f32 1.0, %v5418_v58 }
 0xb28   : > { %5419 = vrcp.f32 %v3195_v59 }
 0xb32   : > { %v5420_v60 = vpop.eup %5419 }
 0xb33   : > { %v3198_v61 = vmul.f32 %v5420_v60, %v3191_v54 }
 0xb35   : > { %v3199_v62 = vmul.f32 %v6024_v19, %v3198_v61 }
 0xb37   : > { %v6130_v63 = vpack.c.bf16 %v3199_v62, %v3199_v62 }
 0xb39   : > { %3214 = vrot.lane.b32.xlu1 %v6130_v63, %s5451_s27 }
 0xbab   : > { %v3215_v0 = vpop.permute.xlu1 %3214 }
 0xbac   : > { %v3217_v1 = vsel %vm442_vm1, 0, %v3215_v0  ;;  %v3218_v2 = vsel %vm442_vm1, %v3215_v0, 0 }
 0xbad   : > { %3223 = vrot.lane.b32.xlu1 %v3218_v2, %s5459_s18  ;;  %3221 = vrot.lane.b32.xlu0 %v3217_v1, %s5459_s18  ;;  %v3275_v3 = vsel %vm507_vm3, %v3217_v1, 0 }
 0xbae   : > { %5216 = vmatpush3.bf16.msra.mxu0 %v3275_v3 }
 0xbaf   : > { %5227 = vmatprep.subr.bf16.mxu0 %v5452_v4 }
 0xbb1   : > { %3319 = vrot.lane.b32.xlu1 %v3218_v2, %s5460_s23  ;;  %3317 = vrot.lane.b32.xlu0 %v3217_v1, %s5460_s23 }
 0xbb2   : > { %5218 = vmatmul.mubr.msk.bf16.vlgmr.msra.gmra.mrb[108].mxu0 %vm503_vm4, %v4697_v5 }
 0xbb3   : > { %5229 = vmatprep.mubr.msk.bf16.mxu0 %vm5453_vm0, %v5452_v4 }
 0xbb5   : > { %3371 = vrot.lane.b32.xlu1 %v3218_v2, %s5461_s24  ;;  %3369 = vrot.lane.b32.xlu0 %v3217_v1, %s5461_s24 }
 0xbb9   : > { %3423 = vrot.lane.b32.xlu1 %v3218_v2, %s5454_s28  ;;  %3421 = vrot.lane.b32.xlu0 %v3217_v1, %s5454_s28 }
 0xbbd   : > { %3475 = vrot.lane.b32.xlu1 %v3218_v2, %s5455_s29  ;;  %3473 = vrot.lane.b32.xlu0 %v3217_v1, %s5455_s29 }
 0xbc1   : > { %3527 = vrot.lane.b32.xlu1 %v3218_v2, %s5462_s26  ;;  %3525 = vrot.lane.b32.xlu0 %v3217_v1, %s5462_s26 }
 0xbc5   : > { %3579 = vrot.lane.b32.xlu1 %v3218_v2, %s5456_s30  ;;  %3577 = vrot.lane.b32.xlu0 %v3217_v1, %s5456_s30 }
 0xbc9   : > { %3631 = vrot.lane.b32.xlu1 %v3218_v2, %s5457_s13  ;;  %3629 = vrot.lane.b32.xlu0 %v3217_v1, %s5457_s13 }
 0xbcd   : > { %3683 = vperm.xlu0 %5385, %v4706_v6  }
 0xc1f   : > { %v3224_v7 = vpop.permute.xlu1 %3223  ;;  %v3222_v9 = vpop.permute.xlu0 %3221 }
 0xc20   : > { %v3225_v10 = vsel %vm1241_vm9, %v3222_v9, %v3224_v7 }
 0xc21   : > { %v3230_v11 = vsel %vm507_vm3, %v3225_v10, 0 }
 0xc22   : > { %5210 = vmatpush3.bf16.msra.mxu1 %v3230_v11 }
 0xc23   : > { %v3320_v13 = vpop.permute.xlu1 %3319  ;;  %v3318_v14 = vpop.permute.xlu0 %3317  ;;  %5221 = vmatprep.subr.bf16.mxu1 %v5452_v4 }
 0xc24   : > { %v3321_v15 = vsel %vm1338_vm10, %v3318_v14, %v3320_v13 }
 0xc25   : > { %v3326_v16 = vsel %vm507_vm3, %v3321_v15, 0  ;;  %5212 = vmatmul.mubr.msk.bf16.vlgmr.msra.gmra.mrb[88].mxu1 %vm503_vm4, %v4698_v12 }
 0xc26   : > { %5222 = vmatpush3.bf16.msra.mxu1 %v3326_v16  ;;  %5223 = vmatprep.mubr.msk.bf16.mxu1 %vm5453_vm0, %v5452_v4 }
 0xc27   : > { %v3372_v17 = vpop.permute.xlu1 %3371  ;;  %v3370_v18 = vpop.permute.xlu0 %3369  ;;  %5233 = vmatprep.subr.bf16.mxu1 %v5452_v4 }
 0xc28   : > { %v3373_v20 = vsel %vm1391_vm11, %v3370_v18, %v3372_v17 }
 0xc29   : > { %v3378_v21 = vsel %vm507_vm3, %v3373_v20, 0 }
 0xc2a   : > { %5228 = vmatpush3.bf16.msra.mxu0 %v3378_v21 }
 0xc2b   : > { %v3424_v24 = vpop.permute.xlu1 %3423  ;;  %v3422_v26 = vpop.permute.xlu0 %3421  ;;  %5239 = vmatprep.subr.bf16.mxu0 %v5452_v4 }
 0xc2c   : > { %v3425_v27 = vsel %vm501_vm2, %v3422_v26, %v3424_v24 }
 0xc2d   : > { %v3430_v28 = vsel %vm507_vm3, %v3425_v27, 0  ;;  %5224 = vmatmul.mubr.msk.bf16.vlgmr.msra.gmra.mrb[92].mxu1 %vm503_vm4, %v4699_v22  ;;  %5230 = vmatmul.mubr.msk.bf16.vlgmr.msra.gmra.mrb[112].mxu0 %vm503_vm4, %v4700_v23 }
 0xc2e   : > { %5234 = vmatpush3.bf16.msra.mxu1 %v3430_v28  ;;  %5235 = vmatprep.mubr.msk.bf16.mxu1 %vm5453_vm0, %v5452_v4 }
 0xc2f   : > { %v3476_v29 = vpop.permute.xlu1 %3475  ;;  %v3474_v30 = vpop.permute.xlu0 %3473  ;;  %5245 = vmatprep.subr.bf16.mxu1 %v5452_v4  ;;  %5241 = vmatprep.mubr.msk.bf16.mxu0 %vm5453_vm0, %v5452_v4 }
 0xc30   : > { %v3477_v31 = vsel %vm608_vm5, %v3474_v30, %v3476_v29 }
 0xc31   : > { %v3482_v32 = vsel %vm507_vm3, %v3477_v31, 0 }
 0xc32   : > { %5240 = vmatpush3.bf16.msra.mxu0 %v3482_v32 }
 0xc33   : > { %v3528_v35 = vpop.permute.xlu1 %3527  ;;  %v3526_v36 = vpop.permute.xlu0 %3525  ;;  %5251 = vmatprep.subr.bf16.mxu0 %v5452_v4 }
 0xc34   : > { %v3529_v37 = vsel %vm1548_vm12, %v3526_v36, %v3528_v35 }
 0xc35   : > { %v3534_v38 = vsel %vm507_vm3, %v3529_v37, 0  ;;  %5236 = vmatmul.mubr.msk.bf16.vlgmr.msra.gmra.mrb[96].mxu1 %vm503_vm4, %v4701_v33  ;;  %5242 = vmatmul.mubr.msk.bf16.vlgmr.msra.gmra.mrb[116].mxu0 %vm503_vm4, %v4702_v34 }
 0xc36   : > { %5246 = vmatpush3.bf16.msra.mxu1 %v3534_v38  ;;  %5247 = vmatprep.mubr.msk.bf16.mxu1 %vm5453_vm0, %v5452_v4 }
 0xc37   : > { %v3580_v39 = vpop.permute.xlu1 %3579  ;;  %v3578_v40 = vpop.permute.xlu0 %3577  ;;  %5257 = vmatprep.subr.bf16.mxu1 %v5452_v4  ;;  %5253 = vmatprep.mubr.msk.bf16.mxu0 %vm5453_vm0, %v5452_v4 }
 0xc38   : > { %v3581_v41 = vsel %vm821_vm6, %v3578_v40, %v3580_v39 }
 0xc39   : > { %v3586_v42 = vsel %vm507_vm3, %v3581_v41, 0 }
 0xc3a   : > { %5252 = vmatpush3.bf16.msra.mxu0 %v3586_v42 }
 0xc3b   : > { %v3632_v46 = vpop.permute.xlu1 %3631  ;;  %v3630_v47 = vpop.permute.xlu0 %3629  ;;  %5263 = vmatprep.subr.bf16.mxu0 %v5452_v4 }
 0xc3c   : > { %v3633_v55 = vsel %vm926_vm7, %v3630_v47, %v3632_v46 }
 0xc3d   : > { %v3638_v48 = vsel %vm507_vm3, %v3633_v55, 0  ;;  %5248 = vmatmul.mubr.msk.bf16.vlgmr.msra.gmra.mrb[100].mxu1 %vm503_vm4, %v4703_v44  ;;  %5254 = vmatmul.mubr.msk.bf16.vlgmr.msra.gmra.mrb[120].mxu0 %vm503_vm4, %v4704_v45 }
 0xc3e   : > { %5258 = vmatpush3.bf16.msra.mxu1 %v3638_v48  ;;  %5259 = vmatprep.mubr.msk.bf16.mxu1 %vm5453_vm0, %v5452_v4 }
 0xc3f   : > { %5269 = vmatprep.subr.bf16.mxu1 %v5452_v4  ;;  %5265 = vmatprep.mubr.msk.bf16.mxu0 %vm5453_vm0, %v5452_v4 }
 0xc45   : > { %5260 = vmatmul.mubr.msk.bf16.vlgmr.msra.gmra.mrb[104].mxu1 %vm503_vm4, %v4705_v49  ;;  %v4717_v49 = vld [vmem:[%s6406_s8 + $0xb4] sm:$0xf] }
 0xc46   : > { %5271 = vmatprep.mubr.msk.bf16.mxu1 %vm5453_vm0, %v5452_v4 }
 0xc4c   : > { %v3684_v34 = vpop.permute.xlu0 %3683 }
 0xc85   : > { %v3311_v50 = vpop.f32.mrb[108].mxu0 }
 0xc86   : > { %v5219_v51 = vpop.f32.mrb[109].mxu0 }
 0xc87   : > { %v3314_v52 = vpop.f32.mrb[110].mxu0  ;;  %v1096_v51 = vld [vmem:[%s6405_s7] sm:$0xff] }
 0xc88   : > { %v5220_v53 = vpop.f32.mrb[111].mxu0  ;;  %v4192_v52 = vld [vmem:[%s6409_s11 + $0x8] sm:$0xff] }
 0xc89   : > { %v4191_v53 = vld [vmem:[%s6409_s11] sm:$0xff] }
 0xcf8   : > { %v3266_v54 = vpop.f32.mrb[88].mxu1 }
 0xcf9   : > { %v3312_v56 = vadd.f32 %v3311_v50, %v3266_v54  ;;  %v5213_v57 = vpop.f32.mrb[89].mxu1  ;;  %v4726_v50 = vld [vmem:[%s6407_s9 + $0x28] sm:$0xff] }
 0xcfa   : > { %v3269_v58 = vpop.f32.mrb[90].mxu1 }
 0xcfb   : > { %v5214_v59 = vpop.f32.mrb[91].mxu1 }
 0xcfc   : > { %v4718_v59 = vld [vmem:[%s6406_s8 + $0xb8] sm:$0xf] }
 0xd00   : > { %v3362_v60 = vpop.f32.mrb[92].mxu1  ;;  %v3414_v61 = vpop.f32.mrb[112].mxu0 }
 0xd01   : > { %v3368_v62 = vadd.f32 %v3362_v60, %v3312_v56  ;;  %v5225_v0 = vpop.f32.mrb[93].mxu1  ;;  %v5231_v1 = vpop.f32.mrb[113].mxu0 }
 0xd02   : > { %v3365_v2 = vpop.f32.mrb[94].mxu1  ;;  %v3417_v3 = vpop.f32.mrb[114].mxu0 }
 0xd03   : > { %v3420_v5 = vadd.f32 %v3414_v61, %v3368_v62  ;;  %v5226_v6 = vpop.f32.mrb[95].mxu1  ;;  %v5232_v7 = vpop.f32.mrb[115].mxu0 }
 0xd04   : > { %v4719_v6 = vld [vmem:[%s6406_s8 + $0xbc] sm:$0xf]  ;;  %v4720_v7 = vld [vmem:[%s6406_s8 + $0xc0] sm:$0xf] }
 0xd08   : > { %v3466_v9 = vpop.f32.mrb[96].mxu1  ;;  %v3518_v10 = vpop.f32.mrb[116].mxu0 }
 0xd09   : > { %v3472_v11 = vadd.f32 %v3466_v9, %v3420_v5  ;;  %v5237_v12 = vpop.f32.mrb[97].mxu1  ;;  %v5243_v13 = vpop.f32.mrb[117].mxu0 }
 0xd0a   : > { %v3469_v14 = vpop.f32.mrb[98].mxu1  ;;  %v3521_v15 = vpop.f32.mrb[118].mxu0 }
 0xd0b   : > { %v3524_v16 = vadd.f32 %v3518_v10, %v3472_v11  ;;  %v5238_v17 = vpop.f32.mrb[99].mxu1  ;;  %v5244_v18 = vpop.f32.mrb[119].mxu0 }
 0xd0c   : > { %v4721_v17 = vld [vmem:[%s6406_s8 + $0xc4] sm:$0xf]  ;;  %v4722_v18 = vld [vmem:[%s6406_s8 + $0xc8] sm:$0xf] }
 0xd10   : > { %v3570_v20 = vpop.f32.mrb[100].mxu1  ;;  %v3622_v21 = vpop.f32.mrb[120].mxu0 }
 0xd11   : > { %v3576_v22 = vadd.f32 %v3570_v20, %v3524_v16  ;;  %v5249_v23 = vpop.f32.mrb[101].mxu1  ;;  %v5255_v24 = vpop.f32.mrb[121].mxu0 }
 0xd12   : > { %v3573_v26 = vpop.f32.mrb[102].mxu1  ;;  %v3625_v27 = vpop.f32.mrb[122].mxu0 }
 0xd13   : > { %v3628_v28 = vadd.f32 %v3622_v21, %v3576_v22  ;;  %v5250_v29 = vpop.f32.mrb[103].mxu1  ;;  %v5256_v30 = vpop.f32.mrb[123].mxu0 }
 0xd14   : > { %v4723_v29 = vld [vmem:[%s6406_s8 + $0xcc] sm:$0xf]  ;;  %v4724_v30 = vld [vmem:[%s6406_s8 + $0xd0] sm:$0xf] }
 0xd18   : > { %v3674_v31 = vpop.f32.mrb[104].mxu1 }
 0xd19   : > { %v3680_v32 = vadd.f32 %v3674_v31, %v3628_v28  ;;  %v5261_v33 = vpop.f32.mrb[105].mxu1 }
 0xd1a   : > { %v3677_v35 = vpop.f32.mrb[106].mxu1 }
 0xd1b   : > { %v3686_v36 = vadd.f32 %v3684_v34, %v3680_v32  ;;  %v5262_v37 = vpop.f32.mrb[107].mxu1  ;;  %v4725_v35 = vld [vmem:[%s6406_s8 + $0xd4] sm:$0xf] }
 0xd1d   : > { %v4716_v38 = vmul.f32 -1.442695, %v3686_v36 }
 0xd1f   : > { %5421 = vpow2.f32 %v4716_v38 }
 0xd29   : > { %v5422_v39 = vpop.eup %5421 }
 0xd2a   : > { %v3690_v40 = vadd.f32 1.0, %v5422_v39 }
 0xd2c   : > { %5423 = vrcp.f32 %v3690_v40 }
 0xd36   : > { %v5424_v41 = vpop.eup %5423 }
 0xd37   : > { %v3693_v42 = vmul.f32 %v5424_v41, %v3686_v36 }
 0xd39   : > { %v3694_v44 = vmul.f32 %v6024_v19, %v3693_v42 }
 0xd3b   : > { %v3695_v45 = vpack.c.bf16 %v3694_v44, %v3694_v44 }
 0xd3d   : > { %3709 = vrot.lane.b32.xlu1 %v3695_v45, %s5451_s27 }
 0xdaf   : > { %v3710_v46 = vpop.permute.xlu1 %3709 }
 0xdb0   : > { %v3712_v47 = vsel %vm442_vm1, 0, %v3710_v46  ;;  %v3713_v55 = vsel %vm442_vm1, %v3710_v46, 0 }
 0xdb1   : > { %3718 = vrot.lane.b32.xlu1 %v3713_v55, %s5459_s18  ;;  %3716 = vrot.lane.b32.xlu0 %v3712_v47, %s5459_s18  ;;  %v3770_v48 = vsel %vm507_vm3, %v3712_v47, 0 }
 0xdb2   : > { %5270 = vmatpush3.bf16.msra.mxu1 %v3770_v48  ;;  %v4328_v48 = vsel %vm507_vm3, %v5916_v43, 0  ;;  %v5395_v43 = vld [vmem:[%s6408_s10 + $0x18] sm:$0xff]  }
 0xdb3   : > { %5281 = vmatprep.subr.bf16.mxu1 %v5452_v4 }
 0xdb5   : > { %3814 = vrot.lane.b32.xlu1 %v3713_v55, %s5460_s23  ;;  %3812 = vrot.lane.b32.xlu0 %v3712_v47, %s5460_s23 }
 0xdb6   : > { %5272 = vmatmul.mubr.msk.bf16.vlgmr.msra.gmra.mrb[108].mxu1 %vm503_vm4, %v4717_v49 }
 0xdb7   : > { %5283 = vmatprep.mubr.msk.bf16.mxu1 %vm5453_vm0, %v5452_v4 }
 0xdb9   : > { %3866 = vrot.lane.b32.xlu1 %v3713_v55, %s5461_s24  ;;  %3864 = vrot.lane.b32.xlu0 %v3712_v47, %s5461_s24 }
 0xdbd   : > { %3918 = vrot.lane.b32.xlu1 %v3713_v55, %s5454_s28  ;;  %3916 = vrot.lane.b32.xlu0 %v3712_v47, %s5454_s28 }
 0xdc1   : > { %3970 = vrot.lane.b32.xlu1 %v3713_v55, %s5455_s29  ;;  %3968 = vrot.lane.b32.xlu0 %v3712_v47, %s5455_s29 }
 0xdc5   : > { %4022 = vrot.lane.b32.xlu1 %v3713_v55, %s5462_s26  ;;  %4020 = vrot.lane.b32.xlu0 %v3712_v47, %s5462_s26 }
 0xdc9   : > { %4074 = vrot.lane.b32.xlu1 %v3713_v55, %s5456_s30  ;;  %4072 = vrot.lane.b32.xlu0 %v3712_v47, %s5456_s30 }
 0xdcd   : > { %4126 = vrot.lane.b32.xlu1 %v3713_v55, %s5457_s13  ;;  %4124 = vrot.lane.b32.xlu0 %v3712_v47, %s5457_s13  ;;  %v5392_v47 = vld [vmem:[%s6408_s10] sm:$0xff]   ;;  %v5393_v55 = vld [vmem:[%s6408_s10 + $0x8] sm:$0xff]   ;;  %s433_s13 = scalar_lea.vmem %s6410_s12, %s4762_s25 }
 0xdd1   : > { %4178 = vperm.xlu1 %5386, %v4726_v50   ;;  %1099 = vperm.xlu0 %5385, %v1096_v51   ;;  %v5394_v50 = vld [vmem:[%s6408_s10 + $0x10] sm:$0xff]  }
 0xdd5   : > { %4254 = vperm.xlu1 %5386, %v4192_v52   ;;  %4249 = vperm.xlu0 %5385, %v4191_v53   ;;  %v4385_v53 = vsel %vm507_vm3, %v6130_v63, 0 }
 0xe23   : > { %v3719_v54 = vpop.permute.xlu1 %3718  ;;  %v3717_v56 = vpop.permute.xlu0 %3716 }
 0xe24   : > { %v3720_v57 = vsel %vm1241_vm9, %v3717_v56, %v3719_v54 }
 0xe25   : > { %v3725_v58 = vsel %vm507_vm3, %v3720_v57, 0 }
 0xe26   : > { %5264 = vmatpush3.bf16.msra.mxu0 %v3725_v58 }
 0xe27   : > { %v3815_v60 = vpop.permute.xlu1 %3814  ;;  %v3813_v61 = vpop.permute.xlu0 %3812  ;;  %5275 = vmatprep.subr.bf16.mxu0 %v5452_v4 }
 0xe28   : > { %v3816_v62 = vsel %vm1338_vm10, %v3813_v61, %v3815_v60 }
 0xe29   : > { %v3821_v0 = vsel %vm507_vm3, %v3816_v62, 0  ;;  %5266 = vmatmul.mubr.msk.bf16.vlgmr.msra.gmra.mrb[124].mxu0 %vm503_vm4, %v4718_v59 }
 0xe2a   : > { %5276 = vmatpush3.bf16.msra.mxu0 %v3821_v0  ;;  %5277 = vmatprep.mubr.msk.bf16.mxu0 %vm5453_vm0, %v5452_v4 }
 0xe2b   : > { %v3867_v1 = vpop.permute.xlu1 %3866  ;;  %v3865_v2 = vpop.permute.xlu0 %3864  ;;  %5287 = vmatprep.subr.bf16.mxu0 %v5452_v4 }
 0xe2c   : > { %v3868_v3 = vsel %vm1391_vm11, %v3865_v2, %v3867_v1 }
 0xe2d   : > { %v3873_v5 = vsel %vm507_vm3, %v3868_v3, 0 }
 0xe2e   : > { %5282 = vmatpush3.bf16.msra.mxu1 %v3873_v5 }
 0xe2f   : > { %v3919_v9 = vpop.permute.xlu1 %3918  ;;  %v3917_v10 = vpop.permute.xlu0 %3916  ;;  %5293 = vmatprep.subr.bf16.mxu1 %v5452_v4 }
 0xe30   : > { %v3920_v11 = vsel %vm501_vm2, %v3917_v10, %v3919_v9 }
 0xe31   : > { %v3925_v12 = vsel %vm507_vm3, %v3920_v11, 0  ;;  %5278 = vmatmul.mubr.msk.bf16.vlgmr.msra.gmra.mrb[128].mxu0 %vm503_vm4, %v4719_v6  ;;  %5284 = vmatmul.mubr.msk.bf16.vlgmr.msra.gmra.mrb[112].mxu1 %vm503_vm4, %v4720_v7 }
 0xe32   : > { %5288 = vmatpush3.bf16.msra.mxu0 %v3925_v12  ;;  %5289 = vmatprep.mubr.msk.bf16.mxu0 %vm5453_vm0, %v5452_v4 }
 0xe33   : > { %v3971_v13 = vpop.permute.xlu1 %3970  ;;  %v3969_v14 = vpop.permute.xlu0 %3968  ;;  %5299 = vmatprep.subr.bf16.mxu0 %v5452_v4  ;;  %5295 = vmatprep.mubr.msk.bf16.mxu1 %vm5453_vm0, %v5452_v4 }
 0xe34   : > { %v3972_v15 = vsel %vm608_vm5, %v3969_v14, %v3971_v13 }
 0xe35   : > { %v3977_v16 = vsel %vm507_vm3, %v3972_v15, 0 }
 0xe36   : > { %5294 = vmatpush3.bf16.msra.mxu1 %v3977_v16 }
 0xe37   : > { %v4023_v20 = vpop.permute.xlu1 %4022  ;;  %v4021_v21 = vpop.permute.xlu0 %4020  ;;  %5305 = vmatprep.subr.bf16.mxu1 %v5452_v4 }
 0xe38   : > { %v4024_v22 = vsel %vm1548_vm12, %v4021_v21, %v4023_v20 }
 0xe39   : > { %v4029_v23 = vsel %vm507_vm3, %v4024_v22, 0  ;;  %5290 = vmatmul.mubr.msk.bf16.vlgmr.msra.gmra.mrb[132].mxu0 %vm503_vm4, %v4721_v17  ;;  %5296 = vmatmul.mubr.msk.bf16.vlgmr.msra.gmra.mrb[116].mxu1 %vm503_vm4, %v4722_v18 }
 0xe3a   : > { %5300 = vmatpush3.bf16.msra.mxu0 %v4029_v23  ;;  %5301 = vmatprep.mubr.msk.bf16.mxu0 %vm5453_vm0, %v5452_v4 }
 0xe3b   : > { %v4075_v24 = vpop.permute.xlu1 %4074  ;;  %v4073_v26 = vpop.permute.xlu0 %4072  ;;  %5311 = vmatprep.subr.bf16.mxu0 %v5452_v4  ;;  %5307 = vmatprep.mubr.msk.bf16.mxu1 %vm5453_vm0, %v5452_v4 }
 0xe3c   : > { %v4076_v27 = vsel %vm821_vm6, %v4073_v26, %v4075_v24 }
 0xe3d   : > { %v4081_v28 = vsel %vm507_vm3, %v4076_v27, 0 }
 0xe3e   : > { %5306 = vmatpush3.bf16.msra.mxu1 %v4081_v28 }
 0xe3f   : > { %v4127_v31 = vpop.permute.xlu1 %4126  ;;  %v4125_v32 = vpop.permute.xlu0 %4124  ;;  %5317 = vmatprep.subr.bf16.mxu1 %v5452_v4 }
 0xe40   : > { %v4128_v33 = vsel %vm926_vm7, %v4125_v32, %v4127_v31 }
 0xe41   : > { %v4133_v34 = vsel %vm507_vm3, %v4128_v33, 0  ;;  %5302 = vmatmul.mubr.msk.bf16.vlgmr.msra.gmra.mrb[136].mxu0 %vm503_vm4, %v4723_v29  ;;  %5308 = vmatmul.mubr.msk.bf16.vlgmr.msra.gmra.mrb[120].mxu1 %vm503_vm4, %v4724_v30 }
 0xe42   : > { %5312 = vmatpush3.bf16.msra.mxu0 %v4133_v34  ;;  %5313 = vmatprep.mubr.msk.bf16.mxu0 %vm5453_vm0, %v5452_v4 }
 0xe43   : > { %5319 = vmatprep.mubr.msk.bf16.mxu1 %vm5453_vm0, %v5452_v4 }
 0xe49   : > { %5314 = vmatmul.mubr.msk.bf16.vlgmr.msra.gmra.mrb[140].mxu0 %vm503_vm4, %v4725_v35 }
 0xe50   : > { %v1100_v36 = vpop.permute.xlu0 %1099  ;;  %v4179_v32 = vpop.permute.xlu1 %4178 }
 0xe51   : > { %v1102_v37 = vadd.f32 %v1100_v36, %v5704_v8  ;;  %v4271_v8 = vsel %vm507_vm3, %v5707_v25, 0 }
 0xe53   : > { %v4620_v38 = vmul.f32 -1.442695, %v1102_v37 }
 0xe55   : > { %5425 = vpow2.f32 %v4620_v38 }
 0xe5f   : > { %v5426_v39 = vpop.eup %5425 }
 0xe60   : > { %v1106_v40 = vadd.f32 1.0, %v5426_v39 }
 0xe62   : > { %5427 = vrcp.f32 %v1106_v40 }
 0xe6c   : > { %v5428_v41 = vpop.eup %5427 }
 0xe6d   : > { %v1109_v42 = vmul.f32 %v5428_v41, %v1102_v37 }
 0xe6f   : > { %v1110_v44 = vmul.f32 %v6024_v19, %v1109_v42 }
 0xe71   : > { %v1111_v45 = vpack.c.bf16 %v1110_v44, %v1110_v44 }
 0xe73   : > { %v4204_v46 = vsel %vm507_vm3, %v1111_v45, 0  ;;  %v5396_v45 = vld [vmem:[%s6408_s10 + $0x20] sm:$0xff]  }
 0xe74   : > { %5318 = vmatpush3.bf16.msra.mxu1 %v4204_v46  ;;  %v4250_v46 = vpop.permute.xlu0 %4249 }
 0xe75   : > { %5323 = vmatprep.subr.bf16.mxu1 %v5452_v4 }
 0xe77   : > { %5320 = vmatmul.mubr.msk.bf16.vlgmr.msra.gmra.mrb[124].mxu1 %vm503_vm4, %v5392_v47 }
 0xe78   : > { %5324 = vmatpush3.bf16.msra.mxu1 %v4271_v8  ;;  %5325 = vmatprep.mubr.msk.bf16.mxu1 %vm5453_vm0, %v5452_v4 }
 0xe79   : > { %5329 = vmatprep.subr.bf16.mxu1 %v5452_v4 }
 0xe83   : > { %5326 = vmatmul.mubr.msk.bf16.vlgmr.msra.gmra.mrb[124].mxu1 %vm503_vm4, %v5393_v55 }
 0xe84   : > { %5330 = vmatpush3.bf16.msra.mxu1 %v4328_v48  ;;  %5331 = vmatprep.mubr.msk.bf16.mxu1 %vm5453_vm0, %v5452_v4  ;;  %v4255_v48 = vpop.permute.xlu1 %4254 }
 0xe85   : > { %5335 = vmatprep.subr.bf16.mxu1 %v5452_v4 }
 0xe89   : > { %v3806_v25 = vpop.f32.mrb[108].mxu1 }
 0xe8a   : > { %v5273_v49 = vpop.f32.mrb[109].mxu1 }
 0xe8b   : > { %v3809_v51 = vpop.f32.mrb[110].mxu1 }
 0xe8c   : > { %v5274_v52 = vpop.f32.mrb[111].mxu1 }
 0xe8f   : > { %5332 = vmatmul.mubr.msk.bf16.vlgmr.msra.gmra.mrb[124].mxu1 %vm503_vm4, %v5394_v50 }
 0xe90   : > { %5336 = vmatpush3.bf16.msra.mxu1 %v4385_v53  ;;  %5337 = vmatprep.mubr.msk.bf16.mxu1 %vm5453_vm0, %v5452_v4 }
 0xe91   : > { %5341 = vmatprep.subr.bf16.mxu1 %v5452_v4 }
 0xe9b   : > { %5338 = vmatmul.mubr.msk.bf16.vlgmr.msra.gmra.mrb[124].mxu1 %vm503_vm4, %v5395_v43 }
 0xe9c   : > { %5343 = vmatprep.mubr.msk.bf16.mxu1 %vm5453_vm0, %v5452_v4 }
 0xefc   : > { %v3761_v54 = vpop.f32.mrb[124].mxu0 }
 0xefd   : > { %v3807_v56 = vadd.f32 %v3806_v25, %v3761_v54  ;;  %v5267_v57 = vpop.f32.mrb[125].mxu0 }
 0xefe   : > { %v3764_v58 = vpop.f32.mrb[126].mxu0 }
 0xeff   : > { %v5268_v63 = vpop.f32.mrb[127].mxu0 }
 0xf04   : > { %v3857_v59 = vpop.f32.mrb[128].mxu0  ;;  %v3909_v60 = vpop.f32.mrb[112].mxu1 }
 0xf05   : > { %v3863_v61 = vadd.f32 %v3857_v59, %v3807_v56  ;;  %v5279_v62 = vpop.f32.mrb[129].mxu0  ;;  %v5285_v0 = vpop.f32.mrb[113].mxu1  ;;  %v5442_v59 = vld [vmem:[%s6400_s2] ss:$0 sm:$0xff] }
 0xf06   : > { %v3860_v1 = vpop.f32.mrb[130].mxu0  ;;  %v3912_v2 = vpop.f32.mrb[114].mxu1 }
 0xf07   : > { %v3915_v3 = vadd.f32 %v3909_v60, %v3863_v61  ;;  %v5280_v5 = vpop.f32.mrb[131].mxu0  ;;  %v5286_v6 = vpop.f32.mrb[115].mxu1 }
 0xf0c   : > { %v3961_v7 = vpop.f32.mrb[132].mxu0  ;;  %v4013_v9 = vpop.f32.mrb[116].mxu1 }
 0xf0d   : > { %v3967_v10 = vadd.f32 %v3961_v7, %v3915_v3  ;;  %v5291_v11 = vpop.f32.mrb[133].mxu0  ;;  %v5297_v4 = vpop.f32.mrb[117].mxu1 }
 0xf0e   : > { %v3964_v12 = vpop.f32.mrb[134].mxu0  ;;  %v4016_v13 = vpop.f32.mrb[118].mxu1 }
 0xf0f   : > { %v4019_v14 = vadd.f32 %v4013_v9, %v3967_v10  ;;  %v5292_v15 = vpop.f32.mrb[135].mxu0  ;;  %v5298_v16 = vpop.f32.mrb[119].mxu1 }
 0xf14   : > { %v4065_v17 = vpop.f32.mrb[136].mxu0  ;;  %v4117_v18 = vpop.f32.mrb[120].mxu1 }
 0xf15   : > { %v4071_v20 = vadd.f32 %v4065_v17, %v4019_v14  ;;  %v5303_v21 = vpop.f32.mrb[137].mxu0  ;;  %v5309_v22 = vpop.f32.mrb[121].mxu1 }
 0xf16   : > { %v4068_v23 = vpop.f32.mrb[138].mxu0  ;;  %v4120_v24 = vpop.f32.mrb[122].mxu1 }
 0xf17   : > { %v4123_v26 = vadd.f32 %v4117_v18, %v4071_v20  ;;  %v5304_v27 = vpop.f32.mrb[139].mxu0  ;;  %v5310_v28 = vpop.f32.mrb[123].mxu1 }
 0xf1c   : > { %v4169_v29 = vpop.f32.mrb[140].mxu0 }
 0xf1d   : > { %v4175_v30 = vadd.f32 %v4169_v29, %v4123_v26  ;;  %v5315_v31 = vpop.f32.mrb[141].mxu0 }
 0xf1e   : > { %v4172_v33 = vpop.f32.mrb[142].mxu0 }
 0xf1f   : > { %v4181_v34 = vadd.f32 %v4179_v32, %v4175_v30  ;;  %v5316_v35 = vpop.f32.mrb[143].mxu0 }
 0xf21   : > { %v4736_v36 = vmul.f32 -1.442695, %v4181_v34 }
 0xf23   : > { %5429 = vpow2.f32 %v4736_v36 }
 0xf2d   : > { %v5430_v37 = vpop.eup %5429 }
 0xf2e   : > { %v4185_v38 = vadd.f32 1.0, %v5430_v37 }
 0xf30   : > { %5431 = vrcp.f32 %v4185_v38 }
 0xf3a   : > { %v5432_v39 = vpop.eup %5431 }
 0xf3b   : > { %v4188_v40 = vmul.f32 %v5432_v39, %v4181_v34 }
 0xf3d   : > { %v4189_v41 = vmul.f32 %v6024_v19, %v4188_v40 }
 0xf3f   : > { %v4190_v42 = vpack.c.bf16 %v4189_v41, %v4189_v41 }
 0xf41   : > { %v4442_v44 = vsel %vm507_vm3, %v4190_v42, 0 }
 0xf42   : > { %5342 = vmatpush3.bf16.msra.mxu1 %v4442_v44 }
 0xf45   : > { %5344 = vmatmul.mubr.msk.bf16.vlgmr.msra.gmra.mrb[124].mxu1 %vm503_vm4, %v5396_v45 }
0x1018   : > { %v4478_v47 = vpop.f32.mrb[124].mxu1 }
0x1019   : > { %v5347_v8 = vadd.f32 %v4478_v47, %v4250_v46  ;;  %v5345_v55 = vpop.f32.mrb[125].mxu1 }
0x101a   : > { %v4481_v25 = vpop.f32.mrb[126].mxu1 }
0x101b   : > { %v4755_v49 = vmul.f32 -1.442695, %v5347_v8  ;;  %v5348_v50 = vadd.f32 %v4481_v25, %v4255_v48  ;;  %v5346_v51 = vpop.f32.mrb[127].mxu1 }
0x101d   : > { %5433 = vpow2.f32 %v4755_v49  ;;  %v4756_v19 = vmul.f32 -1.442695, %v5348_v50 }
0x101f   : > { %5435 = vpow2.f32 %v4756_v19 }
0x1027   : > { %v5434_v52 = vpop.eup %5433 }
0x1028   : > { %v4493_v53 = vadd.f32 1.0, %v5434_v52 }
0x1029   : > { %v5436_v43 = vpop.eup %5435 }
0x102a   : > { %5437 = vrcp.f32 %v4493_v53  ;;  %v4494_v54 = vadd.f32 1.0, %v5436_v43 }
0x102c   : > { %5439 = vrcp.f32 %v4494_v54 }
0x1034   : > { %v5438_v56 = vpop.eup %5437 }
0x1035   : > { %v4499_v57 = vmul.f32 %v5438_v56, %v5347_v8 }
0x1036   : > { %v5440_v58 = vpop.eup %5439 }
0x1037   : > { %v4500_v63 = vmul.f32 %v5440_v58, %v5348_v50  ;;  %v4501_v60 = vmul.f32 %v5442_v59, %v4499_v57 }
0x1039   : > { %v4502_v61 = vmul.f32 %v5442_v59, %v4500_v63 }
0x103b   : > { %v4769_v62 = vpack.c.bf16 %v4502_v61, %v4501_v60 }
0x103d   : > { %4770 = vst [vmem:[%s433_s13] sm:$0xff] %v4769_v62  }
0x103e PF: > { %s22_s21 = sadd.s32 1, %s5449_s21  }
0x103f   : > { %p19_p4 = scmp.ge.s32.totalorder %s22_s21, 4  }
0x1041   :  { %21 = sbr.rel (!%p19_p4) target bundleno = 1 (0x1), region = 129 }

</bundles_post_ra>
